<compile_context>
chip_gen: v7x
topology: tpu7x:2x2x1
jax: 0.10.0
libtpu: 0.0.40
codegen_flags: <defaults>
</compile_context>

<pallas_src>
import functools

import jax
import jax.numpy as jnp
from jax import lax
from jax.experimental import pallas as pl
from jax.experimental.pallas import tpu as pltpu

LANE = 128


def _round_up(x, m):
    return (x + m - 1) // m * m


# ---------------------------------------------------------------------------
# Kernel: one image (H*W rows, lane-padded channels) per grid step.
# ---------------------------------------------------------------------------
def _mbconv_kernel(x_ref, w_exp_ref, b1_ref, w_dw_ref, b2_ref, w_proj_ref,
                   b3_ref, w_se1_ref, b_se1_ref, w_se2_ref, b_se2_ref,
                   out_ref, apad_ref, *, H, W):
    HW = H * W
    Ho, Wo = H // 2, W // 2
    Cmid_p = w_dw_ref.shape[-1]
    Cout_p = out_ref.shape[-1]
    OFF = W + 8                      # start row of the live activation in apad

    # ---- expand 1x1 (bf16 MXU, f32 acc; BN1 scale folded into weight) ------
    a = jnp.dot(x_ref[0], w_exp_ref[...], preferred_element_type=jnp.float32)
    a = jnp.maximum(a + b1_ref[...], 0.0)                     # (HW, Cmid_p) f32

    # ---- stage into zero-row-padded VMEM scratch ----------------------------
    # Layout of apad (flat rows): [W+8 zero rows | a (HW rows) | W+8 zero rows]
    # so every dy window of the stencil is a plain row slice and the h-edge
    # taps read zeros (no h masks, no rotates).
    tail = apad_ref.shape[0] - (OFF + HW)
    apad_ref[pl.ds(0, OFF), :] = jnp.zeros((OFF, Cmid_p), jnp.float32)
    apad_ref[pl.ds(OFF, HW), :] = a
    apad_ref[pl.ds(OFF + HW, tail), :] = jnp.zeros((tail, Cmid_p), jnp.float32)

    # ---- depthwise 3x3, stride 1, pad 1 (BN2 scale folded into taps) -------
    # w-edge predicates hoisted out of the 9-tap loop (computed once).
    w_id = lax.broadcasted_iota(jnp.int32, (HW, 1), 0) % W
    mask_m = w_id > 0                # valid source pixels for dx = -1
    mask_p = w_id < (W - 1)          # valid source pixels for dx = +1
    w_dw = w_dw_ref[...]             # (3, 3, Cmid_p)

    acc = jnp.zeros((HW, Cmid_p), jnp.float32)
    for dy in (-1, 0, 1):
        for dx in (-1, 0, 1):
            v = apad_ref[pl.ds(OFF + dy * W + dx, HW), :]
            if dx == -1:
                v = jnp.where(mask_m, v, 0.0)
            elif dx == 1:
                v = jnp.where(mask_p, v, 0.0)
            acc = acc + v * w_dw[dy + 1, dx + 1].reshape(1, Cmid_p)
    b = jnp.maximum(acc + b2_ref[...], 0.0)                   # (HW, Cmid_p) f32

    # ---- project 1x1 (bf16 MXU, f32 acc; BN3 scale folded) + bias ----------
    y = jnp.dot(b.astype(jnp.bfloat16), w_proj_ref[...],
                preferred_element_type=jnp.float32)           # (HW, Cout_p)
    y = y + b3_ref[...]

    # ---- squeeze & excite (per-image global mean; bf16 SE weights) ---------
    se = jnp.mean(y, axis=0, keepdims=True)                   # (1, Cout_p)
    h = jnp.dot(se.astype(jnp.bfloat16), w_se1_ref[...],
                preferred_element_type=jnp.float32)
    h = jnp.maximum(h + b_se1_ref[...], 0.0)
    g = jnp.dot(h.astype(jnp.bfloat16), w_se2_ref[...],
                preferred_element_type=jnp.float32)
    g = jax.nn.sigmoid(g + b_se2_ref[...])                    # (1, Cout_p)
    y = y * g

    # ---- MaxPool2d(2, 2) ----------------------------------------------------
    yh = jnp.max(y.reshape(Ho, 2, W, Cout_p), axis=1)         # pool H
    yp = jnp.max(yh.reshape(Ho, Wo, 2, Cout_p), axis=2)       # pool W

    # Dropout2d: identity at inference.
    out_ref[...] = yp.reshape(1, Ho * Wo, Cout_p).astype(out_ref.dtype)


# ---------------------------------------------------------------------------
# Parameter preparation: fold BN scales into conv weights, pad channels to the
# lane width (Cmid to 256-multiples when large, to fill the v6e/v7x MXU),
# cast MXU operands to bf16.
# ---------------------------------------------------------------------------
def _prepare_kernel_params(p):
    Cin, Cmid = p["w_exp"].shape
    Cout = p["w_proj"].shape[1]
    red = p["w_se1"].shape[1]
    Cin_p = _round_up(Cin, LANE)
    Cmid_p = _round_up(Cmid, 256) if Cmid > LANE else LANE
    Cout_p = _round_up(Cout, LANE)
    red_p = _round_up(red, LANE)

    def pad2(a, rows, cols):
        return jnp.pad(a, ((0, rows - a.shape[0]), (0, cols - a.shape[1])))

    def pad_bias(v, n):
        return jnp.pad(v, (0, n - v.shape[0])).reshape(1, n).astype(jnp.float32)

    w_exp = pad2(p["w_exp"] * p["s1"][None, :], Cin_p, Cmid_p).astype(jnp.bfloat16)
    w_dw = jnp.pad(p["w_dw"] * p["s2"][None, None, :],
                   ((0, 0), (0, 0), (0, Cmid_p - Cmid))).astype(jnp.float32)
    w_proj = pad2(p["w_proj"] * p["s3"][None, :], Cmid_p, Cout_p).astype(jnp.bfloat16)
    w_se1 = pad2(p["w_se1"], Cout_p, red_p).astype(jnp.bfloat16)
    w_se2 = pad2(p["w_se2"], red_p, Cout_p).astype(jnp.bfloat16)

    weights = (w_exp, pad_bias(p["b1"], Cmid_p),
               w_dw, pad_bias(p["b2"], Cmid_p),
               w_proj, pad_bias(p["b3"], Cout_p),
               w_se1, pad_bias(p["b_se1"], red_p),
               w_se2, pad_bias(p["b_se2"], Cout_p))
    return weights, (Cin_p, Cmid_p, Cout_p, red_p)


# ---------------------------------------------------------------------------
# Core entry point: lane-padded flat NHWC in / out (chaining-friendly — no
# NCHW<->NHWC HBM round trips between blocks).
# ---------------------------------------------------------------------------
def mbconv_padded_nhwc(x_flat, weights, *, B, H, W, Cout_p):
    """x_flat: (B, H*W, Cin_p) bf16, channels zero-padded to a lane multiple.
    Returns (B, (H//2)*(W//2), Cout_p) f32, channels zero-padded."""
    assert H % 2 == 0 and W % 2 == 0, "MaxPool2d(2,2) assumes even H, W"
    assert W % 8 == 0, "aligned-slice depthwise assumes W % 8 == 0"
    HW = H * W
    Ho, Wo = H // 2, W // 2
    Cmid_p = weights[0].shape[1]
    Cin_p = x_flat.shape[-1]

    kernel = functools.partial(_mbconv_kernel, H=H, W=W)

    def _full(a):
        nd = a.ndim
        return pl.BlockSpec(a.shape, lambda b, _nd=nd: (0,) * _nd)

    x_spec = pl.BlockSpec((1, HW, Cin_p), lambda b: (b, 0, 0))
    out_spec = pl.BlockSpec((1, Ho * Wo, Cout_p), lambda b: (b, 0, 0))

    # padded-activation scratch: HW live rows + (W+8) zero rows top & bottom
    R = HW + 2 * W + 16

    grid_spec = pltpu.PrefetchScalarGridSpec(
        num_scalar_prefetch=0,
        grid=(B,),
        in_specs=[x_spec] + [_full(w) for w in weights],
        out_specs=out_spec,
        scratch_shapes=[pltpu.VMEM((R, Cmid_p), jnp.float32)],
    )

    return pl.pallas_call(
        kernel,
        out_shape=jax.ShapeDtypeStruct((B, Ho * Wo, Cout_p), jnp.float32),
        grid_spec=grid_spec,
        compiler_params=pltpu.CompilerParams(
            dimension_semantics=("parallel",),        # pipeline + v7x TC shard
            vmem_limit_bytes=32 * 1024 * 1024),       # explicit, safe on all gens
    )(x_flat, *weights)


# ---------------------------------------------------------------------------
# Convenience wrapper matching the PyTorch module's NCHW interface.
# ---------------------------------------------------------------------------
def mbconv_block(x_nchw, params):
    """x_nchw: (B, Cin, H, W) float32. Returns (B, Cout, H//2, W//2) float32."""
    B, Cin, H, W = x_nchw.shape
    Cout = params["w_proj"].shape[1]
    Ho, Wo = H // 2, W // 2

    weights, (Cin_p, _, Cout_p, _) = _prepare_kernel_params(params)

    # NCHW -> lane-dense flat NHWC, bf16 MXU operand.
    x = jnp.transpose(x_nchw, (0, 2, 3, 1)).reshape(B, H * W, Cin)
    x = jnp.pad(x, ((0, 0), (0, 0), (0, Cin_p - Cin))).astype(jnp.bfloat16)

    out = mbconv_padded_nhwc(x, weights, B=B, H=H, W=W, Cout_p=Cout_p)

    # Drop channel padding, back to NCHW (keep padded NHWC between blocks in
    # production to avoid this HBM round trip).
    out = out[..., :Cout].reshape(B, Ho, Wo, Cout)
    return jnp.transpose(out, (0, 3, 1, 2))


# ---------------------------------------------------------------------------
# Pure-JAX f32 reference (eval-mode semantics of the PyTorch module)
# ---------------------------------------------------------------------------
def mbconv_ref(x, p):
    a = jnp.einsum("bchw,cm->bmhw", x, p["w_exp"])
    a = jax.nn.relu(a * p["s1"][None, :, None, None] + p["b1"][None, :, None, None])
    k = jnp.transpose(p["w_dw"], (2, 0, 1))[:, None, :, :]        # (Cmid,1,3,3)
    b = lax.conv_general_dilated(
        a, k, window_strides=(1, 1), padding=((1, 1), (1, 1)),
        dimension_numbers=("NCHW", "OIHW", "NCHW"),
        feature_group_count=p["w_dw"].shape[2])
    b = jax.nn.relu(b * p["s2"][None, :, None, None] + p["b2"][None, :, None, None])
    y = jnp.einsum("bchw,cm->bmhw", b, p["w_proj"])
    y = y * p["s3"][None, :, None, None] + p["b3"][None, :, None, None]
    se = jnp.mean(y, axis=(2, 3))
    h = jax.nn.relu(se @ p["w_se1"] + p["b_se1"][None, :])
    g = jax.nn.sigmoid(h @ p["w_se2"] + p["b_se2"][None, :])
    y = y * g[:, :, None, None]
    return lax.reduce_window(y, -jnp.inf, lax.max,
                             (1, 1, 2, 2), (1, 1, 2, 2), "VALID")


def init_params(key, in_channels, out_channels, expansion=4):
    mid = in_channels * expansion
    red = out_channels // 4
    ks = jax.random.split(key, 10)

    def folded_bn(k, c):
        kg, kb, km, kv = jax.random.split(k, 4)
        gamma = 1.0 + 0.1 * jax.random.normal(kg, (c,))
        beta = 0.1 * jax.random.normal(kb, (c,))
        mean = 0.1 * jax.random.normal(km, (c,))
        var = 1.0 + 0.1 * jnp.abs(jax.random.normal(kv, (c,)))
        scale = gamma / jnp.sqrt(var + 1e-5)
        bias = beta - mean * scale
        return scale.astype(jnp.float32), bias.astype(jnp.float32)

    s1, b1 = folded_bn(ks[0], mid)
    s2, b2 = folded_bn(ks[1], mid)
    s3, b3 = folded_bn(ks[2], out_channels)

    return {
        # expand: torch weight (mid, in, 1, 1) -> (in, mid) matmul layout
        "w_exp": 0.1 * jax.random.normal(ks[3], (in_channels, mid), jnp.float32),
        # dwconv: torch weight (mid, 1, 3, 3) -> (3, 3, mid)
        "w_dw": 0.1 * jax.random.normal(ks[4], (3, 3, mid), jnp.float32),
        # project: torch weight (out, mid, 1, 1) -> (mid, out)
        "w_proj": 0.1 * jax.random.normal(ks[5], (mid, out_channels), jnp.float32),
        # SE 1x1 convs (with bias), matmul layout
        "w_se1": 0.1 * jax.random.normal(ks[6], (out_channels, red), jnp.float32),
        "b_se1": 0.1 * jax.random.normal(ks[7], (red,), jnp.float32),
        "w_se2": 0.1 * jax.random.normal(ks[8], (red, out_channels), jnp.float32),
        "b_se2": 0.1 * jax.random.normal(ks[9], (out_channels,), jnp.float32),
        "s1": s1, "b1": b1, "s2": s2, "b2": b2, "s3": s3, "b3": b3,
    }


if __name__ == "__main__":
    key = jax.random.PRNGKey(0)
    k_x, k_p = jax.random.split(key)

    B, Cin, H, W = 2, 4, 16, 16
    Cout, expansion = 8, 4

    x = jax.random.normal(k_x, (B, Cin, H, W), jnp.float32)
    params = init_params(k_p, Cin, Cout, expansion)

    out = jax.jit(mbconv_block)(x, params)
    jax.block_until_ready(out)
    assert out.shape == (B, Cout, H // 2, W // 2), out.shape

    # correctness vs pure-JAX f32 reference (loose tol: bf16 MXU/SE operands)
    ref = mbconv_ref(x, params)
    max_err = float(jnp.max(jnp.abs(out - ref)))
    assert jnp.allclose(out, ref, atol=3e-2, rtol=3e-2), max_err

    print("KERNEL_OK")
</pallas_src>

<mosaic_0001>
module attributes {stable_mosaic.version = 11 : i64} {
  func.func @_mbconv_kernel(%arg0: i32, %arg1: memref<1x256x128xbf16, #tpu.memory_space<vmem>>, %arg2: memref<128x128xbf16, #tpu.memory_space<vmem>>, %arg3: memref<1x128xf32, #tpu.memory_space<vmem>>, %arg4: memref<3x3x128xf32, #tpu.memory_space<vmem>>, %arg5: memref<1x128xf32, #tpu.memory_space<vmem>>, %arg6: memref<128x128xbf16, #tpu.memory_space<vmem>>, %arg7: memref<1x128xf32, #tpu.memory_space<vmem>>, %arg8: memref<128x128xbf16, #tpu.memory_space<vmem>>, %arg9: memref<1x128xf32, #tpu.memory_space<vmem>>, %arg10: memref<128x128xbf16, #tpu.memory_space<vmem>>, %arg11: memref<1x128xf32, #tpu.memory_space<vmem>>, %arg12: memref<1x64x128xf32, #tpu.memory_space<vmem>>, %arg13: memref<304x128xf32, #tpu.memory_space<vmem>>) attributes {dimension_semantics = [#tpu.dimension_semantics<parallel>], iteration_bounds = array<i64: 2>, scalar_prefetch = 0 : i64, scratch_operands = 1 : i64, tpu.core_type = #tpu.core_type<tc>, window_params = [{transform_indices = @transform_0, window_bounds = array<i64: 1, 256, 128>}, {pipeline_mode = #tpu.pipeline_mode<synchronous>, transform_indices = @transform_1, window_bounds = array<i64: 128, 128>}, {pipeline_mode = #tpu.pipeline_mode<synchronous>, transform_indices = @transform_2, window_bounds = array<i64: 1, 128>}, {pipeline_mode = #tpu.pipeline_mode<synchronous>, transform_indices = @transform_3, window_bounds = array<i64: 3, 3, 128>}, {pipeline_mode = #tpu.pipeline_mode<synchronous>, transform_indices = @transform_4, window_bounds = array<i64: 1, 128>}, {pipeline_mode = #tpu.pipeline_mode<synchronous>, transform_indices = @transform_5, window_bounds = array<i64: 128, 128>}, {pipeline_mode = #tpu.pipeline_mode<synchronous>, transform_indices = @transform_6, window_bounds = array<i64: 1, 128>}, {pipeline_mode = #tpu.pipeline_mode<synchronous>, transform_indices = @transform_7, window_bounds = array<i64: 128, 128>}, {pipeline_mode = #tpu.pipeline_mode<synchronous>, transform_indices = @transform_8, window_bounds = array<i64: 1, 128>}, {pipeline_mode = #tpu.pipeline_mode<synchronous>, transform_indices = @transform_9, window_bounds = array<i64: 128, 128>}, {pipeline_mode = #tpu.pipeline_mode<synchronous>, transform_indices = @transform_10, window_bounds = array<i64: 1, 128>}, {transform_indices = @transform_11, window_bounds = array<i64: 1, 64, 128>}]} {
    %c0 = arith.constant 0 : index
    %c0_0 = arith.constant 0 : index
    %c0_1 = arith.constant 0 : index
    %0 = vector.load %arg1[%c0, %c0_0, %c0_1] : memref<1x256x128xbf16, #tpu.memory_space<vmem>>, vector<1x256x128xbf16>
    %1 = vector.shape_cast %0 : vector<1x256x128xbf16> to vector<256x128xbf16>
    %c0_2 = arith.constant 0 : index
    %c0_3 = arith.constant 0 : index
    %2 = vector.load %arg2[%c0_2, %c0_3] : memref<128x128xbf16, #tpu.memory_space<vmem>>, vector<128x128xbf16>
    %cst = arith.constant dense<0.000000e+00> : vector<256x128xf32>
    %3 = tpu.matmul %1, %2, %cst {dimension_numbers = #tpu.dot_dimension_numbers<[1], [0], [0], [1], [0, 0, 1, 1], [], []>} : vector<256x128xbf16>, vector<128x128xbf16>, vector<256x128xf32> -> vector<256x128xf32>
    %c0_4 = arith.constant 0 : index
    %c0_5 = arith.constant 0 : index
    %4 = vector.load %arg3[%c0_4, %c0_5] : memref<1x128xf32, #tpu.memory_space<vmem>>, vector<1x128xf32>
    %5 = vector.broadcast %4 : vector<1x128xf32> to vector<256x128xf32>
    %6 = arith.addf %3, %5 : vector<256x128xf32>
    %cst_6 = arith.constant 0.000000e+00 : f32
    %7 = vector.broadcast %cst_6 : f32 to vector<256x128xf32>
    %8 = arith.maximumf %6, %7 : vector<256x128xf32>
    %cst_7 = arith.constant 0.000000e+00 : f32
    %9 = vector.broadcast %cst_7 : f32 to vector<24x128xf32>
    %c0_8 = arith.constant 0 : index
    %c0_9 = arith.constant 0 : index
    %10 = vector.load %arg13[%c0_8, %c0_9] : memref<304x128xf32, #tpu.memory_space<vmem>>, vector<24x128xf32>
    tpu.vector_store %arg13[%c0_8, %c0_9], %9 {strides = array<i32>} : memref<304x128xf32, #tpu.memory_space<vmem>>, vector<24x128xf32>,
    %c24 = arith.constant 24 : index
    %c0_10 = arith.constant 0 : index
    %11 = vector.load %arg13[%c24, %c0_10] : memref<304x128xf32, #tpu.memory_space<vmem>>, vector<256x128xf32>
    tpu.vector_store %arg13[%c24, %c0_10], %8 {strides = array<i32>} : memref<304x128xf32, #tpu.memory_space<vmem>>, vector<256x128xf32>,
    %cst_11 = arith.constant 0.000000e+00 : f32
    %12 = vector.broadcast %cst_11 : f32 to vector<24x128xf32>
    %c280 = arith.constant 280 : index
    %c0_12 = arith.constant 0 : index
    %13 = vector.load %arg13[%c280, %c0_12] : memref<304x128xf32, #tpu.memory_space<vmem>>, vector<24x128xf32>
    tpu.vector_store %arg13[%c280, %c0_12], %12 {strides = array<i32>} : memref<304x128xf32, #tpu.memory_space<vmem>>, vector<24x128xf32>,
    %14 = tpu.iota {dimensions = array<i32: 0>} : vector<256x1xi32>
    %c16_i32 = arith.constant 16 : i32
    %c0_i32 = arith.constant 0 : i32
    %15 = arith.cmpi eq, %c16_i32, %c0_i32 : i32
    %c1_i32 = arith.constant 1 : i32
    %16 = arith.select %15, %c1_i32, %c16_i32 : i32
    %17 = vector.broadcast %16 : i32 to vector<256x1xi32>
    %18 = arith.remsi %14, %17 : vector<256x1xi32>
    %c0_i32_13 = arith.constant 0 : i32
    %19 = vector.broadcast %c0_i32_13 : i32 to vector<256x1xi32>
    %20 = arith.cmpi ne, %18, %19 : vector<256x1xi32>
    %c0_i32_14 = arith.constant 0 : i32
    %21 = vector.broadcast %c0_i32_14 : i32 to vector<256x1xi32>
    %22 = arith.cmpi slt, %18, %21 : vector<256x1xi32>
    %c0_i32_15 = arith.constant 0 : i32
    %23 = arith.cmpi slt, %16, %c0_i32_15 : i32
    %24 = vector.broadcast %23 : i1 to vector<256x1xi1>
    %25 = vector.broadcast %24 : vector<256x1xi1> to vector<256x1xi1>
    %26 = arith.xori %22, %25 : vector<256x1xi1>
    %27 = arith.andi %26, %20 : vector<256x1xi1>
    %28 = vector.broadcast %16 : i32 to vector<256x1xi32>
    %29 = arith.addi %18, %28 : vector<256x1xi32>
    %30 = arith.select %27, %29, %18 : vector<256x1xi1>, vector<256x1xi32>
    %c0_i32_16 = arith.constant 0 : i32
    %31 = vector.broadcast %c0_i32_16 : i32 to vector<256x1xi32>
    %32 = arith.cmpi sgt, %30, %31 : vector<256x1xi32>
    %c15_i32 = arith.constant 15 : i32
    %33 = vector.broadcast %c15_i32 : i32 to vector<256x1xi32>
    %34 = arith.cmpi slt, %30, %33 : vector<256x1xi32>
    %c0_17 = arith.constant 0 : index
    %c0_18 = arith.constant 0 : index
    %c0_19 = arith.constant 0 : index
    %35 = vector.load %arg4[%c0_17, %c0_18, %c0_19] : memref<3x3x128xf32, #tpu.memory_space<vmem>>, vector<3x3x128xf32>
    %cst_20 = arith.constant 0.000000e+00 : f32
    %36 = vector.broadcast %cst_20 : f32 to vector<256x128xf32>
    %c7 = arith.constant 7 : index
    %c0_21 = arith.constant 0 : index
    %37 = vector.load %arg13[%c7, %c0_21] : memref<304x128xf32, #tpu.memory_space<vmem>>, vector<256x128xf32>
    %cst_22 = arith.constant 0.000000e+00 : f32
    %38 = vector.shape_cast %32 : vector<256x1xi1> to vector<256x1xi1>
    %39 = vector.broadcast %38 : vector<256x1xi1> to vector<256x128xi1>
    %40 = vector.broadcast %cst_22 : f32 to vector<256x128xf32>
    %41 = arith.select %39, %37, %40 : vector<256x128xi1>, vector<256x128xf32>
    %42 = vector.extract_strided_slice %35 {offsets = [0, 0, 0], sizes = [1, 1, 128], strides = [1, 1, 1]} : vector<3x3x128xf32> to vector<1x1x128xf32>
    %43 = vector.shape_cast %42 : vector<1x1x128xf32> to vector<128xf32>
    %44 = vector.shape_cast %43 : vector<128xf32> to vector<1x128xf32>
    %45 = vector.broadcast %44 : vector<1x128xf32> to vector<256x128xf32>
    %46 = arith.mulf %41, %45 : vector<256x128xf32>
    %47 = arith.addf %36, %46 : vector<256x128xf32>
    %c8 = arith.constant 8 : index
    %c0_23 = arith.constant 0 : index
    %48 = vector.load %arg13[%c8, %c0_23] : memref<304x128xf32, #tpu.memory_space<vmem>>, vector<256x128xf32>
    %49 = vector.extract_strided_slice %35 {offsets = [0, 1, 0], sizes = [1, 1, 128], strides = [1, 1, 1]} : vector<3x3x128xf32> to vector<1x1x128xf32>
    %50 = vector.shape_cast %49 : vector<1x1x128xf32> to vector<128xf32>
    %51 = vector.shape_cast %50 : vector<128xf32> to vector<1x128xf32>
    %52 = vector.broadcast %51 : vector<1x128xf32> to vector<256x128xf32>
    %53 = arith.mulf %48, %52 : vector<256x128xf32>
    %54 = arith.addf %47, %53 : vector<256x128xf32>
    %c9 = arith.constant 9 : index
    %c0_24 = arith.constant 0 : index
    %55 = vector.load %arg13[%c9, %c0_24] : memref<304x128xf32, #tpu.memory_space<vmem>>, vector<256x128xf32>
    %cst_25 = arith.constant 0.000000e+00 : f32
    %56 = vector.shape_cast %34 : vector<256x1xi1> to vector<256x1xi1>
    %57 = vector.broadcast %56 : vector<256x1xi1> to vector<256x128xi1>
    %58 = vector.broadcast %cst_25 : f32 to vector<256x128xf32>
    %59 = arith.select %57, %55, %58 : vector<256x128xi1>, vector<256x128xf32>
    %60 = vector.extract_strided_slice %35 {offsets = [0, 2, 0], sizes = [1, 1, 128], strides = [1, 1, 1]} : vector<3x3x128xf32> to vector<1x1x128xf32>
    %61 = vector.shape_cast %60 : vector<1x1x128xf32> to vector<128xf32>
    %62 = vector.shape_cast %61 : vector<128xf32> to vector<1x128xf32>
    %63 = vector.broadcast %62 : vector<1x128xf32> to vector<256x128xf32>
    %64 = arith.mulf %59, %63 : vector<256x128xf32>
    %65 = arith.addf %54, %64 : vector<256x128xf32>
    %c23 = arith.constant 23 : index
    %c0_26 = arith.constant 0 : index
    %66 = vector.load %arg13[%c23, %c0_26] : memref<304x128xf32, #tpu.memory_space<vmem>>, vector<256x128xf32>
    %cst_27 = arith.constant 0.000000e+00 : f32
    %67 = vector.shape_cast %32 : vector<256x1xi1> to vector<256x1xi1>
    %68 = vector.broadcast %67 : vector<256x1xi1> to vector<256x128xi1>
    %69 = vector.broadcast %cst_27 : f32 to vector<256x128xf32>
    %70 = arith.select %68, %66, %69 : vector<256x128xi1>, vector<256x128xf32>
    %71 = vector.extract_strided_slice %35 {offsets = [1, 0, 0], sizes = [1, 1, 128], strides = [1, 1, 1]} : vector<3x3x128xf32> to vector<1x1x128xf32>
    %72 = vector.shape_cast %71 : vector<1x1x128xf32> to vector<128xf32>
    %73 = vector.shape_cast %72 : vector<128xf32> to vector<1x128xf32>
    %74 = vector.broadcast %73 : vector<1x128xf32> to vector<256x128xf32>
    %75 = arith.mulf %70, %74 : vector<256x128xf32>
    %76 = arith.addf %65, %75 : vector<256x128xf32>
    %c24_28 = arith.constant 24 : index
    %c0_29 = arith.constant 0 : index
    %77 = vector.load %arg13[%c24_28, %c0_29] : memref<304x128xf32, #tpu.memory_space<vmem>>, vector<256x128xf32>
    %78 = vector.extract_strided_slice %35 {offsets = [1, 1, 0], sizes = [1, 1, 128], strides = [1, 1, 1]} : vector<3x3x128xf32> to vector<1x1x128xf32>
    %79 = vector.shape_cast %78 : vector<1x1x128xf32> to vector<128xf32>
    %80 = vector.shape_cast %79 : vector<128xf32> to vector<1x128xf32>
    %81 = vector.broadcast %80 : vector<1x128xf32> to vector<256x128xf32>
    %82 = arith.mulf %77, %81 : vector<256x128xf32>
    %83 = arith.addf %76, %82 : vector<256x128xf32>
    %c25 = arith.constant 25 : index
    %c0_30 = arith.constant 0 : index
    %84 = vector.load %arg13[%c25, %c0_30] : memref<304x128xf32, #tpu.memory_space<vmem>>, vector<256x128xf32>
    %cst_31 = arith.constant 0.000000e+00 : f32
    %85 = vector.shape_cast %34 : vector<256x1xi1> to vector<256x1xi1>
    %86 = vector.broadcast %85 : vector<256x1xi1> to vector<256x128xi1>
    %87 = vector.broadcast %cst_31 : f32 to vector<256x128xf32>
    %88 = arith.select %86, %84, %87 : vector<256x128xi1>, vector<256x128xf32>
    %89 = vector.extract_strided_slice %35 {offsets = [1, 2, 0], sizes = [1, 1, 128], strides = [1, 1, 1]} : vector<3x3x128xf32> to vector<1x1x128xf32>
    %90 = vector.shape_cast %89 : vector<1x1x128xf32> to vector<128xf32>
    %91 = vector.shape_cast %90 : vector<128xf32> to vector<1x128xf32>
    %92 = vector.broadcast %91 : vector<1x128xf32> to vector<256x128xf32>
    %93 = arith.mulf %88, %92 : vector<256x128xf32>
    %94 = arith.addf %83, %93 : vector<256x128xf32>
    %c39 = arith.constant 39 : index
    %c0_32 = arith.constant 0 : index
    %95 = vector.load %arg13[%c39, %c0_32] : memref<304x128xf32, #tpu.memory_space<vmem>>, vector<256x128xf32>
    %cst_33 = arith.constant 0.000000e+00 : f32
    %96 = vector.shape_cast %32 : vector<256x1xi1> to vector<256x1xi1>
    %97 = vector.broadcast %96 : vector<256x1xi1> to vector<256x128xi1>
    %98 = vector.broadcast %cst_33 : f32 to vector<256x128xf32>
    %99 = arith.select %97, %95, %98 : vector<256x128xi1>, vector<256x128xf32>
    %100 = vector.extract_strided_slice %35 {offsets = [2, 0, 0], sizes = [1, 1, 128], strides = [1, 1, 1]} : vector<3x3x128xf32> to vector<1x1x128xf32>
    %101 = vector.shape_cast %100 : vector<1x1x128xf32> to vector<128xf32>
    %102 = vector.shape_cast %101 : vector<128xf32> to vector<1x128xf32>
    %103 = vector.broadcast %102 : vector<1x128xf32> to vector<256x128xf32>
    %104 = arith.mulf %99, %103 : vector<256x128xf32>
    %105 = arith.addf %94, %104 : vector<256x128xf32>
    %c40 = arith.constant 40 : index
    %c0_34 = arith.constant 0 : index
    %106 = vector.load %arg13[%c40, %c0_34] : memref<304x128xf32, #tpu.memory_space<vmem>>, vector<256x128xf32>
    %107 = vector.extract_strided_slice %35 {offsets = [2, 1, 0], sizes = [1, 1, 128], strides = [1, 1, 1]} : vector<3x3x128xf32> to vector<1x1x128xf32>
    %108 = vector.shape_cast %107 : vector<1x1x128xf32> to vector<128xf32>
    %109 = vector.shape_cast %108 : vector<128xf32> to vector<1x128xf32>
    %110 = vector.broadcast %109 : vector<1x128xf32> to vector<256x128xf32>
    %111 = arith.mulf %106, %110 : vector<256x128xf32>
    %112 = arith.addf %105, %111 : vector<256x128xf32>
    %c41 = arith.constant 41 : index
    %c0_35 = arith.constant 0 : index
    %113 = vector.load %arg13[%c41, %c0_35] : memref<304x128xf32, #tpu.memory_space<vmem>>, vector<256x128xf32>
    %cst_36 = arith.constant 0.000000e+00 : f32
    %114 = vector.shape_cast %34 : vector<256x1xi1> to vector<256x1xi1>
    %115 = vector.broadcast %114 : vector<256x1xi1> to vector<256x128xi1>
    %116 = vector.broadcast %cst_36 : f32 to vector<256x128xf32>
    %117 = arith.select %115, %113, %116 : vector<256x128xi1>, vector<256x128xf32>
    %118 = vector.extract_strided_slice %35 {offsets = [2, 2, 0], sizes = [1, 1, 128], strides = [1, 1, 1]} : vector<3x3x128xf32> to vector<1x1x128xf32>
    %119 = vector.shape_cast %118 : vector<1x1x128xf32> to vector<128xf32>
    %120 = vector.shape_cast %119 : vector<128xf32> to vector<1x128xf32>
    %121 = vector.broadcast %120 : vector<1x128xf32> to vector<256x128xf32>
    %122 = arith.mulf %117, %121 : vector<256x128xf32>
    %123 = arith.addf %112, %122 : vector<256x128xf32>
    %c0_37 = arith.constant 0 : index
    %c0_38 = arith.constant 0 : index
    %124 = vector.load %arg5[%c0_37, %c0_38] : memref<1x128xf32, #tpu.memory_space<vmem>>, vector<1x128xf32>
    %125 = vector.broadcast %124 : vector<1x128xf32> to vector<256x128xf32>
    %126 = arith.addf %123, %125 : vector<256x128xf32>
    %cst_39 = arith.constant 0.000000e+00 : f32
    %127 = vector.broadcast %cst_39 : f32 to vector<256x128xf32>
    %128 = arith.maximumf %126, %127 : vector<256x128xf32>
    %129 = arith.truncf %128 : vector<256x128xf32> to vector<256x128xbf16>
    %c0_40 = arith.constant 0 : index
    %c0_41 = arith.constant 0 : index
    %130 = vector.load %arg6[%c0_40, %c0_41] : memref<128x128xbf16, #tpu.memory_space<vmem>>, vector<128x128xbf16>
    %cst_42 = arith.constant dense<0.000000e+00> : vector<256x128xf32>
    %131 = tpu.matmul %129, %130, %cst_42 {dimension_numbers = #tpu.dot_dimension_numbers<[1], [0], [0], [1], [0, 0, 1, 1], [], []>} : vector<256x128xbf16>, vector<128x128xbf16>, vector<256x128xf32> -> vector<256x128xf32>
    %c0_43 = arith.constant 0 : index
    %c0_44 = arith.constant 0 : index
    %132 = vector.load %arg7[%c0_43, %c0_44] : memref<1x128xf32, #tpu.memory_space<vmem>>, vector<1x128xf32>
    %133 = vector.broadcast %132 : vector<1x128xf32> to vector<256x128xf32>
    %134 = arith.addf %131, %133 : vector<256x128xf32>
    %cst_45 = arith.constant dense<0.000000e+00> : vector<128xf32>
    %135 = vector.multi_reduction <add>, %134, %cst_45 [0] : vector<256x128xf32> to vector<128xf32>
    %136 = vector.shape_cast %135 : vector<128xf32> to vector<1x128xf32>
    %cst_46 = arith.constant 2.560000e+02 : f32
    %137 = vector.broadcast %cst_46 : f32 to vector<1x128xf32>
    %138 = arith.divf %136, %137 : vector<1x128xf32>
    %139 = arith.truncf %138 : vector<1x128xf32> to vector<1x128xbf16>
    %c0_47 = arith.constant 0 : index
    %c0_48 = arith.constant 0 : index
    %140 = vector.load %arg8[%c0_47, %c0_48] : memref<128x128xbf16, #tpu.memory_space<vmem>>, vector<128x128xbf16>
    %cst_49 = arith.constant dense<0.000000e+00> : vector<1x128xf32>
    %141 = tpu.matmul %139, %140, %cst_49 {dimension_numbers = #tpu.dot_dimension_numbers<[1], [0], [0], [1], [0, 0, 1, 1], [], []>} : vector<1x128xbf16>, vector<128x128xbf16>, vector<1x128xf32> -> vector<1x128xf32>
    %c0_50 = arith.constant 0 : index
    %c0_51 = arith.constant 0 : index
    %142 = vector.load %arg9[%c0_50, %c0_51] : memref<1x128xf32, #tpu.memory_space<vmem>>, vector<1x128xf32>
    %143 = arith.addf %141, %142 : vector<1x128xf32>
    %cst_52 = arith.constant 0.000000e+00 : f32
    %144 = vector.broadcast %cst_52 : f32 to vector<1x128xf32>
    %145 = arith.maximumf %143, %144 : vector<1x128xf32>
    %146 = arith.truncf %145 : vector<1x128xf32> to vector<1x128xbf16>
    %c0_53 = arith.constant 0 : index
    %c0_54 = arith.constant 0 : index
    %147 = vector.load %arg10[%c0_53, %c0_54] : memref<128x128xbf16, #tpu.memory_space<vmem>>, vector<128x128xbf16>
    %cst_55 = arith.constant dense<0.000000e+00> : vector<1x128xf32>
    %148 = tpu.matmul %146, %147, %cst_55 {dimension_numbers = #tpu.dot_dimension_numbers<[1], [0], [0], [1], [0, 0, 1, 1], [], []>} : vector<1x128xbf16>, vector<128x128xbf16>, vector<1x128xf32> -> vector<1x128xf32>
    %c0_56 = arith.constant 0 : index
    %c0_57 = arith.constant 0 : index
    %149 = vector.load %arg11[%c0_56, %c0_57] : memref<1x128xf32, #tpu.memory_space<vmem>>, vector<1x128xf32>
    %150 = arith.addf %148, %149 : vector<1x128xf32>
    %151 = arith.negf %150 : vector<1x128xf32>
    %152 = math.exp %151 : vector<1x128xf32>
    %cst_58 = arith.constant 1.000000e+00 : f32
    %153 = vector.broadcast %cst_58 : f32 to vector<1x128xf32>
    %154 = arith.addf %153, %152 : vector<1x128xf32>
    %155 = arith.divf %153, %154 : vector<1x128xf32>
    %156 = vector.broadcast %155 : vector<1x128xf32> to vector<256x128xf32>
    %157 = arith.mulf %134, %156 : vector<256x128xf32>
    %158 = vector.shape_cast %157 : vector<256x128xf32> to vector<8x2x16x128xf32>
    %cst_59 = arith.constant dense<0xFF800000> : vector<8x16x128xf32>
    %159 = vector.multi_reduction <maximumf>, %158, %cst_59 [1] : vector<8x2x16x128xf32> to vector<8x16x128xf32>
    %160 = vector.shape_cast %159 : vector<8x16x128xf32> to vector<8x8x2x128xf32>
    %cst_60 = arith.constant dense<0xFF800000> : vector<8x8x128xf32>
    %161 = vector.multi_reduction <maximumf>, %160, %cst_60 [2] : vector<8x8x2x128xf32> to vector<8x8x128xf32>
    %162 = vector.shape_cast %161 : vector<8x8x128xf32> to vector<1x64x128xf32>
    %c0_61 = arith.constant 0 : index
    %c0_62 = arith.constant 0 : index
    %c0_63 = arith.constant 0 : index
    %163 = vector.load %arg12[%c0_61, %c0_62, %c0_63] : memref<1x64x128xf32, #tpu.memory_space<vmem>>, vector<1x64x128xf32>
    tpu.vector_store %arg12[%c0_61, %c0_62, %c0_63], %162 {strides = array<i32>} : memref<1x64x128xf32, #tpu.memory_space<vmem>>, vector<1x64x128xf32>,
    return
  }
  func.func @transform_0(%arg0: i32) -> (i32, i32, i32) {
    %c0_i32 = arith.constant 0 : i32
    %c0_i32_0 = arith.constant 0 : i32
    %c0_i32_1 = arith.constant 0 : i32
    return %arg0, %c0_i32, %c0_i32_0 : i32, i32, i32
  }
  func.func @transform_1(%arg0: i32) -> (i32, i32) {
    %c0_i32 = arith.constant 0 : i32
    %c0_i32_0 = arith.constant 0 : i32
    %c0_i32_1 = arith.constant 0 : i32
    return %c0_i32, %c0_i32_0 : i32, i32
  }
  func.func @transform_2(%arg0: i32) -> (i32, i32) {
    %c0_i32 = arith.constant 0 : i32
    %c0_i32_0 = arith.constant 0 : i32
    %c0_i32_1 = arith.constant 0 : i32
    return %c0_i32, %c0_i32_0 : i32, i32
  }
  func.func @transform_3(%arg0: i32) -> (i32, i32, i32) {
    %c0_i32 = arith.constant 0 : i32
    %c0_i32_0 = arith.constant 0 : i32
    %c0_i32_1 = arith.constant 0 : i32
    %c0_i32_2 = arith.constant 0 : i32
    return %c0_i32, %c0_i32_0, %c0_i32_1 : i32, i32, i32
  }
  func.func @transform_4(%arg0: i32) -> (i32, i32) {
    %c0_i32 = arith.constant 0 : i32
    %c0_i32_0 = arith.constant 0 : i32
    %c0_i32_1 = arith.constant 0 : i32
    return %c0_i32, %c0_i32_0 : i32, i32
  }
  func.func @transform_5(%arg0: i32) -> (i32, i32) {
    %c0_i32 = arith.constant 0 : i32
    %c0_i32_0 = arith.constant 0 : i32
    %c0_i32_1 = arith.constant 0 : i32
    return %c0_i32, %c0_i32_0 : i32, i32
  }
  func.func @transform_6(%arg0: i32) -> (i32, i32) {
    %c0_i32 = arith.constant 0 : i32
    %c0_i32_0 = arith.constant 0 : i32
    %c0_i32_1 = arith.constant 0 : i32
    return %c0_i32, %c0_i32_0 : i32, i32
  }
  func.func @transform_7(%arg0: i32) -> (i32, i32) {
    %c0_i32 = arith.constant 0 : i32
    %c0_i32_0 = arith.constant 0 : i32
    %c0_i32_1 = arith.constant 0 : i32
    return %c0_i32, %c0_i32_0 : i32, i32
  }
  func.func @transform_8(%arg0: i32) -> (i32, i32) {
    %c0_i32 = arith.constant 0 : i32
    %c0_i32_0 = arith.constant 0 : i32
    %c0_i32_1 = arith.constant 0 : i32
    return %c0_i32, %c0_i32_0 : i32, i32
  }
  func.func @transform_9(%arg0: i32) -> (i32, i32) {
    %c0_i32 = arith.constant 0 : i32
    %c0_i32_0 = arith.constant 0 : i32
    %c0_i32_1 = arith.constant 0 : i32
    return %c0_i32, %c0_i32_0 : i32, i32
  }
  func.func @transform_10(%arg0: i32) -> (i32, i32) {
    %c0_i32 = arith.constant 0 : i32
    %c0_i32_0 = arith.constant 0 : i32
    %c0_i32_1 = arith.constant 0 : i32
    return %c0_i32, %c0_i32_0 : i32, i32
  }
  func.func @transform_11(%arg0: i32) -> (i32, i32, i32) {
    %c0_i32 = arith.constant 0 : i32
    %c0_i32_0 = arith.constant 0 : i32
    %c0_i32_1 = arith.constant 0 : i32
    return %arg0, %c0_i32, %c0_i32_0 : i32, i32, i32
  }
}

</mosaic_0001>

<bundles_post_ra>
// kernel: mbconv_block.1
= control target key start
LH: loop header
LB: loop body
LE: loop exit
PB: predicated region body
PF: predicated region fallthrough
CT: control target
= control target key end

     0   :  { %s4373_s17 = smov 0   ;;  %s6608_s0 = inlined_call_operand.vmem [shape: bf16[2,256,128], index: 0, kind: input, shape index: {}]   ;;  %s6609_s1 = inlined_call_operand.vmem [shape: bf16[128,128], index: 1, kind: input, shape index: {}]   ;;  %s6610_s2 = inlined_call_operand.vmem [shape: f32[1,128], index: 2, kind: input, shape index: {}]   ;;  %s6611_s3 = inlined_call_operand.vmem [shape: f32[3,3,128], index: 3, kind: input, shape index: {}]   ;;  %s6612_s4 = inlined_call_operand.vmem [shape: f32[1,128], index: 4, kind: input, shape index: {}]   ;;  %s6613_s5 = inlined_call_operand.vmem [shape: bf16[128,128], index: 5, kind: input, shape index: {}]   ;;  %s6614_s6 = inlined_call_operand.vmem [shape: f32[1,128], index: 6, kind: input, shape index: {}]   ;;  %s6615_s7 = inlined_call_operand.vmem [shape: bf16[128,128], index: 7, kind: input, shape index: {}]   ;;  %s6616_s8 = inlined_call_operand.vmem [shape: f32[1,128], index: 8, kind: input, shape index: {}]   ;;  %s6617_s9 = inlined_call_operand.vmem [shape: bf16[128,128], index: 9, kind: input, shape index: {}]   ;;  %s6618_s10 = inlined_call_operand.vmem [shape: f32[1,128], index: 10, kind: input, shape index: {}]   ;;  %s6619_s11 = inlined_call_operand.vmem [shape: f32[2,64,128], index: 11, kind: output, shape index: {}]  }
   0x1 LB: > { %s3970_s18 = sadd.s32 4294967295, %s4308_s17   ;;  %p3974_p0 = scmp.ge.s32.totalorder %s4308_s17, 1  ;;  %s4308_s17 = sphi %s4373_s17, %s21_s17  }
   0x2   : > { %p337_p1 = scmp.lt.s32.totalorder %s4308_s17, 3 }
   0x4   : > { %p338_p2 = pnand %p3974_p0, %p337_p1 }
   0x6   : > { %341 = sbr.rel (%p338_p2) target bundleno = 1342 (0x53e), region = 64 }
   0xd   : > { %v4248_v0 = vld [vmem:[%s6609_s1] sm:$0xff]   ;;  %p377_p3 = scmp.lt.s32.totalorder %s3970_s18, 1  ;;  %v4249_v1 = vld [vmem:[%s6609_s1 + $0x8] sm:$0xff]   ;;  %v4250_v2 = vld [vmem:[%s6609_s1 + $0x10] sm:$0xff]   ;;  %v4310_v24 = vmov 0.0   ;;  %v818_v33 = vlaneseq }
   0xe   : > { %4101 = vmatprep.subr.bf16.mxu0 %v4248_v0  ;;  %v4251_v3 = vld [vmem:[%s6609_s1 + $0x18] sm:$0xff]   ;;  %v4252_v5 = vld [vmem:[%s6609_s1 + $0x20] sm:$0xff]   ;;  %v4253_v6 = vld [vmem:[%s6609_s1 + $0x28] sm:$0xff]   ;;  %780 = vst [vmem:[#allocation2] sm:$0xff] %v4310_v24 }
   0xf   : > { %s6827_s18 = smov (!%p377_p3, %s3970_s18), 1  ;;  %4102 = vmatpush3.bf16.msra.mxu0 %v4248_v0  ;;  %v4254_v7 = vld [vmem:[%s6609_s1 + $0x30] sm:$0xff]   ;;  %v4255_v8 = vld [vmem:[%s6609_s1 + $0x38] sm:$0xff]   ;;  %781 = vst [vmem:[#allocation2 + $0x8] sm:$0xff] %v4310_v24  ;;  %782 = vst [vmem:[#allocation2 + $0x10] sm:$0xff] %v4310_v24  ;;  %v4453_v34 = vshrl.u32 %v818_v33, 7 }
  0x10   : > { %4103 = vmatprep.subr.bf16.mxu0 %v4249_v1  ;;  %s4033_s25 = sshll.u32 %s6827_s18, 7  ;;  %815 = vst [vmem:[#allocation2 + $0x118] sm:$0xff] %v4310_v24  ;;  %816 = vst [vmem:[#allocation2 + $0x120] sm:$0xff] %v4310_v24  ;;  %v4272_v25 = vld [vmem:[%s6613_s5] sm:$0xff]   ;;  %v4273_v26 = vld [vmem:[%s6613_s5 + $0x8] sm:$0xff]   ;;  %s4034_s20 = sshll.u32 %s6827_s18, 6 }
  0x11   : > { %s4396_s28 = scalar_lea.vmem %s6608_s0, %s4033_s25  ;;  %817 = vst [vmem:[#allocation2 + $0x128] sm:$0xff] %v4310_v24  ;;  %4149 = vmatprep.subr.bf16.mxu1 %v4272_v25  ;;  %v4274_v27 = vld [vmem:[%s6613_s5 + $0x10] sm:$0xff]   ;;  %v4275_v28 = vld [vmem:[%s6613_s5 + $0x18] sm:$0xff]   ;;  %v4276_v29 = vld [vmem:[%s6613_s5 + $0x20] sm:$0xff]   ;;  %v855_v35 = vand.u32 15, %v4453_v34  ;;  %v4457_v36 = vsub.s32 0, %v4453_v34  ;;  %s6485_s22 = scalar_lea.vmem %s6619_s11, %s4034_s20 }
  0x12   : > { %v4256_v4 = vld [vmem:[%s4396_s28] sm:$0xff]   ;;  %v4257_v9 = vld [vmem:[%s4396_s28 + $0x8] sm:$0xff]   ;;  %v4258_v10 = vld [vmem:[%s4396_s28 + $0x10] sm:$0xff]   ;;  %4150 = vmatpush3.bf16.msra.mxu1 %v4272_v25  ;;  %6641 = vst [vmem:[#allocation3_spill] sm:$0xff] %v4453_v34  ;;  %v1532_v39 = vsub.s32 1, %v4453_v34  ;;  %v1728_v42 = vsub.s32 2, %v4453_v34 }
  0x13   : > { %4104 = vmatpush3.bf16.msra.mxu0 %v4249_v1  ;;  %4117 = vmatprep.mubr.bf16.mxu0 %v4256_v4  ;;  %v4259_v11 = vld [vmem:[%s4396_s28 + $0x18] sm:$0xff]   ;;  %v4260_v12 = vld [vmem:[%s4396_s28 + $0x20] sm:$0xff]   ;;  %v4261_v13 = vld [vmem:[%s4396_s28 + $0x28] sm:$0xff]   ;;  %6642 = vst [vmem:[#allocation4_spill] sm:$0xff] %v4457_v36  ;;  %vm4459_vm0 = vcmp.gt.s32.totalorder %v855_v35, 0  ;;  %v820_v50 = vadd.s32 8, %v4453_v34 }
  0x14   : > { %4105 = vmatprep.subr.bf16.mxu0 %v4250_v2  ;;  %v4262_v14 = vld [vmem:[%s4396_s28 + $0x30] sm:$0xff]   ;;  %v4263_v15 = vld [vmem:[%s4396_s28 + $0x38] sm:$0xff]   ;;  %v4264_v16 = vld [vmem:[%s4396_s28 + $0x40] sm:$0xff]   ;;  %4151 = vmatprep.subr.bf16.mxu1 %v4273_v26  ;;  %v821_v51 = vadd.s32 16, %v4453_v34  ;;  %v822_v52 = vadd.s32 24, %v4453_v34  ;;  %v823_v53 = vadd.s32 32, %v4453_v34 }
  0x15   : > { %v4265_v17 = vld [vmem:[%s4396_s28 + $0x48] sm:$0xff]   ;;  %v4266_v18 = vld [vmem:[%s4396_s28 + $0x50] sm:$0xff]   ;;  %v4267_v19 = vld [vmem:[%s4396_s28 + $0x58] sm:$0xff]   ;;  %v4484_v54 = vadd.s32 40, %v4453_v34  ;;  %v862_v59 = vand.u32 15, %v820_v50  ;;  %v4495_v61 = vadd.s32 48, %v4453_v34 }
  0x16   : > { %v4268_v20 = vld [vmem:[%s4396_s28 + $0x60] sm:$0xff]   ;;  %v4269_v21 = vld [vmem:[%s4396_s28 + $0x68] sm:$0xff]   ;;  %v4270_v22 = vld [vmem:[%s4396_s28 + $0x70] sm:$0xff]   ;;  %4152 = vmatpush3.bf16.msra.mxu1 %v4273_v26  ;;  %v4498_v62 = vadd.s32 64, %v4453_v34  ;;  %v869_v63 = vand.u32 15, %v821_v51  ;;  %v876_v0 = vand.u32 15, %v822_v52 }
  0x17   : > { %4106 = vmatpush3.bf16.msra.mxu0 %v4250_v2  ;;  %v4271_v23 = vld [vmem:[%s4396_s28 + $0x78] sm:$0xff]   ;;  %4153 = vmatprep.subr.bf16.mxu1 %v4274_v27  ;;  %v4277_v30 = vld [vmem:[%s6613_s5 + $0x28] sm:$0xff]   ;;  %v4278_v31 = vld [vmem:[%s6613_s5 + $0x30] sm:$0xff]   ;;  %v883_v1 = vand.u32 15, %v823_v53  ;;  %v890_v4 = vand.u32 15, %v4484_v54  ;;  %v4547_v25 = vadd.s32 104, %v4453_v34 }
  0x18   : > { %4107 = vmatprep.subr.bf16.mxu0 %v4251_v3  ;;  %v4279_v32 = vld [vmem:[%s6613_s5 + $0x38] sm:$0xff]   ;;  %v1302_v38 = vld [vmem:[#allocation2 + $0x7] sm:$0xff]  ;;  %v1299_v40 = vld [vmem:[%s6611_s3] sm:$0x7]  ;;  %v4550_v26 = vadd.s32 128, %v4453_v34  ;;  %vm4553_vm1 = vcmp.gt.s32.totalorder %v869_v63, 0 }
  0x19   : > { %v4468_v41 = vrot.slane %v1299_v40, %v4457_v36  ;;  %v1398_v43 = vsel %vm4459_vm0, %v1302_v38, 0.0  ;;  %v4473_v44 = vrot.slane %v1299_v40, %v1532_v39  ;;  %v4477_v47 = vrot.slane %v1299_v40, %v1728_v42  ;;  %v1303_v48 = vld [vmem:[#allocation2 + $0xf] sm:$0xff]  ;;  %v1300_v55 = vld [vmem:[%s6611_s3 + $0x4] sm:$0x7]  ;;  %v1301_v60 = vld [vmem:[%s6611_s3 + $0x8] sm:$0x7] }
  0x1a   : > { %4154 = vmatpush3.bf16.msra.mxu1 %v4274_v27  ;;  %v1598_v49 = vld [vmem:[#allocation2 + $0x9] sm:$0xff]  ;;  %v4500_v2 = vrot.slane %v1300_v55, %v1532_v39  ;;  %6648 = vst [vmem:[#allocation8_spill] sm:$0xff] %v4547_v25  ;;  %6649 = vst [vmem:[#allocation9_spill] sm:$0xff] %v4550_v26  ;;  %vm4557_vm2 = vcmp.lt.s32.totalorder %v862_v59, 15  ;;  %v4565_v33 = vadd.s32 144, %v4453_v34  ;;  %v4572_v40 = vadd.s32 160, %v4453_v34 }
  0x1b   : > { %4108 = vmatpush3.bf16.msra.mxu0 %v4251_v3  ;;  %4155 = vmatprep.subr.bf16.mxu1 %v4275_v28  ;;  %v1434_v45 = vmul.f32 %v4468_v41, %v1398_v43  ;;  %v1534_v46 = vmul.f32 0.0, %v4473_v44  ;;  %v1435_v56 = vmul.f32 %v4468_v41, %v1303_v48  ;;  %v1730_v58 = vmul.f32 %v4477_v47, %v1598_v49  ;;  %v4505_v3 = vld [vmem:[%s6610_s2] ss:$0 sm:$0xff] }
  0x1c   : > { %4109 = vmatprep.subr.bf16.mxu0 %v4252_v5  ;;  %6655 = vst [vmem:[#allocation11_spill] sm:$0xff] %v4565_v33  ;;  %6657 = vst [vmem:[#allocation13_spill] sm:$0xff] %v4572_v40  ;;  %vm4574_vm3 = vcmp.gt.s32.totalorder %v883_v1, 0  ;;  %v4583_v48 = vadd.s32 176, %v4453_v34  ;;  %vm4588_vm4 = vcmp.lt.s32.totalorder %v876_v0, 15  ;;  %vm4619_vm5 = vcmp.lt.s32.totalorder %v890_v4, 15 }
  0x1d   : > { %v1566_v57 = vadd.f32 %v1534_v46, %v1434_v45  ;;  %v4658_v52 = vadd.s32 192, %v4453_v34 }
  0x1e   : > { %4156 = vmatpush3.bf16.msra.mxu1 %v4275_v28  ;;  %6661 = vst [vmem:[#allocation15_spill] sm:$0xff] %v4583_v48 }
  0x1f   : > { %4110 = vmatpush3.bf16.msra.mxu0 %v4252_v5  ;;  %4157 = vmatprep.subr.bf16.mxu1 %v4276_v29  ;;  %v4508_v5 = vadd.f32 %v1534_v46, %v1435_v56  ;;  %v4580_v46 = vadd.s32 152, %v4453_v34  ;;  %6667 = vst [vmem:[#allocation17_spill] sm:$0xff] %v4658_v52 }
  0x20   : > { %4111 = vmatprep.subr.bf16.mxu0 %v4253_v6 }
  0x21   : > { %6660 = vst [vmem:[#allocation14_spill] sm:$0xff] %v4580_v46 }
  0x22   : > { %4158 = vmatpush3.bf16.msra.mxu1 %v4276_v29 }
  0x23   : > { %4112 = vmatpush3.bf16.msra.mxu0 %v4253_v6  ;;  %4159 = vmatprep.subr.bf16.mxu1 %v4277_v30  ;;  %v4510_v6 = vadd.f32 %v1730_v58, %v1566_v57 }
  0x24   : > { %4113 = vmatprep.subr.bf16.mxu0 %v4254_v7 }
  0x26   : > { %4160 = vmatpush3.bf16.msra.mxu1 %v4277_v30 }
  0x27   : > { %4114 = vmatpush3.bf16.msra.mxu0 %v4254_v7  ;;  %4161 = vmatprep.subr.bf16.mxu1 %v4278_v31  ;;  %v4513_v7 = vrot.slane %v1300_v55, %v4457_v36 }
  0x28   : > { %4115 = vmatprep.subr.bf16.mxu0 %v4255_v8 }
  0x2a   : > { %4162 = vmatpush3.bf16.msra.mxu1 %v4278_v31 }
  0x2b   : > { %4116 = vmatpush3.bf16.msra.mxu0 %v4255_v8  ;;  %4163 = vmatprep.subr.bf16.mxu1 %v4279_v32  ;;  %v4515_v8 = vrot.slane %v1300_v55, %v1728_v42 }
  0x2c   : > { %4197 = vmatprep.subr.bf16.mxu0 %v4310_v24 }
  0x2e   : > { %4118 = vmatmul.mubr.bf16.vlgmr.msra.gmra.mrb[0].mxu0 %v4257_v9  ;;  %4164 = vmatpush3.bf16.msra.mxu1 %v4279_v32  ;;  %v4518_v9 = vrot.slane %v1301_v60, %v4457_v36  ;;  %v4562_v32 = vadd.s32 120, %v4453_v34 }
  0x2f   : > { %4121 = vmatprep.mubr.bf16.mxu0 %v4258_v10  ;;  %4217 = vmatprep.subr.bf16.mxu1 %v4310_v24  ;;  %v4520_v10 = vrot.slane %v1301_v60, %v1532_v39  ;;  %v4544_v24 = vadd.s32 112, %v4453_v34  ;;  %v4569_v39 = vadd.s32 136, %v4453_v34 }
  0x30   : > { %6654 = vst [vmem:[#allocation10_spill] sm:$0xff] %v4562_v32 }
  0x31   : > { %6647 = vst [vmem:[#allocation7_spill] sm:$0xff] %v4544_v24  ;;  %6656 = vst [vmem:[#allocation12_spill] sm:$0xff] %v4569_v39 }
  0x36   : > { %4122 = vmatmul.mubr.bf16.gmra.mrb[4].mxu0 %v4259_v11  ;;  %v4522_v11 = vrot.slane %v1301_v60, %v1728_v42 }
  0x37   : > { %4125 = vmatprep.mubr.bf16.mxu0 %v4260_v12 }
  0x3e   : > { %4126 = vmatmul.mubr.bf16.gmra.mrb[8].mxu0 %v4261_v13 }
  0x3f   : > { %4129 = vmatprep.mubr.bf16.mxu0 %v4262_v14 }
  0x46   : > { %4130 = vmatmul.mubr.bf16.gmra.mrb[12].mxu0 %v4263_v15  ;;  %v4527_v15 = vadd.s32 56, %v4453_v34 }
  0x47   : > { %4133 = vmatprep.mubr.bf16.mxu0 %v4264_v16  ;;  %v4530_v16 = vadd.s32 80, %v4453_v34 }
  0x4e   : > { %4134 = vmatmul.mubr.bf16.gmra.mrb[16].mxu0 %v4265_v17 }
  0x4f   : > { %4137 = vmatprep.mubr.bf16.mxu0 %v4266_v18 }
  0x56   : > { %4138 = vmatmul.mubr.bf16.gmra.mrb[20].mxu0 %v4267_v19  ;;  %v4534_v19 = vadd.s32 72, %v4453_v34 }
  0x57   : > { %4141 = vmatprep.mubr.bf16.mxu0 %v4268_v20  ;;  %v4537_v20 = vadd.s32 96, %v4453_v34 }
  0x58   : > { %6645 = vst [vmem:[#allocation5_spill] sm:$0xff] %v4534_v19 }
  0x5e   : > { %4142 = vmatmul.mubr.bf16.gmra.mrb[24].mxu0 %v4269_v21  ;;  %v4540_v21 = vadd.s32 88, %v4453_v34 }
  0x5f   : > { %4145 = vmatprep.mubr.bf16.mxu0 %v4270_v22 }
  0x60   : > { %6646 = vst [vmem:[#allocation6_spill] sm:$0xff] %v4540_v21 }
  0x66   : > { %4146 = vmatmul.mubr.bf16.gmra.mrb[28].mxu0 %v4271_v23 }
 0x101   : > { %v4119_v12 = vpop.f32.mrb[0].mxu0 }
 0x102   : > { %v630_v17 = vadd.f32 %v4119_v12, %v4505_v3  ;;  %v621_v18 = vpop.f32.mrb[1].mxu0 }
 0x103   : > { %v622_v22 = vadd.f32 %v4505_v3, %v621_v18  ;;  %v4120_v23 = vpop.f32.mrb[2].mxu0 }
 0x104   : > { %v750_v27 = vmax.f32 %v630_v17, 0.0  ;;  %v633_v28 = vadd.f32 %v4120_v23, %v4505_v3  ;;  %v624_v29 = vpop.f32.mrb[3].mxu0  ;;  %v4627_v23 = vadd.s32 168, %v4453_v34 }
 0x105   : > { %v748_v35 = vmax.f32 %v622_v22, 0.0  ;;  %v625_v38 = vadd.f32 %v4505_v3, %v624_v29 }
 0x106   : > { %785 = vst [vmem:[#allocation2 + $0x28] sm:$0xff] %v750_v27  ;;  %v751_v42 = vmax.f32 %v633_v28, 0.0  ;;  %v4602_v18 = vmul.f32 %v4473_v44, %v750_v27  ;;  %v4609_v60 = vmul.f32 %v4500_v2, %v750_v27  ;;  %v4612_v1 = vmul.f32 %v4520_v10, %v750_v27  ;;  %6666 = vst [vmem:[#allocation16_spill] sm:$0xff] %v4627_v23 }
 0x107   : > { %783 = vst [vmem:[#allocation2 + $0x18] sm:$0xff] %v748_v35  ;;  %v749_v49 = vmax.f32 %v625_v38, 0.0  ;;  %v1536_v38 = vmul.f32 %v4473_v44, %v748_v35 }
 0x108   : > { %786 = vst [vmem:[#allocation2 + $0x30] sm:$0xff] %v751_v42 }
 0x109   : > { %784 = vst [vmem:[#allocation2 + $0x20] sm:$0xff] %v749_v49  ;;  %v4123_v59 = vpop.f32.mrb[4].mxu0  ;;  %v4643_v55 = vmul.f32 %v4500_v2, %v749_v49 }
 0x10a   : > { %v646_v12 = vadd.f32 %v4123_v59, %v4505_v3  ;;  %v637_v17 = vpop.f32.mrb[5].mxu0 }
 0x10b   : > { %v638_v28 = vadd.f32 %v4505_v3, %v637_v17  ;;  %v4124_v29 = vpop.f32.mrb[6].mxu0  ;;  %v4624_v17 = vmul.f32 %v4500_v2, %v748_v35  ;;  %v1537_v35 = vmul.f32 %v4473_v44, %v749_v49 }
 0x10c   : > { %v4614_v59 = vmax.f32 %v646_v12, 0.0  ;;  %v649_v0 = vadd.f32 %v4124_v29, %v4505_v3  ;;  %v640_v63 = vpop.f32.mrb[7].mxu0  ;;  %v4633_v12 = vmul.f32 %v4473_v44, %v751_v42  ;;  %v4636_v29 = vmul.f32 %v4500_v2, %v751_v42 }
 0x10d   : > { %v4629_v57 = vmax.f32 %v638_v28, 0.0  ;;  %v641_v27 = vadd.f32 %v4505_v3, %v640_v63  ;;  %v4646_v28 = vmul.f32 %v4520_v10, %v751_v42 }
 0x10e   : > { %789 = vst [vmem:[#allocation2 + $0x48] sm:$0xff] %v4614_v59  ;;  %v4639_v54 = vmax.f32 %v649_v0, 0.0  ;;  %v1304_v4 = vld [vmem:[#allocation2 + $0x17] sm:$0xff]  ;;  %v4669_v14 = vmul.f32 %v4473_v44, %v4614_v59 }
 0x10f   : > { %v1599_v58 = vld [vmem:[#allocation2 + $0x11] sm:$0xff]  ;;  %787 = vst [vmem:[#allocation2 + $0x38] sm:$0xff] %v4629_v57  ;;  %v4649_v63 = vmax.f32 %v641_v27, 0.0  ;;  %v1400_v0 = vsel %vm4553_vm1, %v1304_v4, 0.0  ;;  %v1796_v52 = vsel %vm4459_vm0, %v1304_v4, 0.0  ;;  %v4702_v19 = vld [vmem:[#allocation2 + $0x29] sm:$0xff] }
 0x110   : > { %v4651_v56 = vld [vmem:[#allocation2 + $0x2f] sm:$0xff]  ;;  %v1695_v51 = vsel %vm4557_vm2, %v1599_v58, 0.0  ;;  %790 = vst [vmem:[#allocation2 + $0x50] sm:$0xff] %v4639_v54  ;;  %v1305_v49 = vld [vmem:[#allocation2 + $0x1f] sm:$0xff]  ;;  %v4661_v42 = vld [vmem:[#allocation2 + $0x27] sm:$0xff]  ;;  %v1436_v45 = vmul.f32 %v4468_v41, %v1400_v0 }
 0x111   : > { %v4664_v27 = vld [vmem:[#allocation2 + $0x19] sm:$0xff]  ;;  %v1731_v50 = vmul.f32 %v4477_v47, %v1695_v51  ;;  %788 = vst [vmem:[#allocation2 + $0x40] sm:$0xff] %v4649_v63  ;;  %v4127_v13 = vpop.f32.mrb[8].mxu0  ;;  %v1402_v36 = vsel %vm4574_vm3, %v4661_v42, 0.0  ;;  %v1437_v34 = vmul.f32 %v4468_v41, %v1305_v49  ;;  %v4677_v0 = vld [vmem:[#allocation2 + $0x21] sm:$0xff]  ;;  %v1439_v23 = vmul.f32 %v4468_v41, %v4651_v56 }
 0x112   : > { %v1732_v51 = vmul.f32 %v4477_v47, %v4664_v27  ;;  %v662_v46 = vadd.f32 %v4127_v13, %v4505_v3  ;;  %v653_v58 = vpop.f32.mrb[9].mxu0  ;;  %v1568_v48 = vadd.f32 %v1536_v38, %v1436_v45  ;;  %v1798_v39 = vsel %vm4553_vm1, %v4661_v42, 0.0 }
 0x113   : > { %v654_v40 = vadd.f32 %v4505_v3, %v653_v58  ;;  %v4128_v32 = vpop.f32.mrb[10].mxu0  ;;  %v1438_v33 = vmul.f32 %v4468_v41, %v1402_v36  ;;  %v1569_v25 = vadd.f32 %v1537_v35, %v1437_v34  ;;  %v1697_v4 = vsel %vm4588_vm4, %v4677_v0, 0.0 }
 0x114   : > { %v4694_v13 = vmax.f32 %v662_v46, 0.0  ;;  %v665_v26 = vadd.f32 %v4128_v32, %v4505_v3  ;;  %v656_v21 = vpop.f32.mrb[11].mxu0  ;;  %v1733_v45 = vmul.f32 %v4477_v47, %v1697_v4  ;;  %v1763_v38 = vadd.f32 %v1731_v50, %v4508_v5 }
 0x115   : > { %v4699_v24 = vmax.f32 %v654_v40, 0.0  ;;  %v657_v58 = vadd.f32 %v4505_v3, %v656_v21  ;;  %v1764_v34 = vadd.f32 %v1732_v51, %v1568_v48  ;;  %v1832_v36 = vmul.f32 %v4513_v7, %v1796_v52 }
 0x116   : > { %6668 = vst [vmem:[#allocation18_spill] sm:$0xff] %v4694_v13  ;;  %v6669_v35 = vand.u32 15, %v4495_v61  ;;  %793 = vst [vmem:[#allocation2 + $0x68] sm:$0xff] %v4694_v13  ;;  %v4712_v32 = vmax.f32 %v665_v26, 0.0  ;;  %v4714_v5 = vld [vmem:[#allocation2 + $0x37] sm:$0xff]  ;;  %v1765_v21 = vadd.f32 %v1733_v45, %v1569_v25  ;;  %v1833_v50 = vmul.f32 %v4513_v7, %v1305_v49 }
 0x117   : > { %v4716_v40 = vld [vmem:[#allocation2 + $0x31] sm:$0xff]  ;;  %v4721_v48 = vmul.f32 %v4500_v2, %v4614_v59  ;;  %791 = vst [vmem:[#allocation2 + $0x58] sm:$0xff] %v4699_v24  ;;  %v4724_v61 = vmax.f32 %v657_v58, 0.0  ;;  %v1834_v52 = vmul.f32 %v4513_v7, %v1798_v39  ;;  %v4732_v51 = vmul.f32 %v4520_v10, %v4614_v59 }
 0x118   : > { %vm4707_vm6 = vcmp.gt.s32.totalorder %v6669_v35, 0  ;;  %6672 = vst [vmem:[#allocation19_spill] sm:$0xff] %v4712_v32  ;;  %v1699_v26 = vsel %vm4619_vm5, %v4716_v40, 0.0  ;;  %794 = vst [vmem:[#allocation2 + $0x70] sm:$0xff] %v4712_v32  ;;  %v1571_v25 = vadd.f32 %v4633_v12, %v1439_v23  ;;  %v1734_v49 = vmul.f32 %v4477_v47, %v4702_v19 }
 0x119   : > { %6673 = vst [vmem:[#allocation20_spill] sm:$0xff] %v4721_v48  ;;  %6674 = vst [vmem:[#allocation21_spill] sm:$0xff] %v4724_v61  ;;  %v1835_v4 = vmul.f32 %v4513_v7, %v4651_v56  ;;  %v1864_v45 = vadd.f32 %v1832_v36, %v4510_v6  ;;  %v4131_v58 = vpop.f32.mrb[12].mxu0  ;;  %v1570_v39 = vadd.f32 %v4602_v18, %v1438_v33  ;;  %v1800_v59 = vsel %vm4574_vm3, %v4714_v5, 0.0 }
 0x11a   : > { %792 = vst [vmem:[#allocation2 + $0x60] sm:$0xff] %v4724_v61  ;;  %v1865_v35 = vadd.f32 %v1833_v50, %v1763_v38  ;;  %v1866_v32 = vadd.f32 %v1834_v52, %v1764_v34  ;;  %v678_v23 = vadd.f32 %v4131_v58, %v4505_v3  ;;  %v669_v12 = vpop.f32.mrb[13].mxu0  ;;  %v1735_v13 = vmul.f32 %v4477_v47, %v1699_v26 }
 0x11b   : > { %v1867_v48 = vadd.f32 %v1835_v4, %v1765_v21  ;;  %v1969_v6 = vsel %vm4557_vm2, %v4677_v0, 0.0  ;;  %v670_v36 = vadd.f32 %v4505_v3, %v669_v12  ;;  %v4132_v61 = vpop.f32.mrb[14].mxu0  ;;  %v1934_v33 = vadd.f32 %v4624_v17, %v1864_v45 }
 0x11c   : > { %v1935_v18 = vadd.f32 %v4643_v55, %v1865_v35  ;;  %v1936_v38 = vadd.f32 %v4609_v60, %v1866_v32  ;;  %v762_v34 = vmax.f32 %v678_v23, 0.0  ;;  %v681_v50 = vadd.f32 %v4132_v61, %v4505_v3  ;;  %v672_v52 = vpop.f32.mrb[15].mxu0 }
 0x11d   : > { %v4757_v26 = vadd.f32 %v4636_v29, %v1867_v48  ;;  %v2004_v21 = vmul.f32 %v4515_v8, %v4664_v27  ;;  %v4761_v0 = vmax.f32 %v670_v36, 0.0  ;;  %v673_v4 = vadd.f32 %v4505_v3, %v672_v52  ;;  %v1309_v36 = vld [vmem:[#allocation2 + $0x3f] sm:$0xff] }
 0x11e   : > { %v1836_v17 = vmul.f32 %v4513_v7, %v1800_v59  ;;  %v2005_v55 = vmul.f32 %v4515_v8, %v1969_v6  ;;  %797 = vst [vmem:[#allocation2 + $0x88] sm:$0xff] %v762_v34  ;;  %v4766_v60 = vmax.f32 %v681_v50, 0.0  ;;  %v1971_v32 = vsel %vm4588_vm4, %v4716_v40, 0.0 }
 0x11f   : > { %v2036_v29 = vadd.f32 %v2004_v21, %v1934_v33  ;;  %v2070_v27 = vsel %vm4459_vm0, %v4661_v42, 0.0  ;;  %795 = vst [vmem:[#allocation2 + $0x78] sm:$0xff] %v4761_v0  ;;  %v4775_v48 = vmax.f32 %v673_v4, 0.0  ;;  %v1766_v61 = vadd.f32 %v1734_v49, %v1570_v39 }
 0x120   : > { %v2037_v45 = vadd.f32 %v2005_v55, %v1935_v18  ;;  %v2106_v58 = vmul.f32 %v4518_v9, %v2070_v27  ;;  %798 = vst [vmem:[#allocation2 + $0x90] sm:$0xff] %v4766_v60  ;;  %v2006_v59 = vmul.f32 %v4515_v8, %v4702_v19  ;;  %v2107_v35 = vmul.f32 %v4518_v9, %v4651_v56 }
 0x121   : > { %v2243_v37 = vsel %vm4557_vm2, %v4716_v40, 0.0  ;;  %v1404_v42 = vsel %vm4707_vm6, %v4714_v5, 0.0  ;;  %796 = vst [vmem:[#allocation2 + $0x80] sm:$0xff] %v4775_v48  ;;  %v4135_v49 = vpop.f32.mrb[16].mxu0  ;;  %v4790_v39 = vadd.f32 %v1735_v13, %v1571_v25  ;;  %v4792_v23 = vadd.f32 %v1836_v17, %v1766_v61 }
 0x122   : > { %v2007_v12 = vmul.f32 %v4515_v8, %v1971_v32  ;;  %v2138_v6 = vadd.f32 %v2106_v58, %v2036_v29  ;;  %v694_v56 = vadd.f32 %v4135_v49, %v4505_v3  ;;  %v685_v33 = vpop.f32.mrb[17].mxu0  ;;  %v2038_v31 = vadd.f32 %v2006_v59, %v1936_v38  ;;  %v4808_v38 = vld [vmem:[#allocation2 + $0x39] sm:$0xff] }
 0x123   : > { %v2139_v40 = vadd.f32 %v2107_v35, %v2037_v45  ;;  %v2278_v18 = vmul.f32 %v4522_v11, %v4702_v19  ;;  %v6675_v34 = vand.u32 15, %v4498_v62  ;;  %v686_v13 = vadd.f32 %v4505_v3, %v685_v33  ;;  %v4136_v25 = vpop.f32.mrb[18].mxu0  ;;  %v4815_v32 = vld [vmem:[%s6612_s4] ss:$0 sm:$0xff] }
 0x124   : > { %v2208_v52 = vadd.f32 %v4612_v1, %v2138_v6  ;;  %v2279_v21 = vmul.f32 %v4522_v11, %v2243_v37  ;;  %v1440_v4 = vmul.f32 %v4468_v41, %v1404_v42  ;;  %v766_v17 = vmax.f32 %v694_v56, 0.0  ;;  %v688_v55 = vpop.f32.mrb[19].mxu0  ;;  %v4826_v6 = vld [vmem:[#allocation2 + $0x41] sm:$0xff] }
 0x125   : > { %vm4800_vm7 = vcmp.gt.s32.totalorder %v6675_v34, 0  ;;  %v697_v19 = vadd.f32 %v4136_v25, %v4505_v3  ;;  %v2209_v62 = vadd.f32 %v4646_v28, %v2139_v40  ;;  %v1441_v29 = vmul.f32 %v4468_v41, %v1309_v36 }
 0x126   : > { %v764_v1 = vmax.f32 %v686_v13, 0.0  ;;  %v689_v27 = vadd.f32 %v4505_v3, %v688_v55  ;;  %v2310_v61 = vadd.f32 %v2278_v18, %v2208_v52  ;;  %v1540_v45 = vmul.f32 %v4473_v44, %v4629_v57  ;;  %801 = vst [vmem:[#allocation2 + $0xa8] sm:$0xff] %v766_v17 }
 0x127   : > { %v767_v58 = vmax.f32 %v697_v19, 0.0  ;;  %v2311_v59 = vadd.f32 %v2279_v21, %v2209_v62  ;;  %v1541_v28 = vmul.f32 %v4473_v44, %v4649_v63  ;;  %v1736_v35 = vmul.f32 %v4477_v47, %v4808_v38 }
 0x128   : > { %799 = vst [vmem:[#allocation2 + $0x98] sm:$0xff] %v764_v1  ;;  %v765_v37 = vmax.f32 %v689_v27, 0.0  ;;  %v2349_v42 = vadd.f32 %v4815_v32, %v2310_v61  ;;  %v1572_v49 = vadd.f32 %v1540_v45, %v1440_v4  ;;  %v1837_v56 = vmul.f32 %v4513_v7, %v1309_v36 }
 0x129   : > { %802 = vst [vmem:[#allocation2 + $0xb0] sm:$0xff] %v767_v58  ;;  %v2350_v33 = vadd.f32 %v4815_v32, %v2311_v59  ;;  %v4830_v40 = vadd.f32 %v1541_v28, %v1441_v29  ;;  %v2039_v18 = vadd.f32 %v2007_v12, %v4757_v26  ;;  %v2072_v34 = vsel %vm4553_vm1, %v4714_v5, 0.0  ;;  %v4139_v25 = vpop.f32.mrb[20].mxu0  ;;  %v4846_v12 = vld [vmem:[#allocation2 + $0x47] sm:$0xff] }
 0x12a   : > { %800 = vst [vmem:[#allocation2 + $0xa0] sm:$0xff] %v765_v37  ;;  %v2381_v13 = vmax.f32 %v2349_v42, 0.0  ;;  %v2108_v52 = vmul.f32 %v4518_v9, %v2072_v34  ;;  %v2109_v21 = vmul.f32 %v4518_v9, %v1309_v36  ;;  %v2178_v4 = vmul.f32 %v4520_v10, %v4629_v57  ;;  %v701_v5 = vpop.f32.mrb[21].mxu0 }
 0x12b   : > { %v2382_v17 = vmax.f32 %v2350_v33, 0.0  ;;  %v710_v19 = vadd.f32 %v4139_v25, %v4505_v3  ;;  %v2179_v26 = vmul.f32 %v4520_v10, %v4649_v63  ;;  %v2245_v30 = vsel %vm4588_vm4, %v4826_v6, 0.0  ;;  %v4140_v1 = vpop.f32.mrb[22].mxu0  ;;  %v1311_v33 = vld [vmem:[#allocation2 + $0x4f] sm:$0xff] }
 0x12c   : > { %v2140_v55 = vadd.f32 %v2108_v52, %v2038_v31  ;;  %v2141_v62 = vadd.f32 %v2109_v21, %v2039_v18  ;;  %v2280_v36 = vmul.f32 %v4522_v11, %v4808_v38  ;;  %v2281_v29 = vmul.f32 %v4522_v11, %v2245_v30  ;;  %v704_v31 = vpop.f32.mrb[23].mxu0 }
 0x12d   : > { %v6678_v27 = vand.u32 15, %v4530_v16  ;;  %v2413_v45 = vpack.c.bf16 %v2382_v17, %v2381_v13  ;;  %v770_v53 = vmax.f32 %v710_v19, 0.0  ;;  %v702_v58 = vadd.f32 %v4505_v3, %v701_v5 }
 0x12e   : > { %v713_v59 = vadd.f32 %v4140_v1, %v4505_v3  ;;  %v2210_v28 = vadd.f32 %v2178_v4, %v2140_v55  ;;  %v2211_v37 = vadd.f32 %v2179_v26, %v2141_v62  ;;  %v705_v42 = vadd.f32 %v4505_v3, %v704_v31  ;;  %v1606_v26 = vld [vmem:[#allocation2 + $0x49] sm:$0xff] }
 0x12f   : > { %vm4853_vm8 = vcmp.gt.s32.totalorder %v6678_v27, 0  ;;  %v1406_v16 = vsel %vm4800_vm7, %v4846_v12, 0.0  ;;  %v6681_v18 = vand.u32 15, %v4527_v15  ;;  %4165 = vmatprep.mubr.bf16.mxu1 %v2413_v45  ;;  %805 = vst [vmem:[#allocation2 + $0xc8] sm:$0xff] %v770_v53  ;;  %v4869_v13 = vadd.f32 %v1736_v35, %v1572_v49 }
 0x130   : > { %v4871_v25 = vmax.f32 %v702_v58, 0.0  ;;  %v4873_v52 = vmax.f32 %v713_v59, 0.0  ;;  %v1442_v21 = vmul.f32 %v4468_v41, %v1406_v16  ;;  %v1906_v4 = vmul.f32 %v4500_v2, %v4629_v57  ;;  %v4904_v59 = vld [vmem:[#allocation2 + $0x51] sm:$0xff] }
 0x131   : > { %vm4865_vm9 = vcmp.lt.s32.totalorder %v6681_v18, 15  ;;  %v2312_v17 = vadd.f32 %v2280_v36, %v2210_v28  ;;  %v2313_v19 = vadd.f32 %v2281_v29, %v2211_v37  ;;  %v4878_v15 = vmax.f32 %v705_v42, 0.0  ;;  %v4143_v36 = vpop.f32.mrb[24].mxu0 }
 0x132   : > { %v1907_v30 = vmul.f32 %v4500_v2, %v4649_v63  ;;  %v1973_v35 = vsel %vm4619_vm5, %v4826_v6, 0.0  ;;  %v2008_v49 = vmul.f32 %v4515_v8, %v4808_v38  ;;  %803 = vst [vmem:[#allocation2 + $0xb8] sm:$0xff] %v4871_v25  ;;  %806 = vst [vmem:[#allocation2 + $0xd0] sm:$0xff] %v4873_v52  ;;  %v1443_v57 = vmul.f32 %v4468_v41, %v1311_v33  ;;  %v4902_v45 = vpop.f32.mrb[25].mxu0 }
 0x133   : > { %v2351_v5 = vadd.f32 %v4815_v32, %v2312_v17  ;;  %v2352_v55 = vadd.f32 %v4815_v32, %v2313_v19  ;;  %804 = vst [vmem:[#allocation2 + $0xc0] sm:$0xff] %v4878_v15  ;;  %v1543_v63 = vmul.f32 %v4473_v44, %v4639_v54  ;;  %v1869_v62 = vadd.f32 %v1837_v56, %v4790_v39  ;;  %v4907_v56 = vld [vmem:[#allocation2 + $0x57] sm:$0xff]  ;;  %v1313_v19 = vld [vmem:[#allocation2 + $0x5f] sm:$0xff] }
 0x134   : > { %v1574_v38 = vadd.f32 %v4669_v14, %v1442_v21  ;;  %v1738_v29 = vmul.f32 %v4477_v47, %v1606_v26  ;;  %v1802_v1 = vsel %vm4707_vm6, %v4846_v12, 0.0  ;;  %v1938_v27 = vadd.f32 %v1906_v4, %v4792_v23  ;;  %v4909_v14 = vpop.f32.mrb[26].mxu0 }
 0x135   : > { %v2383_v53 = vmax.f32 %v2351_v5, 0.0  ;;  %v2384_v58 = vmax.f32 %v2352_v55, 0.0  ;;  %v1939_v31 = vadd.f32 %v1907_v30, %v1869_v62  ;;  %v2009_v39 = vmul.f32 %v4515_v8, %v1973_v35  ;;  %v4917_v16 = vpop.f32.mrb[27].mxu0 }
 0x136   : > { %v4911_v28 = vadd.f32 %v1543_v63, %v1443_v57  ;;  %v1839_v37 = vmul.f32 %v4513_v7, %v1311_v33  ;;  %v2040_v42 = vadd.f32 %v2008_v49, %v1938_v27  ;;  %v2074_v23 = vsel %vm4574_vm3, %v4846_v12, 0.0 }
 0x137   : > { %v2414_v18 = vpack.c.bf16 %v2384_v58, %v2383_v53  ;;  %v2041_v21 = vadd.f32 %v2009_v39, %v1939_v31  ;;  %v2110_v4 = vmul.f32 %v4518_v9, %v2074_v23  ;;  %v2111_v17 = vmul.f32 %v4518_v9, %v1311_v33  ;;  %v4946_v58 = vld [vmem:[#allocation2 + $0x59] sm:$0xff] }
 0x138   : > { %v4921_v30 = vadd.f32 %v1738_v29, %v1574_v38  ;;  %v2247_v35 = vsel %vm4619_vm5, %v4904_v59, 0.0  ;;  %v726_v49 = vadd.f32 %v4143_v36, %v4505_v3  ;;  %v1408_v43 = vsel %vm4853_vm8, %v4907_v56, 0.0 }
 0x139   : > { %4166 = vmatmul.mubr.bf16.vlgmr.msra.gmra.mrb[0].mxu1 %v2414_v18  ;;  %v2142_v12 = vadd.f32 %v2110_v4, %v2040_v42  ;;  %v2143_v57 = vadd.f32 %v2111_v17, %v2041_v21  ;;  %v2181_v5 = vmul.f32 %v4520_v10, %v4639_v54  ;;  %v2282_v33 = vmul.f32 %v4522_v11, %v1606_v26  ;;  %v4949_v39 = vpop.f32.mrb[28].mxu0  ;;  %v6687_v42 = vld [vmem:[#allocation21_spill] sm:$0xff] }
 0x13a   : > { %v774_v55 = vmax.f32 %v726_v49, 0.0  ;;  %v1444_v63 = vmul.f32 %v4468_v41, %v1408_v43  ;;  %v1445_v22 = vmul.f32 %v4468_v41, %v1313_v19  ;;  %v1701_v62 = vsel %vm4865_vm9, %v4826_v6, 0.0  ;;  %v4958_v18 = vpop.f32.mrb[29].mxu0  ;;  %v6688_v49 = vld [vmem:[#allocation5_spill] sm:$0xff] }
 0x13b   : > { %v6684_v36 = vand.u32 15, %v4537_v20  ;;  %v2212_v29 = vadd.f32 %v4732_v51, %v2142_v12  ;;  %v2213_v27 = vadd.f32 %v2181_v5, %v2143_v57  ;;  %v2283_v53 = vmul.f32 %v4522_v11, %v2247_v35  ;;  %v4968_v12 = vpop.f32.mrb[30].mxu0 }
 0x13c   : > { %v1737_v31 = vmul.f32 %v4477_v47, %v1701_v62  ;;  %v1909_v6 = vmul.f32 %v4500_v2, %v4639_v54  ;;  %809 = vst [vmem:[#allocation2 + $0xe8] sm:$0xff] %v774_v55  ;;  %v1544_v20 = vmul.f32 %v4473_v44, %v4699_v24  ;;  %v1545_v23 = vmul.f32 %v4473_v44, %v6687_v42 }
 0x13d   : > { %vm4940_vm10 = vcmp.gt.s32.totalorder %v6684_v36, 0  ;;  %v1838_v51 = vmul.f32 %v4513_v7, %v1802_v1  ;;  %v2010_v21 = vmul.f32 %v4515_v8, %v1606_v26  ;;  %v2314_v4 = vadd.f32 %v2282_v33, %v2212_v29  ;;  %v4975_v33 = vpop.f32.mrb[31].mxu0 }
 0x13e   : > { %v2315_v17 = vadd.f32 %v2283_v53, %v2213_v27  ;;  %v1769_v35 = vadd.f32 %v1737_v31, %v4830_v40  ;;  %v6689_v43 = vand.u32 15, %v6688_v49  ;;  %v1576_v57 = vadd.f32 %v1544_v20, %v1444_v63  ;;  %v4990_v20 = vld [vmem:[#allocation2 + $0x61] sm:$0xff] }
 0x13f   : > { %v4970_v5 = vadd.f32 %v1545_v23, %v1445_v22  ;;  %v1740_v1 = vmul.f32 %v4477_v47, %v4946_v58  ;;  %v1870_v26 = vadd.f32 %v1838_v51, %v4869_v13  ;;  %v2353_v40 = vadd.f32 %v4815_v32, %v2314_v4  ;;  %v6692_v22 = vld [vmem:[#allocation20_spill] sm:$0xff]  ;;  %v4997_v49 = vld [vmem:[#allocation2 + $0x67] sm:$0xff] }
 0x140   : > { %vm4964_vm11 = vcmp.lt.s32.totalorder %v6689_v43, 15  ;;  %v2354_v55 = vadd.f32 %v4815_v32, %v2315_v17  ;;  %v1871_v62 = vadd.f32 %v1839_v37, %v1769_v35  ;;  %v1975_v36 = vsel %vm4865_vm9, %v4904_v59, 0.0 }
 0x141   : > { %v1804_v63 = vsel %vm4800_vm7, %v4907_v56, 0.0  ;;  %v1940_v29 = vadd.f32 %v6692_v22, %v1870_v26  ;;  %v2011_v27 = vmul.f32 %v4515_v8, %v1975_v36  ;;  %v2076_v13 = vsel %vm4707_vm6, %v4907_v56, 0.0 }
 0x142   : > { %v2385_v53 = vmax.f32 %v2353_v40, 0.0  ;;  %v2386_v31 = vmax.f32 %v2354_v55, 0.0  ;;  %v1841_v37 = vmul.f32 %v4513_v7, %v1313_v19  ;;  %v1941_v23 = vadd.f32 %v1909_v6, %v1871_v62  ;;  %v1315_v62 = vld [vmem:[#allocation2 + $0x6f] sm:$0xff] }
 0x143   : > { %v4993_v51 = vadd.f32 %v1740_v1, %v1576_v57  ;;  %v2042_v4 = vadd.f32 %v2010_v21, %v1940_v29  ;;  %v2112_v17 = vmul.f32 %v4518_v9, %v2076_v13  ;;  %v2113_v35 = vmul.f32 %v4518_v9, %v1313_v19  ;;  %v6693_v29 = vld [vmem:[#allocation7_spill] sm:$0xff] }
 0x144   : > { %v2415_v43 = vpack.c.bf16 %v2386_v31, %v2385_v53  ;;  %v2043_v26 = vadd.f32 %v2011_v27, %v1941_v23  ;;  %v2182_v46 = vmul.f32 %v4520_v10, %v4699_v24  ;;  %v2183_v56 = vmul.f32 %v4520_v10, %v6687_v42 }
 0x145   : > { %v2144_v40 = vadd.f32 %v2112_v17, %v2042_v4  ;;  %v2249_v6 = vsel %vm4865_vm9, %v4990_v20, 0.0  ;;  %v718_v21 = vadd.f32 %v4505_v3, %v4902_v45  ;;  %v729_v19 = vadd.f32 %v4909_v14, %v4505_v3 }
 0x146   : > { %4169 = vmatprep.mubr.bf16.mxu1 %v2415_v43  ;;  %v2145_v57 = vadd.f32 %v2113_v35, %v2043_v26  ;;  %v2284_v1 = vmul.f32 %v4522_v11, %v4946_v58  ;;  %v721_v55 = vadd.f32 %v4505_v3, %v4917_v16  ;;  %v1410_v34 = vsel %vm4940_vm10, %v4997_v49, 0.0  ;;  %v6697_v35 = vld [vmem:[#allocation18_spill] sm:$0xff] }
 0x147   : > { %v2214_v36 = vadd.f32 %v2182_v46, %v2144_v40  ;;  %v5017_v22 = vmax.f32 %v718_v21, 0.0  ;;  %v5019_v45 = vmax.f32 %v729_v19, 0.0  ;;  %v1446_v14 = vmul.f32 %v4468_v41, %v1410_v34  ;;  %v1610_v26 = vld [vmem:[#allocation2 + $0x69] sm:$0xff] }
 0x148   : > { %v6694_v27 = vand.u32 15, %v6693_v29  ;;  %v1910_v16 = vmul.f32 %v4500_v2, %v4699_v24  ;;  %v2215_v53 = vadd.f32 %v2183_v56, %v2145_v57  ;;  %v2285_v31 = vmul.f32 %v4522_v11, %v2249_v6  ;;  %v6698_v46 = vld [vmem:[#allocation6_spill] sm:$0xff] }
 0x149   : > { %v5031_v23 = vmax.f32 %v721_v55, 0.0  ;;  %v2316_v4 = vadd.f32 %v2284_v1, %v2214_v36  ;;  %807 = vst [vmem:[#allocation2 + $0xd8] sm:$0xff] %v5017_v22  ;;  %810 = vst [vmem:[#allocation2 + $0xf0] sm:$0xff] %v5019_v45  ;;  %v1447_v17 = vmul.f32 %v4468_v41, %v1315_v62  ;;  %v1546_v43 = vmul.f32 %v4473_v44, %v6697_v35 }
 0x14a   : > { %vm5024_vm12 = vcmp.gt.s32.totalorder %v6694_v27, 0  ;;  %v1703_v24 = vsel %vm4964_vm11, %v4904_v59, 0.0  ;;  %v6699_v56 = vand.u32 15, %v6698_v46  ;;  %v1911_v6 = vmul.f32 %v4500_v2, %v6687_v42  ;;  %v6702_v59 = vld [vmem:[#allocation19_spill] sm:$0xff] }
 0x14b   : > { %v2012_v21 = vmul.f32 %v4515_v8, %v4946_v58  ;;  %v2317_v19 = vadd.f32 %v2285_v31, %v2215_v53  ;;  %808 = vst [vmem:[#allocation2 + $0xe0] sm:$0xff] %v5031_v23  ;;  %v1739_v57 = vmul.f32 %v4477_v47, %v1703_v24  ;;  %v2355_v1 = vadd.f32 %v4815_v32, %v2316_v4  ;;  %v5073_v46 = vld [vmem:[#allocation2 + $0x71] sm:$0xff] }
 0x14c   : > { %vm5043_vm13 = vcmp.lt.s32.totalorder %v6699_v56, 15  ;;  %v1547_v55 = vmul.f32 %v4473_v44, %v6702_v59  ;;  %v1578_v34 = vadd.f32 %v1546_v43, %v1446_v14  ;;  %v1840_v36 = vmul.f32 %v4513_v7, %v1804_v63 }
 0x14d   : > { %v2356_v29 = vadd.f32 %v4815_v32, %v2317_v19  ;;  %v1742_v42 = vmul.f32 %v4477_v47, %v1610_v26  ;;  %v1771_v27 = vadd.f32 %v1739_v57, %v4911_v28  ;;  %v1806_v58 = vsel %vm4853_vm8, %v4997_v49, 0.0  ;;  %v5081_v57 = vld [vmem:[#allocation2 + $0x77] sm:$0xff] }
 0x14e   : > { %v2387_v53 = vmax.f32 %v2355_v1, 0.0  ;;  %v5063_v31 = vadd.f32 %v1547_v55, %v1447_v17  ;;  %v1872_v4 = vadd.f32 %v1840_v36, %v4921_v30  ;;  %v1977_v14 = vsel %vm4964_vm11, %v4990_v20, 0.0 }
 0x14f   : > { %v2388_v63 = vmax.f32 %v2356_v29, 0.0  ;;  %v1843_v43 = vmul.f32 %v4513_v7, %v1315_v62  ;;  %v1873_v24 = vadd.f32 %v1841_v37, %v1771_v27  ;;  %v2078_v28 = vsel %vm4800_vm7, %v4997_v49, 0.0 }
 0x150   : > { %v5075_v56 = vadd.f32 %v1742_v42, %v1578_v34  ;;  %v1912_v17 = vmul.f32 %v4500_v2, %v6697_v35  ;;  %v1913_v30 = vmul.f32 %v4500_v2, %v6702_v59  ;;  %v1942_v19 = vadd.f32 %v1910_v16, %v1872_v4  ;;  %v1317_v42 = vld [vmem:[#allocation2 + $0x7f] sm:$0xff] }
 0x151   : > { %v2416_v1 = vpack.c.bf16 %v2388_v63, %v2387_v53  ;;  %v1943_v55 = vadd.f32 %v1911_v6, %v1873_v24  ;;  %v2013_v37 = vmul.f32 %v4515_v8, %v1977_v14  ;;  %v2014_v50 = vmul.f32 %v4515_v8, %v1610_v26  ;;  %v5100_v14 = vld [vmem:[#allocation2 + $0x79] sm:$0xff] }
 0x152   : > { %v2044_v49 = vadd.f32 %v2012_v21, %v1942_v19  ;;  %v2114_v36 = vmul.f32 %v4518_v9, %v2078_v28  ;;  %v2115_v34 = vmul.f32 %v4518_v9, %v1315_v62  ;;  %v742_v29 = vadd.f32 %v4949_v39, %v4505_v3  ;;  %v6703_v63 = vld [vmem:[#allocation9_spill] sm:$0xff] }
 0x153   : > { %4170 = vmatmul.mubr.bf16.gmra.mrb[4].mxu1 %v2416_v1  ;;  %v2045_v27 = vadd.f32 %v2013_v37, %v1943_v55  ;;  %v2184_v16 = vmul.f32 %v4520_v10, %v6697_v35  ;;  %v2251_v6 = vsel %vm4964_vm11, %v5073_v46, 0.0  ;;  %v1412_v21 = vsel %vm5024_vm12, %v5081_v57, 0.0 }
 0x154   : > { %v2146_v53 = vadd.f32 %v2114_v36, %v2044_v49  ;;  %v2185_v62 = vmul.f32 %v4520_v10, %v6702_v59  ;;  %v778_v4 = vmax.f32 %v742_v29, 0.0  ;;  %v1448_v39 = vmul.f32 %v4468_v41, %v1412_v21 }
 0x155   : > { %v6704_v24 = vand.u32 15, %v6703_v63  ;;  %v2147_v54 = vadd.f32 %v2115_v34, %v2045_v27  ;;  %v2286_v28 = vmul.f32 %v4522_v11, %v1610_v26  ;;  %v1449_v19 = vmul.f32 %v4468_v41, %v1317_v42  ;;  %v6707_v27 = vld [vmem:[#allocation8_spill] sm:$0xff] }
 0x156   : > { %v1705_v59 = vsel %vm5043_vm13, %v4990_v20, 0.0  ;;  %v2216_v1 = vadd.f32 %v2184_v16, %v2146_v53  ;;  %v2287_v55 = vmul.f32 %v4522_v11, %v2251_v6  ;;  %813 = vst [vmem:[#allocation2 + $0x108] sm:$0xff] %v778_v4  ;;  %v1548_v37 = vmul.f32 %v4473_v44, %v4761_v0 }
 0x157   : > { %vm5104_vm14 = vcmp.gt.s32.totalorder %v6704_v24, 0  ;;  %v1741_v49 = vmul.f32 %v4477_v47, %v1705_v59  ;;  %v2217_v36 = vadd.f32 %v2185_v62, %v2147_v54  ;;  %v1549_v34 = vmul.f32 %v4473_v44, %v4775_v48 }
 0x158   : > { %v1744_v26 = vmul.f32 %v4477_v47, %v5100_v14  ;;  %v1842_v29 = vmul.f32 %v4513_v7, %v1806_v58  ;;  %v6708_v20 = vand.u32 15, %v6707_v27  ;;  %v2318_v6 = vadd.f32 %v2286_v28, %v2216_v1  ;;  %v5144_v1 = vld [vmem:[#allocation2 + $0x81] sm:$0xff] }
 0x159   : > { %v1580_v21 = vadd.f32 %v1548_v37, %v1448_v39  ;;  %v1773_v53 = vadd.f32 %v1741_v49, %v4970_v5  ;;  %v1808_v62 = vsel %vm4940_vm10, %v5081_v57, 0.0  ;;  %v2319_v4 = vadd.f32 %v2287_v55, %v2217_v36 }
 0x15a   : > { %vm5124_vm15 = vcmp.lt.s32.totalorder %v6708_v20, 15  ;;  %v5132_v63 = vadd.f32 %v1549_v34, %v1449_v19  ;;  %v1874_v24 = vadd.f32 %v1842_v29, %v4993_v51  ;;  %v1979_v58 = vsel %vm5043_vm13, %v5073_v46, 0.0  ;;  %v5151_v34 = vld [vmem:[#allocation2 + $0x87] sm:$0xff] }
 0x15b   : > { %v2357_v54 = vadd.f32 %v4815_v32, %v2318_v6  ;;  %v1875_v59 = vadd.f32 %v1843_v43, %v1773_v53  ;;  %v2015_v39 = vmul.f32 %v4515_v8, %v1979_v58  ;;  %v2080_v5 = vsel %vm4853_vm8, %v5081_v57, 0.0 }
 0x15c   : > { %v2358_v28 = vadd.f32 %v4815_v32, %v2319_v4  ;;  %v1845_v19 = vmul.f32 %v4513_v7, %v1317_v42  ;;  %v1914_v51 = vmul.f32 %v4500_v2, %v4761_v0  ;;  %v1944_v55 = vadd.f32 %v1912_v17, %v1874_v24  ;;  %v1514_v4 = vld [vmem:[#allocation2 + $0x88] sm:$0xff] }
 0x15d   : > { %v2389_v37 = vmax.f32 %v2357_v54, 0.0  ;;  %v1945_v49 = vadd.f32 %v1913_v30, %v1875_v59  ;;  %v2116_v43 = vmul.f32 %v4518_v9, %v2080_v5  ;;  %v2117_v36 = vmul.f32 %v4518_v9, %v1317_v42  ;;  %v1319_v54 = vld [vmem:[#allocation2 + $0x8f] sm:$0xff] }
 0x15e   : > { %v2390_v61 = vmax.f32 %v2358_v28, 0.0  ;;  %v2046_v57 = vadd.f32 %v2014_v50, %v1944_v55  ;;  %v2186_v29 = vmul.f32 %v4520_v10, %v4761_v0  ;;  %v2187_v27 = vmul.f32 %v4520_v10, %v4775_v48  ;;  %v6711_v59 = vld [vmem:[#allocation11_spill] sm:$0xff] }
 0x15f   : > { %v2047_v20 = vadd.f32 %v2015_v39, %v1945_v49  ;;  %v2253_v17 = vsel %vm5043_vm13, %v5144_v1, 0.0  ;;  %v734_v30 = vadd.f32 %v4505_v3, %v4958_v18  ;;  %v745_v42 = vadd.f32 %v4968_v12, %v4505_v3 }
 0x160   : > { %v2417_v6 = vpack.c.bf16 %v2390_v61, %v2389_v37  ;;  %v2148_v53 = vadd.f32 %v2116_v43, %v2046_v57  ;;  %v737_v50 = vadd.f32 %v4505_v3, %v4975_v33  ;;  %v1414_v0 = vsel %vm5104_vm14, %v5151_v34, 0.0  ;;  %v1614_v43 = vld [vmem:[#allocation2 + $0x89] sm:$0xff] }
 0x161   : > { %v2149_v24 = vadd.f32 %v2117_v36, %v2047_v20  ;;  %v5169_v58 = vmax.f32 %v734_v30, 0.0  ;;  %v5171_v40 = vmax.f32 %v745_v42, 0.0  ;;  %v1450_v18 = vmul.f32 %v4468_v41, %v1414_v0 }
 0x162   : > { %v6712_v12 = vand.u32 15, %v6711_v59  ;;  %4173 = vmatprep.mubr.bf16.mxu1 %v2417_v6  ;;  %v5180_v3 = vadd.f32 %v1744_v26, %v1580_v21  ;;  %v2218_v33 = vadd.f32 %v2186_v29, %v2148_v53  ;;  %v2288_v5 = vmul.f32 %v4522_v11, %v5100_v14  ;;  %v6715_v21 = vld [vmem:[#allocation10_spill] sm:$0xff] }
 0x163   : > { %v5184_v28 = vmax.f32 %v737_v50, 0.0  ;;  %v2219_v55 = vadd.f32 %v2187_v27, %v2149_v24  ;;  %v2289_v37 = vmul.f32 %v4522_v11, %v2253_v17  ;;  %811 = vst [vmem:[#allocation2 + $0xf8] sm:$0xff] %v5169_v58  ;;  %814 = vst [vmem:[#allocation2 + $0x110] sm:$0xff] %v5171_v40  ;;  %v1550_v49 = vmul.f32 %v4473_v44, %v1514_v4 }
 0x164   : > { %vm5176_vm0 = vcmp.gt.s32.totalorder %v6712_v12, 0  ;;  %v1707_v26 = vsel %vm5124_vm15, %v5073_v46, 0.0  ;;  %v6716_v36 = vand.u32 15, %v6715_v21  ;;  %v1915_v57 = vmul.f32 %v4500_v2, %v4775_v48 }
 0x165   : > { %v2320_v29 = vadd.f32 %v2288_v5, %v2218_v33  ;;  %812 = vst [vmem:[#allocation2 + $0x100] sm:$0xff] %v5184_v28  ;;  %v1451_v27 = vmul.f32 %v4468_v41, %v1319_v54  ;;  %v1743_v20 = vmul.f32 %v4477_v47, %v1707_v26  ;;  %v2016_v17 = vmul.f32 %v4515_v8, %v5100_v14 }
 0x166   : > { %vm5195_vm1 = vcmp.lt.s32.totalorder %v6716_v36, 15  ;;  %v2321_v46 = vadd.f32 %v2289_v37, %v2219_v55  ;;  %v1582_v30 = vadd.f32 %v1550_v49, %v1450_v18  ;;  %v1844_v42 = vmul.f32 %v4513_v7, %v1808_v62  ;;  %v5228_v49 = vld [vmem:[#allocation2 + $0x97] sm:$0xff] }
 0x167   : > { %v2359_v6 = vadd.f32 %v4815_v32, %v2320_v29  ;;  %v1551_v53 = vmul.f32 %v4473_v44, %v4766_v60  ;;  %v1746_v48 = vmul.f32 %v4477_v47, %v1614_v43  ;;  %v1775_v50 = vadd.f32 %v1743_v20, %v5063_v31  ;;  %v1516_v29 = vld [vmem:[#allocation2 + $0x98] sm:$0xff] }
 0x168   : > { %v2360_v0 = vadd.f32 %v4815_v32, %v2321_v46  ;;  %v1810_v24 = vsel %vm5024_vm12, %v5151_v34, 0.0  ;;  %v1876_v14 = vadd.f32 %v1844_v42, %v5075_v56  ;;  %v1981_v62 = vsel %vm5124_vm15, %v5144_v1, 0.0  ;;  %v5230_v56 = vld [vmem:[#allocation2 + $0x91] sm:$0xff]  ;;  %v1517_v46 = vld [vmem:[#allocation2 + $0xa0] sm:$0xff] }
 0x169   : > { %v2391_v18 = vmax.f32 %v2359_v6, 0.0  ;;  %v5220_v59 = vadd.f32 %v1551_v53, %v1451_v27  ;;  %v1847_v12 = vmul.f32 %v4513_v7, %v1319_v54  ;;  %v1877_v33 = vadd.f32 %v1845_v19, %v1775_v50  ;;  %v6719_v53 = vld [vmem:[#allocation13_spill] sm:$0xff] }
 0x16a   : > { %v2392_v5 = vmax.f32 %v2360_v0, 0.0  ;;  %v5223_v31 = vadd.f32 %v1746_v48, %v1582_v30  ;;  %v1946_v55 = vadd.f32 %v1914_v51, %v1876_v14  ;;  %v2082_v37 = vsel %vm4940_vm10, %v5151_v34, 0.0  ;;  %v1321_v34 = vld [vmem:[#allocation2 + $0x9f] sm:$0xff] }
 0x16b   : > { %v1916_v26 = vmul.f32 %v4500_v2, %v1514_v4  ;;  %v1917_v21 = vmul.f32 %v4500_v2, %v4766_v60  ;;  %v1947_v36 = vadd.f32 %v1915_v57, %v1877_v33  ;;  %v2017_v19 = vmul.f32 %v4515_v8, %v1981_v62  ;;  %v5255_v0 = vld [vmem:[#allocation2 + $0x99] sm:$0xff] }
 0x16c   : > { %v2418_v27 = vpack.c.bf16 %v2392_v5, %v2391_v18  ;;  %v2048_v20 = vadd.f32 %v2016_v17, %v1946_v55  ;;  %v2118_v51 = vmul.f32 %v4518_v9, %v2082_v37  ;;  %v2119_v38 = vmul.f32 %v4518_v9, %v1319_v54  ;;  %v6723_v5 = vld [vmem:[#allocation12_spill] sm:$0xff] }
 0x16d   : > { %v2049_v30 = vadd.f32 %v2017_v19, %v1947_v36  ;;  %v2188_v42 = vmul.f32 %v4520_v10, %v1514_v4  ;;  %v2189_v6 = vmul.f32 %v4520_v10, %v4766_v60  ;;  %v1416_v57 = vsel %vm5176_vm0, %v5228_v49, 0.0 }
 0x16e   : > { %v6720_v48 = vand.u32 15, %v6719_v53  ;;  %4174 = vmatmul.mubr.bf16.gmra.mrb[8].mxu1 %v2418_v27  ;;  %v2150_v54 = vadd.f32 %v2118_v51, %v2048_v20  ;;  %v2255_v50 = vsel %vm5124_vm15, %v5230_v56, 0.0  ;;  %v1452_v4 = vmul.f32 %v4468_v41, %v1416_v57 }
 0x16f   : > { %v1552_v60 = vmul.f32 %v4473_v44, %v1516_v29  ;;  %v2151_v14 = vadd.f32 %v2119_v38, %v2049_v30  ;;  %v1453_v62 = vmul.f32 %v4468_v41, %v1321_v34  ;;  %v1553_v18 = vmul.f32 %v4473_v44, %v1517_v46 }
 0x170   : > { %vm5246_vm2 = vcmp.gt.s32.totalorder %v6720_v48, 0  ;;  %v1709_v33 = vsel %vm5195_vm1, %v5144_v1, 0.0  ;;  %v6724_v55 = vand.u32 15, %v6723_v5  ;;  %v2018_v37 = vmul.f32 %v4515_v8, %v1614_v43 }
 0x171   : > { %v2220_v36 = vadd.f32 %v2188_v42, %v2150_v54  ;;  %v2290_v19 = vmul.f32 %v4522_v11, %v1614_v43  ;;  %v1745_v27 = vmul.f32 %v4477_v47, %v1709_v33  ;;  %v2221_v20 = vadd.f32 %v2189_v6, %v2151_v14  ;;  %v5295_v33 = vld [vmem:[#allocation2 + $0xa1] sm:$0xff] }
 0x172   : > { %vm5264_vm3 = vcmp.lt.s32.totalorder %v6724_v55, 15  ;;  %v2291_v51 = vmul.f32 %v4522_v11, %v2255_v50  ;;  %v1748_v38 = vmul.f32 %v4477_v47, %v5255_v0  ;;  %v1846_v1 = vmul.f32 %v4513_v7, %v1810_v24 }
 0x173   : > { %v2322_v30 = vadd.f32 %v2290_v19, %v2220_v36  ;;  %v1584_v57 = vadd.f32 %v1552_v60, %v1452_v4  ;;  %v1777_v53 = vadd.f32 %v1745_v27, %v5132_v63  ;;  %v1812_v42 = vsel %vm5104_vm14, %v5228_v49, 0.0 }
 0x174   : > { %v2323_v48 = vadd.f32 %v2291_v51, %v2221_v20  ;;  %v5279_v43 = vadd.f32 %v1553_v18, %v1453_v62  ;;  %v1878_v6 = vadd.f32 %v1846_v1, %v5180_v3  ;;  %v1983_v54 = vsel %vm5195_vm1, %v5230_v56, 0.0  ;;  %v5293_v18 = vld [vmem:[#allocation2 + $0xa7] sm:$0xff] }
 0x175   : > { %v2361_v50 = vadd.f32 %v4815_v32, %v2322_v30  ;;  %v1879_v24 = vadd.f32 %v1847_v12, %v1777_v53  ;;  %v2019_v4 = vmul.f32 %v4515_v8, %v1983_v54  ;;  %v2084_v63 = vsel %vm5024_vm12, %v5228_v49, 0.0  ;;  %v1518_v20 = vld [vmem:[#allocation2 + $0xa8] sm:$0xff] }
 0x176   : > { %v2362_v60 = vadd.f32 %v4815_v32, %v2323_v48  ;;  %v1849_v14 = vmul.f32 %v4513_v7, %v1321_v34  ;;  %v1918_v62 = vmul.f32 %v4500_v2, %v1516_v29  ;;  %v1948_v3 = vadd.f32 %v1916_v26, %v1878_v6  ;;  %v1323_v30 = vld [vmem:[#allocation2 + $0xaf] sm:$0xff] }
 0x177   : > { %v5297_v5 = vadd.f32 %v1748_v38, %v1584_v57  ;;  %v1919_v12 = vmul.f32 %v4500_v2, %v1517_v46  ;;  %v1949_v55 = vadd.f32 %v1917_v21, %v1879_v24  ;;  %v2120_v36 = vmul.f32 %v4518_v9, %v2084_v63  ;;  %v1519_v57 = vld [vmem:[#allocation2 + $0xb0] sm:$0xff]  ;;  %v6731_v63 = vld [vmem:[#allocation14_spill] sm:$0xff] }
 0x178   : > { %v2393_v13 = vmax.f32 %v2361_v50, 0.0  ;;  %v2394_v49 = vmax.f32 %v2362_v60, 0.0  ;;  %v2050_v19 = vadd.f32 %v2018_v37, %v1948_v3  ;;  %v2121_v27 = vmul.f32 %v4518_v9, %v1321_v34  ;;  %v6727_v21 = vld [vmem:[#allocation15_spill] sm:$0xff] }
 0x179   : > { %v2051_v51 = vadd.f32 %v2019_v4, %v1949_v55  ;;  %v2190_v26 = vmul.f32 %v4520_v10, %v1516_v29  ;;  %v2191_v1 = vmul.f32 %v4520_v10, %v1517_v46  ;;  %v1418_v38 = vsel %vm5246_vm2, %v5293_v18, 0.0  ;;  %v5320_v24 = vld [vmem:[#allocation2 + $0xa9] sm:$0xff] }
 0x17a   : > { %v6728_v53 = vand.u32 15, %v6727_v21  ;;  %v2419_v37 = vpack.c.bf16 %v2394_v49, %v2393_v13  ;;  %v2152_v34 = vadd.f32 %v2120_v36, %v2050_v19  ;;  %v2257_v29 = vsel %vm5195_vm1, %v5295_v33, 0.0 }
 0x17b   : > { %v1454_v46 = vmul.f32 %v4468_v41, %v1418_v38  ;;  %v2153_v6 = vadd.f32 %v2121_v27, %v2051_v51  ;;  %v2292_v54 = vmul.f32 %v4522_v11, %v5255_v0  ;;  %v1554_v50 = vmul.f32 %v4473_v44, %v1518_v20 }
 0x17c   : > { %vm5309_vm4 = vcmp.gt.s32.totalorder %v6728_v53, 0  ;;  %v1711_v4 = vsel %vm5264_vm3, %v5230_v56, 0.0  ;;  %v6732_v60 = vand.u32 15, %v6731_v63  ;;  %4177 = vmatprep.mubr.bf16.mxu1 %v2419_v37  ;;  %v2222_v61 = vadd.f32 %v2190_v26, %v2152_v34  ;;  %v5360_v63 = vld [vmem:[#allocation2 + $0xb1] sm:$0xff] }
 0x17d   : > { %v1455_v55 = vmul.f32 %v4468_v41, %v1323_v30  ;;  %v1555_v36 = vmul.f32 %v4473_v44, %v1519_v57  ;;  %v1747_v13 = vmul.f32 %v4477_v47, %v1711_v4  ;;  %v2223_v49 = vadd.f32 %v2191_v1, %v2153_v6 }
 0x17e   : > { %vm5327_vm5 = vcmp.lt.s32.totalorder %v6732_v60, 15  ;;  %v2293_v19 = vmul.f32 %v4522_v11, %v2257_v29  ;;  %v1586_v27 = vadd.f32 %v1554_v50, %v1454_v46  ;;  %v1848_v56 = vmul.f32 %v4513_v7, %v1812_v42  ;;  %v5358_v50 = vld [vmem:[#allocation2 + $0xb7] sm:$0xff] }
 0x17f   : > { %v2020_v51 = vmul.f32 %v4515_v8, %v5255_v0  ;;  %v2324_v38 = vadd.f32 %v2292_v54, %v2222_v61  ;;  %v1750_v21 = vmul.f32 %v4477_v47, %v5320_v24  ;;  %v1779_v26 = vadd.f32 %v1747_v13, %v5220_v59 }
 0x180   : > { %v2325_v53 = vadd.f32 %v2293_v19, %v2223_v49  ;;  %v1814_v37 = vsel %vm5176_vm0, %v5293_v18, 0.0  ;;  %v1880_v1 = vadd.f32 %v1848_v56, %v5223_v31  ;;  %v1985_v42 = vsel %vm5264_vm3, %v5295_v33, 0.0  ;;  %v1325_v19 = vld [vmem:[#allocation2 + $0xbf] sm:$0xff] }
 0x181   : > { %v2363_v34 = vadd.f32 %v4815_v32, %v2324_v38  ;;  %v5349_v0 = vadd.f32 %v1555_v36, %v1455_v55  ;;  %v1851_v29 = vmul.f32 %v4513_v7, %v1323_v30  ;;  %v1881_v46 = vadd.f32 %v1849_v14, %v1779_v26 }
 0x182   : > { %v2364_v59 = vadd.f32 %v4815_v32, %v2325_v53  ;;  %v5353_v6 = vadd.f32 %v1750_v21, %v1586_v27  ;;  %v1950_v54 = vadd.f32 %v1918_v62, %v1880_v1  ;;  %v2086_v31 = vsel %vm5104_vm14, %v5293_v18, 0.0 }
 0x183   : > { %v2395_v4 = vmax.f32 %v2363_v34, 0.0  ;;  %v1920_v60 = vmul.f32 %v4500_v2, %v1518_v20  ;;  %v1951_v61 = vadd.f32 %v1919_v12, %v1881_v46  ;;  %v2021_v55 = vmul.f32 %v4515_v8, %v1985_v42 }
 0x184   : > { %v2396_v14 = vmax.f32 %v2364_v59, 0.0  ;;  %v1921_v36 = vmul.f32 %v4500_v2, %v1519_v57  ;;  %v2052_v13 = vadd.f32 %v2020_v51, %v1950_v54  ;;  %v2122_v62 = vmul.f32 %v4518_v9, %v2086_v31 }
 0x185   : > { %v2053_v49 = vadd.f32 %v2021_v55, %v1951_v61  ;;  %v2123_v35 = vmul.f32 %v4518_v9, %v1323_v30  ;;  %v2192_v18 = vmul.f32 %v4520_v10, %v1518_v20  ;;  %v1420_v27 = vsel %vm5309_vm4, %v5358_v50, 0.0  ;;  %v5378_v20 = vld [vmem:[#allocation2 + $0xb9] sm:$0xff] }
 0x186   : > { %v2420_v56 = vpack.c.bf16 %v2396_v14, %v2395_v4  ;;  %v2154_v12 = vadd.f32 %v2122_v62, %v2052_v13  ;;  %v2259_v38 = vsel %vm5264_vm3, %v5360_v63, 0.0  ;;  %v1456_v51 = vmul.f32 %v4468_v41, %v1420_v27 }
 0x187   : > { %v2155_v21 = vadd.f32 %v2123_v35, %v2053_v49  ;;  %v2193_v26 = vmul.f32 %v4520_v10, %v1519_v57  ;;  %v2294_v30 = vmul.f32 %v4522_v11, %v5320_v24  ;;  %v1713_v53 = vsel %vm5327_vm5, %v5295_v33, 0.0 }
 0x188   : > { %4178 = vmatmul.mubr.bf16.gmra.mrb[12].mxu1 %v2420_v56  ;;  %v2224_v1 = vadd.f32 %v2192_v18, %v2154_v12  ;;  %v1457_v42 = vmul.f32 %v4468_v41, %v1325_v19  ;;  %v1556_v16 = vmul.f32 %v4473_v44, %v4871_v25  ;;  %v1749_v34 = vmul.f32 %v4477_v47, %v1713_v53  ;;  %v5411_v12 = vld [vmem:[#allocation2 + $0xc1] sm:$0xff] }
 0x189   : > { %v2225_v46 = vadd.f32 %v2193_v26, %v2155_v21  ;;  %v2295_v57 = vmul.f32 %v4522_v11, %v2259_v38  ;;  %v1557_v59 = vmul.f32 %v4473_v44, %v4878_v15  ;;  %v1850_v54 = vmul.f32 %v4513_v7, %v1814_v37 }
 0x18a   : > { %v2326_v31 = vadd.f32 %v2294_v30, %v2224_v1  ;;  %v1588_v4 = vadd.f32 %v1556_v16, %v1456_v51  ;;  %v1752_v33 = vmul.f32 %v4477_v47, %v5378_v20  ;;  %v1781_v61 = vadd.f32 %v1749_v34, %v5279_v43  ;;  %v1327_v16 = vld [vmem:[#allocation2 + $0xcf] sm:$0xff] }
 0x18b   : > { %v2022_v55 = vmul.f32 %v4515_v8, %v5320_v24  ;;  %v2327_v14 = vadd.f32 %v2295_v57, %v2225_v46  ;;  %v1816_v13 = vsel %vm5246_vm2, %v5358_v50, 0.0  ;;  %v1882_v62 = vadd.f32 %v1850_v54, %v5297_v5  ;;  %v6736_v57 = vld [vmem:[#allocation16_spill] sm:$0xff] }
 0x18c   : > { %v2365_v49 = vadd.f32 %v4815_v32, %v2326_v31  ;;  %v5401_v37 = vadd.f32 %v1557_v59, %v1457_v42  ;;  %v1883_v35 = vadd.f32 %v1851_v29, %v1781_v61  ;;  %v1987_v18 = vsel %vm5327_vm5, %v5360_v63, 0.0  ;;  %v5423_v42 = vld [vmem:[#allocation2 + $0xc7] sm:$0xff] }
 0x18d   : > { %v2366_v43 = vadd.f32 %v4815_v32, %v2327_v14  ;;  %v1952_v27 = vadd.f32 %v1920_v60, %v1882_v62  ;;  %v2023_v24 = vmul.f32 %v4515_v8, %v1987_v18  ;;  %v2088_v56 = vsel %vm5176_vm0, %v5358_v50, 0.0  ;;  %v6735_v50 = vld [vmem:[#allocation17_spill] sm:$0xff]  ;;  %v1622_v18 = vld [vmem:[#allocation2 + $0xc9] sm:$0xff] }
 0x18e   : > { %v5413_v5 = vadd.f32 %v1752_v33, %v1588_v4  ;;  %v1853_v38 = vmul.f32 %v4513_v7, %v1325_v19  ;;  %v1922_v29 = vmul.f32 %v4500_v2, %v4871_v25  ;;  %v1953_v51 = vadd.f32 %v1921_v36, %v1883_v35 }
 0x18f   : > { %v2397_v21 = vmax.f32 %v2365_v49, 0.0  ;;  %v2398_v26 = vmax.f32 %v2366_v43, 0.0  ;;  %v2054_v32 = vadd.f32 %v2022_v55, %v1952_v27  ;;  %v2124_v60 = vmul.f32 %v4518_v9, %v2088_v56  ;;  %v1522_v55 = vld [vmem:[#allocation2 + $0xc8] sm:$0xff] }
 0x190   : > { %v2055_v30 = vadd.f32 %v2023_v24, %v1953_v51  ;;  %v2125_v53 = vmul.f32 %v4518_v9, %v1325_v19  ;;  %v2194_v39 = vmul.f32 %v4520_v10, %v4871_v25  ;;  %v1023_v1 = vand.u32 15, %v6735_v50 }
 0x191   : > { %v2421_v34 = vpack.c.bf16 %v2398_v26, %v2397_v21  ;;  %v2156_v46 = vadd.f32 %v2124_v60, %v2054_v32  ;;  %v2261_v36 = vsel %vm5327_vm5, %v5411_v12, 0.0  ;;  %v6737_v59 = vand.u32 15, %v6736_v57  ;;  %v5464_v32 = vld [vmem:[%s6612_s4] ss:$0 sm:$0xff] }
 0x192   : > { %v2157_v19 = vadd.f32 %v2125_v53, %v2055_v30  ;;  %v2195_v25 = vmul.f32 %v4520_v10, %v4878_v15  ;;  %v2296_v31 = vmul.f32 %v4522_v11, %v5378_v20  ;;  %vm5438_vm7 = vcmp.gt.s32.totalorder %v1023_v1, 0 }
 0x193   : > { %vm5430_vm6 = vcmp.lt.s32.totalorder %v6737_v59, 15  ;;  %4181 = vmatprep.mubr.bf16.mxu1 %v2421_v34  ;;  %v2226_v3 = vadd.f32 %v2194_v39, %v2156_v46  ;;  %v1422_v33 = vsel %vm5438_vm7, %v5423_v42, 0.0  ;;  %v1459_v61 = vmul.f32 %v4468_v41, %v1327_v16  ;;  %v5479_v59 = vld [vmem:[#allocation2 + $0xd1] sm:$0xff] }
 0x194   : > { %v1715_v14 = vsel %vm5430_vm6, %v5360_v63, 0.0  ;;  %v1923_v62 = vmul.f32 %v4500_v2, %v4878_v15  ;;  %v2227_v49 = vadd.f32 %v2195_v25, %v2157_v19  ;;  %v2297_v35 = vmul.f32 %v4522_v11, %v2261_v36 }
 0x195   : > { %v1751_v43 = vmul.f32 %v4477_v47, %v1715_v14  ;;  %v2328_v27 = vadd.f32 %v2296_v31, %v2226_v3  ;;  %v1458_v24 = vmul.f32 %v4468_v41, %v1422_v33  ;;  %v1559_v56 = vmul.f32 %v4473_v44, %v4873_v52 }
 0x196   : > { %v1852_v51 = vmul.f32 %v4513_v7, %v1816_v13  ;;  %v2024_v63 = vmul.f32 %v4515_v8, %v5378_v20  ;;  %v2329_v21 = vadd.f32 %v2297_v35, %v2227_v49  ;;  %v1558_v15 = vmul.f32 %v4473_v44, %v1522_v55 }
 0x197   : > { %v1783_v26 = vadd.f32 %v1751_v43, %v5349_v0  ;;  %v2367_v60 = vadd.f32 %v5464_v32, %v2328_v27  ;;  %v5467_v30 = vadd.f32 %v1559_v56, %v1459_v61  ;;  %v1754_v53 = vmul.f32 %v4477_v47, %v1622_v18  ;;  %v1329_v27 = vld [vmem:[#allocation2 + $0xdf] sm:$0xff] }
 0x198   : > { %v1884_v13 = vadd.f32 %v1852_v51, %v5353_v6  ;;  %v2368_v20 = vadd.f32 %v5464_v32, %v2329_v21  ;;  %v1818_v39 = vsel %vm5309_vm4, %v5423_v42, 0.0  ;;  %v1989_v50 = vsel %vm5430_vm6, %v5411_v12, 0.0 }
 0x199   : > { %v1885_v0 = vadd.f32 %v1853_v38, %v1783_v26  ;;  %v2399_v1 = vmax.f32 %v2367_v60, 0.0  ;;  %v1590_v34 = vadd.f32 %v1558_v15, %v1458_v24  ;;  %v1855_v46 = vmul.f32 %v4513_v7, %v1327_v16  ;;  %v1328_v15 = vld [vmem:[#allocation2 + $0xd7] sm:$0xff] }
 0x19a   : > { %v1954_v36 = vadd.f32 %v1922_v29, %v1884_v13  ;;  %v2400_v57 = vmax.f32 %v2368_v20, 0.0  ;;  %v2025_v19 = vmul.f32 %v4515_v8, %v1989_v50  ;;  %v2090_v25 = vsel %vm5246_vm2, %v5423_v42, 0.0  ;;  %v6742_v42 = vld [vmem:[#allocation3_spill] sm:$0xff]  ;;  %v1624_v50 = vld [vmem:[#allocation2 + $0xd9] sm:$0xff] }
 0x19b   : > { %v1955_v6 = vadd.f32 %v1923_v62, %v1885_v0  ;;  %v1924_v38 = vmul.f32 %v4500_v2, %v1522_v55  ;;  %v1925_v31 = vmul.f32 %v4500_v2, %v4873_v52  ;;  %v2126_v33 = vmul.f32 %v4518_v9, %v2090_v25 }
 0x19c   : > { %v2056_v3 = vadd.f32 %v2024_v63, %v1954_v36  ;;  %v2422_v61 = vpack.c.bf16 %v2400_v57, %v2399_v1  ;;  %v2127_v14 = vmul.f32 %v4518_v9, %v1327_v16  ;;  %v2196_v62 = vmul.f32 %v4520_v10, %v1522_v55 }
 0x19d   : > { %v2057_v29 = vadd.f32 %v2025_v19, %v1955_v6  ;;  %v2263_v17 = vsel %vm5430_vm6, %v5479_v59, 0.0  ;;  %v842_v35 = vadd.s32 184, %v6742_v42  ;;  %v845_v43 = vadd.s32 208, %v6742_v42 }
 0x19e   : > { %v2158_v49 = vadd.f32 %v2126_v33, %v2056_v3  ;;  %4182 = vmatmul.mubr.bf16.gmra.mrb[16].mxu1 %v2422_v61  ;;  %v5496_v24 = vadd.f32 %v1754_v53, %v1590_v34  ;;  %v2026_v56 = vmul.f32 %v4515_v8, %v1622_v18  ;;  %v2197_v16 = vmul.f32 %v4520_v10, %v4873_v52 }
 0x19f   : > { %v2159_v51 = vadd.f32 %v2127_v14, %v2057_v29  ;;  %v2298_v63 = vmul.f32 %v4522_v11, %v1622_v18  ;;  %v1016_v21 = vand.u32 15, %v842_v35  ;;  %v1037_v54 = vand.u32 15, %v845_v43  ;;  %v5536_v35 = vld [vmem:[#allocation2 + $0xe1] sm:$0xff] }
 0x1a0   : > { %v2228_v55 = vadd.f32 %v2196_v62, %v2158_v49  ;;  %v2299_v60 = vmul.f32 %v4522_v11, %v2263_v17  ;;  %v1461_v13 = vmul.f32 %v4468_v41, %v1329_v27  ;;  %v1854_v53 = vmul.f32 %v4513_v7, %v1818_v39 }
 0x1a1   : > { %v2229_v26 = vadd.f32 %v2197_v16, %v2159_v51  ;;  %vm5505_vm8 = vcmp.gt.s32.totalorder %v1037_v54, 0  ;;  %vm5509_vm9 = vcmp.lt.s32.totalorder %v1016_v21, 15  ;;  %v1560_v18 = vmul.f32 %v4473_v44, %v5017_v22 }
 0x1a2   : > { %v2330_v20 = vadd.f32 %v2298_v63, %v2228_v55  ;;  %v1424_v34 = vsel %vm5505_vm8, %v1328_v15, 0.0  ;;  %v1717_v39 = vsel %vm5509_vm9, %v5411_v12, 0.0  ;;  %v1886_v36 = vadd.f32 %v1854_v53, %v5413_v5 }
 0x1a3   : > { %v2331_v1 = vadd.f32 %v2299_v60, %v2229_v26  ;;  %v1460_v6 = vmul.f32 %v4468_v41, %v1424_v34  ;;  %v1561_v19 = vmul.f32 %v4473_v44, %v5031_v23  ;;  %v1753_v25 = vmul.f32 %v4477_v47, %v1717_v39 }
 0x1a4   : > { %v2369_v57 = vadd.f32 %v5464_v32, %v2330_v20  ;;  %v1756_v33 = vmul.f32 %v4477_v47, %v1624_v50  ;;  %v1956_v61 = vadd.f32 %v1924_v38, %v1886_v36  ;;  %v1991_v12 = vsel %vm5509_vm9, %v5479_v59, 0.0 }
 0x1a5   : > { %v2370_v3 = vadd.f32 %v5464_v32, %v2331_v1  ;;  %v5531_v5 = vadd.f32 %v1561_v19, %v1461_v13  ;;  %v1785_v14 = vadd.f32 %v1753_v25, %v5401_v37  ;;  %v1820_v62 = vsel %vm5438_vm7, %v1328_v15, 0.0  ;;  %v1526_v1 = vld [vmem:[#allocation2 + $0xe8] sm:$0xff] }
 0x1a6   : > { %v2401_v29 = vmax.f32 %v2369_v57, 0.0  ;;  %v1592_v17 = vadd.f32 %v1560_v18, %v1460_v6  ;;  %v2058_v43 = vadd.f32 %v2026_v56, %v1956_v61  ;;  %v2092_v38 = vsel %vm5309_vm4, %v1328_v15, 0.0  ;;  %v1331_v18 = vld [vmem:[#allocation2 + $0xef] sm:$0xff]  ;;  %v1330_v6 = vld [vmem:[#allocation2 + $0xe7] sm:$0xff] }
 0x1a7   : > { %v2402_v49 = vmax.f32 %v2370_v3, 0.0  ;;  %v1857_v51 = vmul.f32 %v4513_v7, %v1329_v27  ;;  %v1887_v16 = vadd.f32 %v1855_v46, %v1785_v14  ;;  %v2027_v55 = vmul.f32 %v4515_v8, %v1991_v12  ;;  %v1626_v61 = vld [vmem:[#allocation2 + $0xe9] sm:$0xff] }
 0x1a8   : > { %v2128_v63 = vmul.f32 %v4518_v9, %v2092_v38  ;;  %v1926_v37 = vmul.f32 %v4500_v2, %v5017_v22  ;;  %v1927_v54 = vmul.f32 %v4500_v2, %v5031_v23  ;;  %v2028_v26 = vmul.f32 %v4515_v8, %v1624_v50 }
 0x1a9   : > { %v2423_v21 = vpack.c.bf16 %v2402_v49, %v2401_v29  ;;  %v1957_v56 = vadd.f32 %v1925_v31, %v1887_v16  ;;  %v2198_v48 = vmul.f32 %v4520_v10, %v5017_v22  ;;  %v2265_v46 = vsel %vm5509_vm9, %v5536_v35, 0.0 }
 0x1aa   : > { %v2160_v60 = vadd.f32 %v2128_v63, %v2058_v43  ;;  %v5553_v15 = vadd.f32 %v1756_v33, %v1592_v17  ;;  %v2129_v13 = vmul.f32 %v4518_v9, %v1329_v27  ;;  %v844_v53 = vadd.s32 200, %v6742_v42 }
 0x1ab   : > { %4185 = vmatprep.mubr.bf16.mxu1 %v2423_v21  ;;  %v847_v20 = vadd.s32 224, %v6742_v42  ;;  %v2059_v31 = vadd.f32 %v2027_v55, %v1957_v56  ;;  %v2199_v34 = vmul.f32 %v4520_v10, %v5031_v23  ;;  %v2300_v39 = vmul.f32 %v4522_v11, %v1624_v50 }
 0x1ac   : > { %v2230_v22 = vadd.f32 %v2198_v48, %v2160_v60  ;;  %v2301_v52 = vmul.f32 %v4522_v11, %v2265_v46  ;;  %v1030_v36 = vand.u32 15, %v844_v53  ;;  %v1856_v27 = vmul.f32 %v4513_v7, %v1820_v62 }
 0x1ad   : > { %v1051_v57 = vand.u32 15, %v847_v20  ;;  %v2161_v19 = vadd.f32 %v2129_v13, %v2059_v31  ;;  %v1463_v3 = vmul.f32 %v4468_v41, %v1331_v18  ;;  %v1562_v33 = vmul.f32 %v4473_v44, %v1526_v1  ;;  %v5598_v20 = vld [vmem:[#allocation2 + $0xf1] sm:$0xff] }
 0x1ae   : > { %v2332_v25 = vadd.f32 %v2300_v39, %v2230_v22  ;;  %vm5569_vm11 = vcmp.lt.s32.totalorder %v1030_v36, 15  ;;  %v1563_v50 = vmul.f32 %v4473_v44, %v5019_v45  ;;  %v1888_v29 = vadd.f32 %v1856_v27, %v5496_v24 }
 0x1af   : > { %vm5565_vm10 = vcmp.gt.s32.totalorder %v1051_v57, 0  ;;  %v2231_v14 = vadd.f32 %v2199_v34, %v2161_v19  ;;  %v1719_v17 = vsel %vm5569_vm11, %v5479_v59, 0.0  ;;  %v1758_v16 = vmul.f32 %v4477_v47, %v1626_v61 }
 0x1b0   : > { %v2371_v62 = vadd.f32 %v5464_v32, %v2332_v25  ;;  %v1426_v49 = vsel %vm5565_vm10, %v1330_v6, 0.0  ;;  %v1755_v38 = vmul.f32 %v4477_v47, %v1719_v17  ;;  %v1958_v55 = vadd.f32 %v1926_v37, %v1888_v29 }
 0x1b1   : > { %v1462_v43 = vmul.f32 %v4468_v41, %v1426_v49  ;;  %v2333_v63 = vadd.f32 %v2301_v52, %v2231_v14  ;;  %v5585_v21 = vadd.f32 %v1563_v50, %v1463_v3  ;;  %v1822_v24 = vsel %vm5505_vm8, %v1330_v6, 0.0  ;;  %v1333_v50 = vld [vmem:[#allocation2 + $0xff] sm:$0xff] }
 0x1b2   : > { %v5590_v56 = vmul.f32 %v4513_v7, %v1331_v18  ;;  %v1787_v60 = vadd.f32 %v1755_v38, %v5467_v30  ;;  %v1928_v59 = vmul.f32 %v4500_v2, %v1526_v1  ;;  %v1993_v48 = vsel %vm5569_vm11, %v5536_v35, 0.0 }
 0x1b3   : > { %v2060_v46 = vadd.f32 %v2028_v26, %v1958_v55  ;;  %v2372_v37 = vadd.f32 %v5464_v32, %v2333_v63  ;;  %v2403_v13 = vmax.f32 %v2371_v62, 0.0  ;;  %v1594_v53 = vadd.f32 %v1562_v33, %v1462_v43  ;;  %v1628_v43 = vld [vmem:[#allocation2 + $0xf9] sm:$0xff] }
 0x1b4   : > { %v2094_v31 = vsel %vm5438_vm7, %v1330_v6, 0.0  ;;  %v1889_v34 = vadd.f32 %v1857_v51, %v1787_v60  ;;  %v1929_v30 = vmul.f32 %v4500_v2, %v5019_v45  ;;  %v2030_v22 = vmul.f32 %v4515_v8, %v1626_v61 }
 0x1b5   : > { %v2130_v39 = vmul.f32 %v4518_v9, %v2094_v31  ;;  %v2404_v52 = vmax.f32 %v2372_v37, 0.0  ;;  %v2029_v26 = vmul.f32 %v4515_v8, %v1993_v48  ;;  %v2200_v36 = vmul.f32 %v4520_v10, %v1526_v1 }
 0x1b6   : > { %v846_v57 = vadd.s32 216, %v6742_v42  ;;  %v1959_v27 = vadd.f32 %v1927_v54, %v1889_v34  ;;  %v2267_v4 = vsel %vm5569_vm11, %v5598_v20, 0.0  ;;  %v849_v51 = vadd.s32 240, %v6742_v42  ;;  %v1332_v54 = vld [vmem:[#allocation2 + $0xf7] sm:$0xff] }
 0x1b7   : > { %v2162_v19 = vadd.f32 %v2130_v39, %v2060_v46  ;;  %v2424_v6 = vpack.c.bf16 %v2404_v52, %v2403_v13  ;;  %v5613_v25 = vadd.f32 %v1758_v16, %v1594_v53  ;;  %v2131_v3 = vmul.f32 %v4518_v9, %v1331_v18 }
 0x1b8   : > { %v1044_v33 = vand.u32 15, %v846_v57  ;;  %v2061_v29 = vadd.f32 %v2029_v26, %v1959_v27  ;;  %v2302_v1 = vmul.f32 %v4522_v11, %v1626_v61  ;;  %v1065_v62 = vand.u32 15, %v849_v51  ;;  %v1629_v27 = vld [vmem:[#allocation2 + $0x101] sm:$0xff] }
 0x1b9   : > { %v2232_v14 = vadd.f32 %v2200_v36, %v2162_v19  ;;  %4186 = vmatmul.mubr.bf16.gmra.mrb[20].mxu1 %v2424_v6  ;;  %v2201_v23 = vmul.f32 %v4520_v10, %v5019_v45  ;;  %v2303_v49 = vmul.f32 %v4522_v11, %v2267_v4  ;;  %v1858_v18 = vmul.f32 %v4513_v7, %v1822_v24 }
 0x1ba   : > { %vm5620_vm12 = vcmp.lt.s32.totalorder %v1044_v33, 15  ;;  %v2163_v38 = vadd.f32 %v2131_v3, %v2061_v29  ;;  %vm5625_vm13 = vcmp.gt.s32.totalorder %v1065_v62, 0  ;;  %v1465_v61 = vmul.f32 %v4468_v41, %v1333_v50 }
 0x1bb   : > { %v2334_v16 = vadd.f32 %v2302_v1, %v2232_v14  ;;  %v1428_v45 = vsel %vm5625_vm13, %v1332_v54, 0.0  ;;  %v1564_v63 = vmul.f32 %v4473_v44, %v5169_v58  ;;  %v1721_v60 = vsel %vm5620_vm12, %v5536_v35, 0.0 }
 0x1bc   : > { %v1890_v24 = vadd.f32 %v1858_v18, %v5553_v15  ;;  %v2233_v48 = vadd.f32 %v2201_v23, %v2163_v38  ;;  %v1565_v46 = vmul.f32 %v4473_v44, %v5184_v28  ;;  %v1757_v37 = vmul.f32 %v4477_v47, %v1721_v60  ;;  %v1794_v23 = vld [vmem:[#allocation2 + $0x107] sm:$0xff] }
 0x1bd   : > { %v1760_v13 = vmul.f32 %v4477_v47, %v1628_v43  ;;  %v2373_v53 = vadd.f32 %v5464_v32, %v2334_v16  ;;  %v1464_v31 = vmul.f32 %v4468_v41, %v1428_v45  ;;  %v1995_v39 = vsel %vm5620_vm12, %v5598_v20, 0.0 }
 0x1be   : > { %v1960_v34 = vadd.f32 %v1928_v59, %v1890_v24  ;;  %v2335_v35 = vadd.f32 %v2303_v49, %v2233_v48  ;;  %v5647_v52 = vadd.f32 %v1565_v46, %v1465_v61  ;;  %v1789_v15 = vadd.f32 %v1757_v37, %v5531_v5 }
 0x1bf   : > { %v1824_v44 = vsel %vm5565_vm10, %v1332_v54, 0.0  ;;  %v5653_v26 = vmul.f32 %v4513_v7, %v1333_v50  ;;  %v1930_v36 = vmul.f32 %v4500_v2, %v5169_v58  ;;  %v2096_v59 = vsel %vm5505_vm8, %v1332_v54, 0.0 }
 0x1c0   : > { %v2062_v41 = vadd.f32 %v2030_v22, %v1960_v34  ;;  %v2374_v57 = vadd.f32 %v5464_v32, %v2335_v35  ;;  %v1891_v19 = vadd.f32 %v5590_v56, %v1789_v15  ;;  %v2031_v5 = vmul.f32 %v4515_v8, %v1995_v39  ;;  %v1896_v34 = vld [vmem:[#allocation2 + $0x108] sm:$0xff] }
 0x1c1   : > { %v2132_v4 = vmul.f32 %v4518_v9, %v2096_v59  ;;  %v2405_v51 = vmax.f32 %v2373_v53, 0.0  ;;  %v1596_v6 = vadd.f32 %v1564_v63, %v1464_v31  ;;  %v5665_v3 = vmul.f32 %v4500_v2, %v5184_v28  ;;  %v1795_v63 = vld [vmem:[#allocation2 + $0x10f] sm:$0xff] }
 0x1c2   : > { %v2133_v22 = vmul.f32 %v4518_v9, %v1333_v50  ;;  %v2406_v33 = vmax.f32 %v2374_v57, 0.0  ;;  %v1961_v0 = vadd.f32 %v1929_v30, %v1891_v19  ;;  %v2202_v14 = vmul.f32 %v4520_v10, %v5169_v58  ;;  %v1966_v57 = vld [vmem:[#allocation2 + $0x109] sm:$0xff] }
 0x1c3   : > { %v2164_v29 = vadd.f32 %v2132_v4, %v2062_v41  ;;  %v2269_v56 = vsel %vm5620_vm12, %v1629_v27, 0.0  ;;  %v2304_v1 = vmul.f32 %v4522_v11, %v1628_v43  ;;  %v848_v62 = vadd.s32 232, %v6742_v42 }
 0x1c4   : > { %v850_v54 = vadd.s32 248, %v6742_v42  ;;  %v2425_v49 = vpack.c.bf16 %v2406_v33, %v2405_v51  ;;  %v2063_v18 = vadd.f32 %v2031_v5, %v1961_v0  ;;  %v1860_v50 = vmul.f32 %v4513_v7, %v1824_v44  ;;  %v2068_v33 = vld [vmem:[#allocation2 + $0x117] sm:$0xff] }
 0x1c5   : > { %v2234_v38 = vadd.f32 %v2202_v14, %v2164_v29  ;;  %v2032_v30 = vmul.f32 %v4515_v8, %v1628_v43  ;;  %v2203_v58 = vmul.f32 %v4520_v10, %v5184_v28  ;;  %v1058_v16 = vand.u32 15, %v848_v62  ;;  %v5691_v43 = vld [vmem:[#allocation2 + $0x111] sm:$0xff] }
 0x1c6   : > { %v1072_v17 = vand.u32 15, %v850_v54  ;;  %4189 = vmatprep.mubr.bf16.mxu1 %v2425_v49  ;;  %v2165_v61 = vadd.f32 %v2133_v22, %v2063_v18  ;;  %v1826_v60 = vsel %vm5625_vm13, %v1794_v23, 0.0  ;;  %v1892_v24 = vadd.f32 %v1860_v50, %v5613_v25  ;;  %v5725_v54 = vld [vmem:[#allocation2] sm:$0xff] }
 0x1c7   : > { %v2336_v45 = vadd.f32 %v2304_v1, %v2234_v38  ;;  %v1792_v48 = vadd.f32 %v1760_v13, %v1596_v6  ;;  %v2305_v46 = vmul.f32 %v4522_v11, %v2269_v56  ;;  %vm5683_vm14 = vcmp.lt.s32.totalorder %v1058_v16, 15  ;;  %v2069_v49 = vld [vmem:[#allocation2 + $0x11f] sm:$0xff] }
 0x1c8   : > { %vm5687_vm15 = vcmp.lt.s32.totalorder %v1072_v17, 15  ;;  %v2235_v53 = vadd.f32 %v2203_v58, %v2165_v61  ;;  %v1723_v25 = vsel %vm5683_vm14, %v5598_v20, 0.0  ;;  %v1862_v35 = vmul.f32 %v4513_v7, %v1826_v60 }
 0x1c9   : > { %v2375_v31 = vadd.f32 %v5464_v32, %v2336_v45  ;;  %v1725_v13 = vsel %vm5687_vm15, %v1629_v27, 0.0  ;;  %v1759_v39 = vmul.f32 %v4477_v47, %v1723_v25  ;;  %v1863_v15 = vmul.f32 %v4513_v7, %v1795_v63 }
 0x1ca   : > { %v1962_v44 = vadd.f32 %v1930_v36, %v1892_v24  ;;  %v2337_v41 = vadd.f32 %v2305_v46, %v2235_v53  ;;  %v1761_v59 = vmul.f32 %v4477_v47, %v1725_v13  ;;  %v1997_v19 = vsel %vm5683_vm14, %v1629_v27, 0.0  ;;  %v4280_v47 = vld [vmem:[%s6615_s7] sm:$0xff]  }
 0x1cb   : > { %v1999_v20 = vsel %vm5687_vm15, %v5691_v43, 0.0  ;;  %v1791_v5 = vadd.f32 %v1759_v39, %v5585_v21  ;;  %v1932_v4 = vmul.f32 %v4500_v2, %v1896_v34  ;;  %v2098_v7 = vsel %vm5565_vm10, %v1794_v23, 0.0  ;;  %4198 = vmatpush3.bf16.msra.mxu0 %v4280_v47 }
 0x1cc   : > { %v2064_v51 = vadd.f32 %v2032_v30, %v1962_v44  ;;  %v2376_v36 = vadd.f32 %v5464_v32, %v2337_v41  ;;  %v2407_v6 = vmax.f32 %v2375_v31, 0.0  ;;  %v1933_v27 = vmul.f32 %v4500_v2, %v5171_v40  ;;  %4199 = vmatprep.subr.bf16.mxu0 %v5725_v54 }
 0x1cd   : > { %v2134_v22 = vmul.f32 %v4518_v9, %v2098_v7  ;;  %v1893_v21 = vadd.f32 %v5653_v26, %v1791_v5  ;;  %v2033_v0 = vmul.f32 %v4515_v8, %v1997_v19  ;;  %v2034_v12 = vmul.f32 %v4515_v8, %v1966_v57  ;;  %v4282_v7 = vld [vmem:[%s6615_s7 + $0x10] sm:$0xff]  }
 0x1ce   : > { %v2035_v29 = vmul.f32 %v4515_v8, %v1999_v20  ;;  %v2408_v14 = vmax.f32 %v2376_v36, 0.0  ;;  %v2204_v1 = vmul.f32 %v4520_v10, %v1896_v34  ;;  %v1793_v62 = vadd.f32 %v1761_v59, %v5647_v52  ;;  %v2241_v52 = vld [vmem:[#allocation2 + $0x121] sm:$0xff] }
 0x1cf   : > { %v2166_v56 = vadd.f32 %v2134_v22, %v2064_v51  ;;  %v1963_v2 = vadd.f32 %v5665_v3, %v1893_v21  ;;  %v2135_v26 = vmul.f32 %v4518_v9, %v1795_v63  ;;  %v1894_v23 = vadd.f32 %v1862_v35, %v1792_v48  ;;  %v2240_v63 = vld [vmem:[#allocation2 + $0x119] sm:$0xff]  ;;  %v4281_v51 = vld [vmem:[%s6615_s7 + $0x8] sm:$0xff]  }
 0x1d0   : > { %v2100_v8 = vsel %vm5625_vm13, %v2068_v33, 0.0  ;;  %v2426_v18 = vpack.c.bf16 %v2408_v14, %v2407_v6  ;;  %v2205_v38 = vmul.f32 %v4520_v10, %v5171_v40  ;;  %v1895_v30 = vadd.f32 %v1863_v15, %v1793_v62  ;;  %4200 = vmatpush3.bf16.msra.mxu0 %v4281_v51  ;;  %v4283_v6 = vld [vmem:[%s6615_s7 + $0x18] sm:$0xff]   ;;  %v5772_v62 = vld [vmem:[%s6614_s6] ss:$0 sm:$0xff] }
 0x1d1   : > { %v2236_v50 = vadd.f32 %v2204_v1, %v2166_v56  ;;  %v2065_v58 = vadd.f32 %v2033_v0, %v1963_v2  ;;  %v2271_v16 = vsel %vm5683_vm14, %v5691_v43, 0.0  ;;  %v2306_v3 = vmul.f32 %v4522_v11, %v1966_v57  ;;  %4201 = vmatprep.subr.bf16.mxu0 %v5725_v54 }
 0x1d2   : > { %v1964_v17 = vadd.f32 %v1932_v4, %v1894_v23  ;;  %4190 = vmatmul.mubr.bf16.gmra.mrb[24].mxu1 %v2426_v18  ;;  %v1965_v61 = vadd.f32 %v1933_v27, %v1895_v30  ;;  %v2136_v55 = vmul.f32 %v4518_v9, %v2100_v8  ;;  %v2137_v45 = vmul.f32 %v4518_v9, %v2069_v49  ;;  %v4285_v23 = vld [vmem:[%s6615_s7 + $0x28] sm:$0xff]   ;;  %v4286_v8 = vld [vmem:[%s6615_s7 + $0x30] sm:$0xff]   ;;  %v4288_v30 = vld [vmem:[%s6617_s9] sm:$0xff]  }
 0x1d3   : > { %v2206_v40 = vmul.f32 %v5725_v54, %v4520_v10  ;;  %v2167_v60 = vadd.f32 %v2135_v26, %v2065_v58  ;;  %v2338_v24 = vadd.f32 %v2306_v3, %v2236_v50  ;;  %v2273_v46 = vsel %vm5687_vm15, %v2241_v52, 0.0  ;;  %v4287_v50 = vld [vmem:[%s6615_s7 + $0x38] sm:$0xff]   ;;  %4218 = vmatpush3.bf16.msra.mxu1 %v4288_v30  ;;  %v4289_v58 = vld [vmem:[%s6617_s9 + $0x8] sm:$0xff]  }
 0x1d4   : > { %v2066_v48 = vadd.f32 %v2034_v12, %v1964_v17  ;;  %v2067_v37 = vadd.f32 %v2035_v29, %v1965_v61  ;;  %v2307_v53 = vmul.f32 %v4522_v11, %v2271_v16  ;;  %v2308_v25 = vmul.f32 %v4522_v11, %v2240_v63  ;;  %4202 = vmatpush3.bf16.msra.mxu0 %v4282_v7  ;;  %v4284_v12 = vld [vmem:[%s6615_s7 + $0x20] sm:$0xff]   ;;  %v4290_v17 = vld [vmem:[%s6617_s9 + $0x10] sm:$0xff]  }
 0x1d5   : > { %v2237_v43 = vadd.f32 %v2205_v38, %v2167_v60  ;;  %v2309_v9 = vmul.f32 %v4522_v11, %v2273_v46  ;;  %v2377_v10 = vadd.f32 %v5464_v32, %v2338_v24  ;;  %4203 = vmatprep.subr.bf16.mxu0 %v5725_v54  ;;  %vm4311_vm0 = vmmov 0   ;;  %4219 = vmatprep.subr.bf16.mxu1 %v5725_v54 }
 0x1d6   : > { %v2168_v31 = vadd.f32 %v2136_v55, %v2066_v48  ;;  %v2169_v13 = vadd.f32 %v2137_v45, %v2067_v37  ;;  %4213 = vmatprep.mubr.msk.bf16.mxu0 %vm4311_vm0, %v5725_v54  ;;  %v4292_v37 = vld [vmem:[%s6617_s9 + $0x20] sm:$0xff]   ;;  %vm3323_vm1 = vcmask 1041408   ;;  %vm3836_vm2 = vcmask 1041409  }
 0x1d7   : > { %v2339_v34 = vadd.f32 %v2307_v53, %v2237_v43  ;;  %v2409_v41 = vmax.f32 %v2377_v10, 0.0  ;;  %4220 = vmatpush3.bf16.msra.mxu1 %v4289_v58  ;;  %vm3838_vm3 = vcmask 1042434   ;;  %vm3840_vm4 = vcmask 1043459  }
 0x1d8   : > { %v2238_v39 = vadd.f32 %v2206_v40, %v2168_v31  ;;  %v2239_v35 = vadd.f32 %v2206_v40, %v2169_v13  ;;  %4204 = vmatpush3.bf16.msra.mxu0 %v4283_v6  ;;  %4221 = vmatprep.subr.bf16.mxu1 %v5725_v54  ;;  %v4291_v40 = vld [vmem:[%s6617_s9 + $0x18] sm:$0xff]   ;;  %v4293_v31 = vld [vmem:[%s6617_s9 + $0x28] sm:$0xff]   ;;  %vm3842_vm5 = vcmask 1044484   ;;  %vm3844_vm6 = vcmask 1045509  }
 0x1d9   : > { %v2378_v15 = vadd.f32 %v5464_v32, %v2339_v34  ;;  %4205 = vmatprep.subr.bf16.mxu0 %v5725_v54  ;;  %vm3846_vm7 = vcmask 1046534   ;;  %vm3848_vm8 = vcmask 1047559  }
 0x1da   : > { %v2340_v44 = vadd.f32 %v2308_v25, %v2238_v39  ;;  %v2341_v28 = vadd.f32 %v2309_v9, %v2239_v35  ;;  %v4294_v9 = vld [vmem:[%s6617_s9 + $0x30] sm:$0xff]   ;;  %v4295_v39 = vld [vmem:[%s6617_s9 + $0x38] sm:$0xff]  }
 0x1db   : > { %v2410_v59 = vmax.f32 %v2378_v15, 0.0  ;;  %4222 = vmatpush3.bf16.msra.mxu1 %v4290_v17 }
 0x1dc   : > { %v2379_v57 = vadd.f32 %v5464_v32, %v2340_v44  ;;  %v2380_v19 = vadd.f32 %v5464_v32, %v2341_v28  ;;  %4206 = vmatpush3.bf16.msra.mxu0 %v4284_v12  ;;  %4223 = vmatprep.subr.bf16.mxu1 %v5725_v54 }
 0x1dd   : > { %v2427_v20 = vpack.c.bf16 %v2410_v59, %v2409_v41  ;;  %4207 = vmatprep.subr.bf16.mxu0 %v5725_v54 }
 0x1de   : > { %v2411_v5 = vmax.f32 %v2379_v57, 0.0  ;;  %v2412_v4 = vmax.f32 %v2380_v19, 0.0 }
 0x1df   : > { %4193 = vmatprep.mubr.bf16.mxu1 %v2427_v20  ;;  %4224 = vmatpush3.bf16.msra.mxu1 %v4291_v40 }
 0x1e0   : > { %v2428_v11 = vpack.c.bf16 %v2412_v4, %v2411_v5  ;;  %4208 = vmatpush3.bf16.msra.mxu0 %v4285_v23  ;;  %4225 = vmatprep.subr.bf16.mxu1 %v5725_v54 }
 0x1e1   : > { %4209 = vmatprep.subr.bf16.mxu0 %v5725_v54 }
 0x1e2   : > { %4194 = vmatmul.mubr.bf16.gmra.mrb[28].mxu1 %v2428_v11 }
 0x1e3   : > { %4233 = vmatprep.mubr.msk.bf16.mxu1 %vm4311_vm0, %v5725_v54  ;;  %4226 = vmatpush3.bf16.msra.mxu1 %v4292_v37 }
 0x1e4   : > { %4210 = vmatpush3.bf16.msra.mxu0 %v4286_v8  ;;  %4227 = vmatprep.subr.bf16.mxu1 %v5725_v54 }
 0x1e5   : > { %4211 = vmatprep.subr.bf16.mxu0 %v5725_v54 }
 0x1e7   : > { %4228 = vmatpush3.bf16.msra.mxu1 %v4293_v31 }
 0x1e8   : > { %4212 = vmatpush3.bf16.msra.mxu0 %v4287_v50  ;;  %4229 = vmatprep.subr.bf16.mxu1 %v5725_v54 }
 0x1eb   : > { %4230 = vmatpush3.bf16.msra.mxu1 %v4294_v9 }
 0x1ec   : > { %4231 = vmatprep.subr.bf16.mxu1 %v5725_v54 }
 0x1ef   : > { %4232 = vmatpush3.bf16.msra.mxu1 %v4295_v39 }
 0x20c   : > { %v4167_v32 = vpop.f32.mrb[0].mxu1 }
 0x20d   : > { %v2534_v47 = vpop.f32.mrb[1].mxu1  ;;  %v5792_v18 = vadd.f32 %v4167_v32, %v5772_v62 }
 0x20e   : > { %v4168_v36 = vpop.f32.mrb[2].mxu1  ;;  %v5778_v26 = vadd.f32 %v5772_v62, %v2534_v47 }
 0x20f   : > { %v2537_v27 = vpop.f32.mrb[3].mxu1  ;;  %v5803_v52 = vadd.f32 %v4168_v36, %v5772_v62 }
 0x210   : > { %v5775_v2 = vadd.f32 %v5772_v62, %v2537_v27 }
 0x212   : > { %v2661_v49 = vadd.f32 %v5775_v2, %v5778_v26 }
 0x214   : > { %v2662_v38 = vadd.f32 %v2661_v49, %v5792_v18 }
 0x216   : > { %v2663_v3 = vadd.f32 %v2662_v38, %v5803_v52 }
 0x226   : > { %v4171_v22 = vpop.f32.mrb[4].mxu1 }
 0x227   : > { %v2550_v33 = vpop.f32.mrb[5].mxu1  ;;  %v5827_v46 = vadd.f32 %v4171_v22, %v5772_v62 }
 0x228   : > { %v4172_v21 = vpop.f32.mrb[6].mxu1  ;;  %v5810_v16 = vadd.f32 %v5772_v62, %v2550_v33 }
 0x229   : > { %v2553_v0 = vpop.f32.mrb[7].mxu1  ;;  %v5835_v53 = vadd.f32 %v4172_v21, %v5772_v62 }
 0x22a   : > { %v2664_v61 = vadd.f32 %v2663_v3, %v5810_v16  ;;  %v5819_v55 = vadd.f32 %v5772_v62, %v2553_v0 }
 0x22c   : > { %v2665_v60 = vadd.f32 %v2664_v61, %v5819_v55 }
 0x22e   : > { %v2666_v43 = vadd.f32 %v2665_v60, %v5827_v46 }
 0x230   : > { %v2667_v13 = vadd.f32 %v2666_v43, %v5835_v53 }
 0x241   : > { %v4175_v29 = vpop.f32.mrb[8].mxu1 }
 0x242   : > { %v2566_v14 = vpop.f32.mrb[9].mxu1  ;;  %v5859_v15 = vadd.f32 %v4175_v29, %v5772_v62 }
 0x243   : > { %v5767_v56 = vpop.f32.mrb[10].mxu1  ;;  %v5842_v25 = vadd.f32 %v5772_v62, %v2566_v14 }
 0x244   : > { %v2569_v1 = vpop.f32.mrb[11].mxu1  ;;  %v5864_v59 = vadd.f32 %v5767_v56, %v5772_v62 }
 0x245   : > { %v2668_v34 = vadd.f32 %v2667_v13, %v5842_v25  ;;  %v5851_v10 = vadd.f32 %v5772_v62, %v2569_v1 }
 0x247   : > { %v2669_v35 = vadd.f32 %v2668_v34, %v5851_v10 }
 0x249   : > { %v2670_v44 = vadd.f32 %v2669_v35, %v5859_v15 }
 0x24b   : > { %v2671_v54 = vadd.f32 %v2670_v44, %v5864_v59 }
 0x25b   : > { %v4179_v45 = vpop.f32.mrb[12].mxu1 }
 0x25c   : > { %v2582_v63 = vpop.f32.mrb[13].mxu1  ;;  %v5876_v51 = vadd.f32 %v4179_v45, %v5772_v62 }
 0x25d   : > { %v4180_v24 = vpop.f32.mrb[14].mxu1  ;;  %v5867_v20 = vadd.f32 %v5772_v62, %v2582_v63 }
 0x25e   : > { %v2585_v48 = vpop.f32.mrb[15].mxu1  ;;  %v5880_v32 = vadd.f32 %v4180_v24, %v5772_v62 }
 0x25f   : > { %v2672_v5 = vadd.f32 %v2671_v54, %v5867_v20  ;;  %v5872_v4 = vadd.f32 %v5772_v62, %v2585_v48 }
 0x261   : > { %v2673_v11 = vadd.f32 %v2672_v5, %v5872_v4 }
 0x263   : > { %v2674_v7 = vadd.f32 %v2673_v11, %v5876_v51 }
 0x265   : > { %v2675_v36 = vadd.f32 %v2674_v7, %v5880_v32 }
 0x271   : > { %v4183_v28 = vpop.f32.mrb[16].mxu1 }
 0x272   : > { %v2598_v41 = vpop.f32.mrb[17].mxu1  ;;  %v5892_v12 = vadd.f32 %v4183_v28, %v5772_v62 }
 0x273   : > { %v4184_v57 = vpop.f32.mrb[18].mxu1  ;;  %v5883_v47 = vadd.f32 %v5772_v62, %v2598_v41 }
 0x274   : > { %v2601_v19 = vpop.f32.mrb[19].mxu1  ;;  %v5896_v56 = vadd.f32 %v4184_v57, %v5772_v62 }
 0x275   : > { %v2676_v6 = vadd.f32 %v2675_v36, %v5883_v47  ;;  %v5888_v27 = vadd.f32 %v5772_v62, %v2601_v19 }
 0x277   : > { %v2677_v33 = vadd.f32 %v2676_v6, %v5888_v27 }
 0x279   : > { %v2678_v14 = vadd.f32 %v2677_v33, %v5892_v12 }
 0x27b   : > { %v2679_v23 = vadd.f32 %v2678_v14, %v5896_v56  ;;  %v2717_v14 = vld [vmem:[%s6616_s8] sm:$0x1] }
 0x28c   : > { %v4187_v22 = vpop.f32.mrb[20].mxu1 }
 0x28d   : > { %v2614_v21 = vpop.f32.mrb[21].mxu1  ;;  %v5908_v50 = vadd.f32 %v4187_v22, %v5772_v62 }
 0x28e   : > { %v4188_v0 = vpop.f32.mrb[22].mxu1  ;;  %v5899_v1 = vadd.f32 %v5772_v62, %v2614_v21 }
 0x28f   : > { %v2617_v29 = vpop.f32.mrb[23].mxu1  ;;  %v5912_v58 = vadd.f32 %v4188_v0, %v5772_v62 }
 0x290   : > { %v2680_v49 = vadd.f32 %v2679_v23, %v5899_v1  ;;  %v5904_v8 = vadd.f32 %v5772_v62, %v2617_v29 }
 0x292   : > { %v2681_v38 = vadd.f32 %v2680_v49, %v5904_v8 }
 0x294   : > { %v2682_v30 = vadd.f32 %v2681_v38, %v5908_v50 }
 0x296   : > { %v2683_v17 = vadd.f32 %v2682_v30, %v5912_v58 }
 0x2a5   : > { %v4191_v3 = vpop.f32.mrb[24].mxu1 }
 0x2a6   : > { %v2630_v61 = vpop.f32.mrb[25].mxu1  ;;  %v5924_v37 = vadd.f32 %v4191_v3, %v5772_v62 }
 0x2a7   : > { %v5916_v45 = vadd.f32 %v5772_v62, %v2630_v61  ;;  %v4192_v40 = vpop.f32.mrb[26].mxu1  ;;  %v2824_v61 = vld [vmem:[%s6618_s10] sm:$0x1] }
 0x2a8   : > { %v2633_v63 = vpop.f32.mrb[27].mxu1  ;;  %v5928_v31 = vadd.f32 %v4192_v40, %v5772_v62 }
 0x2a9   : > { %v2684_v60 = vadd.f32 %v2683_v17, %v5916_v45  ;;  %v5920_v24 = vadd.f32 %v5772_v62, %v2633_v63 }
 0x2ab   : > { %v2685_v48 = vadd.f32 %v2684_v60, %v5920_v24 }
 0x2ad   : > { %v2686_v43 = vadd.f32 %v2685_v48, %v5924_v37 }
 0x2af   : > { %v2687_v9 = vadd.f32 %v2686_v43, %v5928_v31 }
 0x2b5   : > { %v4195_v13 = vpop.f32.mrb[28].mxu1 }
 0x2b6   : > { %v2646_v34 = vpop.f32.mrb[29].mxu1  ;;  %v5939_v57 = vadd.f32 %v4195_v13, %v5772_v62 }
 0x2b7   : > { %v5932_v39 = vadd.f32 %v5772_v62, %v2646_v34  ;;  %v4196_v35 = vpop.f32.mrb[30].mxu1 }
 0x2b8   : > { %v2649_v44 = vpop.f32.mrb[31].mxu1  ;;  %v5943_v54 = vadd.f32 %v4196_v35, %v5772_v62  ;;  %v4312_v35 = vmov 1983009808  }
 0x2b9   : > { %v2688_v28 = vadd.f32 %v2687_v9, %v5932_v39  ;;  %v5936_v41 = vadd.f32 %v5772_v62, %v2649_v44  ;;  %v2989_v44 = vunpack.c.l.s4 %v4312_v35 }
 0x2bb   : > { %v2689_v19 = vadd.f32 %v2688_v28, %v5936_v41  ;;  %v2990_v28 = vunpack.c.0.s8 %v2989_v44 }
 0x2bd   : > { %v2690_v5 = vadd.f32 %v2689_v19, %v5939_v57 }
 0x2bf   : > { %v2691_v11 = vadd.f32 %v2690_v5, %v5943_v54  ;;  %v6759_v5 = vld [vmem:[#allocation4_spill] sm:$0xff] }
 0x2c1   : > { %v2692_v7 = vrot.slane %v2691_v11, 4 }
 0x2c3   : > { %v2693_v36 = vadd.f32 %v2692_v7, %v2691_v11  ;;  %v5955_v7 = vsub.s32 %v2990_v28, %v6742_v42 }
 0x2c5   : > { %v2694_v6 = vrot.slane %v2693_v36, 2 }
 0x2c7   : > { %v2695_v22 = vadd.f32 %v2694_v6, %v2693_v36 }
 0x2c9   : > { %v2696_v33 = vrot.slane %v2695_v22, 1 }
 0x2cb   : > { %v2697_v21 = vadd.f32 %v2696_v33, %v2695_v22 }
 0x2cd   : > { %v2699_v0 = vmul.f32 0.00390625, %v2697_v21 }
 0x2cf   : > { %v2700_v29 = vpack.c.bf16 %v2699_v0, %v2699_v0 }
 0x2d1   : > { %4214 = vmatmul.mubr.bf16.vlgmr.msra.gmra.mrb[32].mxu0 %v2700_v29 }
 0x3a4   : > { %v2800_v23 = vpop.f32.mrb[32].mxu0 }
 0x3a5   : > { %v2801_v62 = vadd.f32 %v2800_v23, %v2717_v14  ;;  %v4215_v49 = vpop.f32.mrb[33].mxu0 }
 0x3a6   : > { %v2803_v38 = vpop.f32.mrb[34].mxu0 }
 0x3a7   : > { %v2806_v30 = vmax.f32 %v2801_v62, 0.0  ;;  %v4216_v3 = vpop.f32.mrb[35].mxu0 }
 0x3a9   : > { %v2807_v17 = vpack.c.bf16 %v2806_v30, %v2806_v30 }
 0x3ab   : > { %4234 = vmatmul.mubr.bf16.vlgmr.msra.gmra.mrb[32].mxu1 %v2807_v17 }
 0x47e   : > { %v2907_v40 = vpop.f32.mrb[32].mxu1 }
 0x47f   : > { %v2908_v63 = vadd.f32 %v2907_v40, %v2824_v61  ;;  %v4235_v60 = vpop.f32.mrb[33].mxu1 }
 0x480   : > { %v2910_v48 = vpop.f32.mrb[34].mxu1 }
 0x481   : > { %v4030_v43 = vmul.f32 -1.442695, %v2908_v63  ;;  %v4236_v13 = vpop.f32.mrb[35].mxu1 }
 0x483   : > { %4296 = vpow2.f32 %v4030_v43 }
 0x48d   : > { %v4297_v9 = vpop.eup %4296 }
 0x48e   : > { %v2916_v34 = vadd.f32 1.0, %v4297_v9 }
 0x490   : > { %4298 = vrcp.f32 %v2916_v34 }
 0x49a   : > { %v4299_v19 = vpop.eup %4298 }
 0x49b   : > { %v2922_v11 = vrot.slane %v4299_v19, %v6759_v5 }
 0x49d   : > { %v2923_v36 = vmul.f32 %v2922_v11, %v5778_v26  ;;  %v2924_v6 = vmul.f32 %v2922_v11, %v5775_v2  ;;  %v2925_v22 = vmul.f32 %v2922_v11, %v5792_v18  ;;  %v2926_v33 = vmul.f32 %v2922_v11, %v5803_v52 }
 0x49e   : > { %v2927_v21 = vmul.f32 %v2922_v11, %v5810_v16  ;;  %v2928_v0 = vmul.f32 %v2922_v11, %v5819_v55  ;;  %v2929_v29 = vmul.f32 %v2922_v11, %v5827_v46  ;;  %v2930_v14 = vmul.f32 %v2922_v11, %v5835_v53 }
 0x49f   : > { %v2931_v23 = vmul.f32 %v2922_v11, %v5842_v25  ;;  %v2932_v42 = vmul.f32 %v2922_v11, %v5851_v10  ;;  %v2933_v26 = vmul.f32 %v2922_v11, %v5859_v15  ;;  %v2934_v2 = vmul.f32 %v2922_v11, %v5864_v59 }
 0x4a0   : > { %v2935_v18 = vmul.f32 %v2922_v11, %v5867_v20  ;;  %v2936_v52 = vmul.f32 %v2922_v11, %v5872_v4  ;;  %v2937_v16 = vmul.f32 %v2922_v11, %v5876_v51  ;;  %v2938_v55 = vmul.f32 %v2922_v11, %v5880_v32 }
 0x4a1   : > { %v2939_v46 = vmul.f32 %v2922_v11, %v5883_v47  ;;  %v2940_v53 = vmul.f32 %v2922_v11, %v5888_v27  ;;  %v2941_v25 = vmul.f32 %v2922_v11, %v5892_v12  ;;  %v2942_v10 = vmul.f32 %v2922_v11, %v5896_v56 }
 0x4a2   : > { %v2943_v15 = vmul.f32 %v2922_v11, %v5899_v1  ;;  %v2944_v59 = vmul.f32 %v2922_v11, %v5904_v8  ;;  %v2945_v20 = vmul.f32 %v2922_v11, %v5908_v50  ;;  %v2946_v4 = vmul.f32 %v2922_v11, %v5912_v58 }
 0x4a3   : > { %v2947_v51 = vmul.f32 %v2922_v11, %v5916_v45  ;;  %v2948_v32 = vmul.f32 %v2922_v11, %v5920_v24  ;;  %v2949_v47 = vmul.f32 %v2922_v11, %v5924_v37  ;;  %v2950_v27 = vmul.f32 %v2922_v11, %v5928_v31 }
 0x4a4   : > { %v2951_v12 = vmul.f32 %v2922_v11, %v5932_v39  ;;  %v2952_v56 = vmul.f32 %v2922_v11, %v5936_v41  ;;  %v2955_v62 = vmax.f32 %v2923_v36, %v2925_v22  ;;  %v2956_v1 = vmax.f32 %v2924_v6, %v2926_v33 }
 0x4a5   : > { %v2953_v8 = vmul.f32 %v2922_v11, %v5939_v57  ;;  %v2954_v50 = vmul.f32 %v2922_v11, %v5943_v54  ;;  %v2957_v49 = vmax.f32 %v2927_v21, %v2929_v29  ;;  %v2958_v58 = vmax.f32 %v2928_v0, %v2930_v14 }
 0x4a6   : > { %v2959_v38 = vmax.f32 %v2931_v23, %v2933_v26  ;;  %v2960_v45 = vmax.f32 %v2932_v42, %v2934_v2  ;;  %v2961_v30 = vmax.f32 %v2935_v18, %v2937_v16  ;;  %v2962_v24 = vmax.f32 %v2936_v52, %v2938_v55 }
 0x4a7   : > { %v2963_v3 = vmax.f32 %v2939_v46, %v2941_v25  ;;  %v2964_v37 = vmax.f32 %v2940_v53, %v2942_v10  ;;  %v2965_v17 = vmax.f32 %v2943_v15, %v2945_v20  ;;  %v2966_v31 = vmax.f32 %v2944_v59, %v2946_v4 }
 0x4a8   : > { %v2987_v61 = vcombine.high %v2955_v62, %v2955_v62  ;;  %v5990_v39 = vrot.slane %v2955_v62, %v5955_v7  ;;  %v3004_v41 = vcombine.high %v2956_v1, %v2956_v1  ;;  %v5993_v40 = vrot.slane %v2956_v1, %v5955_v7 }
 0x4a9   : > { %v3021_v57 = vcombine.high %v2957_v49, %v2957_v49  ;;  %v5996_v54 = vrot.slane %v2957_v49, %v5955_v7  ;;  %v3038_v63 = vcombine.high %v2958_v58, %v2958_v58  ;;  %v5999_v60 = vrot.slane %v2958_v58, %v5955_v7 }
 0x4aa   : > { %v2967_v48 = vmax.f32 %v2947_v51, %v2949_v47  ;;  %v2968_v43 = vmax.f32 %v2948_v32, %v2950_v27  ;;  %v6001_v13 = vmax.f32 %v2951_v12, %v2953_v8  ;;  %v6004_v9 = vrot.slane %v2987_v61, %v5955_v7 }
 0x4ab   : > { %v6006_v34 = vmax.f32 %v2952_v56, %v2954_v50  ;;  %v3002_v35 = vcombine.high %v5990_v39, %v5990_v39  ;;  %v6011_v44 = vrot.slane %v3004_v41, %v5955_v7  ;;  %v3019_v28 = vcombine.high %v5993_v40, %v5993_v40 }
 0x4ac   : > { %v6016_v19 = vrot.slane %v3021_v57, %v5955_v7  ;;  %v3036_v5 = vcombine.high %v5996_v54, %v5996_v54  ;;  %v6021_v11 = vrot.slane %v3038_v63, %v5955_v7  ;;  %v3055_v36 = vcombine.high %v2959_v38, %v2959_v38 }
 0x4ad   : > { %v3053_v6 = vcombine.high %v5999_v60, %v5999_v60  ;;  %v6026_v22 = vrot.slane %v2959_v38, %v5955_v7  ;;  %v3072_v33 = vcombine.high %v2960_v45, %v2960_v45  ;;  %v6029_v21 = vrot.slane %v2960_v45, %v5955_v7 }
 0x4ae   : > { %v3003_v0 = vcombine.high %v6004_v9, %v6004_v9  ;;  %v6034_v29 = vrot.slane %v3055_v36, %v5955_v7  ;;  %v3089_v14 = vcombine.high %v2961_v30, %v2961_v30  ;;  %v6037_v23 = vrot.slane %v2961_v30, %v5955_v7 }
 0x4af   : > { %v3020_v42 = vcombine.high %v6011_v44, %v6011_v44  ;;  %v6042_v26 = vrot.slane %v3072_v33, %v5955_v7  ;;  %v3106_v2 = vcombine.high %v2962_v24, %v2962_v24  ;;  %v6045_v18 = vrot.slane %v2962_v24, %v5955_v7 }
 0x4b0   : > { %v3037_v52 = vcombine.high %v6016_v19, %v6016_v19  ;;  %v3054_v16 = vcombine.high %v6021_v11, %v6021_v11  ;;  %v6052_v55 = vrot.slane %v3089_v14, %v5955_v7  ;;  %v3123_v46 = vcombine.high %v2963_v3, %v2963_v3 }
 0x4b1   : > { %v6061_v15 = vrot.slane %v3106_v2, %v5955_v7  ;;  %v6068_v4 = vrot.slane %v2963_v3, %v5955_v7  ;;  %v3140_v51 = vcombine.high %v2964_v37, %v2964_v37  ;;  %v6076_v27 = vrot.slane %v2964_v37, %v5955_v7 }
 0x4b2   : > { %v6073_v47 = vrot.slane %v3123_v46, %v5955_v7  ;;  %v3157_v12 = vcombine.high %v2965_v17, %v2965_v17  ;;  %v6084_v1 = vrot.slane %v2965_v17, %v5955_v7  ;;  %v3174_v8 = vcombine.high %v2966_v31, %v2966_v31 }
 0x4b3   : > { %v6081_v62 = vrot.slane %v3140_v51, %v5955_v7  ;;  %v6092_v58 = vrot.slane %v2966_v31, %v5955_v7  ;;  %v3191_v38 = vcombine.high %v2967_v48, %v2967_v48  ;;  %v6100_v24 = vrot.slane %v2967_v48, %v5955_v7 }
 0x4b4   : > { %v6089_v49 = vrot.slane %v3157_v12, %v5955_v7  ;;  %v6097_v30 = vrot.slane %v3174_v8, %v5955_v7  ;;  %v3208_v3 = vcombine.high %v2968_v43, %v2968_v43  ;;  %v6110_v61 = vrot.slane %v2968_v43, %v5955_v7 }
 0x4b5   : > { %v6107_v31 = vrot.slane %v3191_v38, %v5955_v7  ;;  %v3225_v48 = vcombine.high %v6001_v13, %v6001_v13  ;;  %v3242_v14 = vcombine.high %v6006_v34, %v6006_v34  ;;  %v3324_v12 = vsel %vm3323_vm1, %v5990_v39, -inf }
 0x4b6   : > { %v6117_v63 = vrot.slane %v3208_v3, %v5955_v7  ;;  %v6141_v38 = vrot.slane %v6001_v13, %v5955_v7  ;;  %v3325_v3 = vrot.slane %v3324_v12, 4  ;;  %v3331_v2 = vsel %vm3323_vm1, %v3002_v35, -inf }
 0x4b7   : > { %v6148_v46 = vrot.slane %v3225_v48, %v5955_v7  ;;  %v6152_v51 = vrot.slane %v6006_v34, %v5955_v7  ;;  %v3332_v43 = vrot.slane %v3331_v2, 4  ;;  %v3338_v8 = vsel %vm3323_vm1, %v6004_v9, -inf }
 0x4b8   : > { %v6157_v13 = vrot.slane %v3242_v14, %v5955_v7  ;;  %v3326_v33 = vmax.f32 %v3324_v12, %v3325_v3  ;;  %v3339_v36 = vrot.slane %v3338_v8, 4  ;;  %v3345_v39 = vsel %vm3323_vm1, %v3003_v0, -inf }
 0x4b9   : > { %v3333_v35 = vmax.f32 %v3331_v2, %v3332_v43  ;;  %v3346_v48 = vrot.slane %v3345_v39, 4  ;;  %v3352_v34 = vsel %vm3323_vm1, %v5993_v40, -inf  ;;  %v3359_v57 = vsel %vm3323_vm1, %v3019_v28, -inf }
 0x4ba   : > { %v3327_v41 = vrot.slane %v3326_v33, 2  ;;  %v3340_v7 = vmax.f32 %v3338_v8, %v3339_v36  ;;  %v3353_v14 = vrot.slane %v3352_v34, 4  ;;  %v3360_v12 = vrot.slane %v3359_v57, 4 }
 0x4bb   : > { %v3334_v3 = vrot.slane %v3333_v35, 2  ;;  %v3347_v17 = vmax.f32 %v3345_v39, %v3346_v48  ;;  %v3366_v9 = vsel %vm3323_vm1, %v6011_v44, -inf  ;;  %v3373_v0 = vsel %vm3323_vm1, %v3020_v42, -inf }
 0x4bc   : > { %v3328_v43 = vmax.f32 %v3326_v33, %v3327_v41  ;;  %v3341_v2 = vrot.slane %v3340_v7, 2  ;;  %v3354_v37 = vmax.f32 %v3352_v34, %v3353_v14  ;;  %v3361_v40 = vmax.f32 %v3359_v57, %v3360_v12 }
 0x4bd   : > { %v3335_v45 = vmax.f32 %v3333_v35, %v3334_v3  ;;  %v3348_v28 = vrot.slane %v3347_v17, 2  ;;  %v3367_v50 = vrot.slane %v3366_v9, 4  ;;  %v3374_v36 = vrot.slane %v3373_v0, 4 }
 0x4be   : > { %v3329_v8 = vrot.slane %v3328_v43, 1  ;;  %v3342_v32 = vmax.f32 %v3340_v7, %v3341_v2  ;;  %v3355_v56 = vrot.slane %v3354_v37, 2  ;;  %v3362_v39 = vrot.slane %v3361_v40, 2 }
 0x4bf   : > { %v3336_v48 = vrot.slane %v3335_v45, 1  ;;  %v3349_v20 = vmax.f32 %v3347_v17, %v3348_v28  ;;  %v3368_v59 = vmax.f32 %v3366_v9, %v3367_v50  ;;  %v3375_v10 = vmax.f32 %v3373_v0, %v3374_v36 }
 0x4c0   : > { %v3343_v41 = vrot.slane %v3342_v32, 1  ;;  %v3356_v57 = vmax.f32 %v3354_v37, %v3355_v56  ;;  %v3363_v35 = vmax.f32 %v3361_v40, %v3362_v39  ;;  %v6183_v50 = vmax.f32 %v3328_v43, %v3329_v8 }
 0x4c1   : > { %v3350_v33 = vrot.slane %v3349_v20, 1  ;;  %v3369_v34 = vrot.slane %v3368_v59, 2  ;;  %v3376_v14 = vrot.slane %v3375_v10, 2  ;;  %v3380_v12 = vsel %vm3323_vm1, %v5996_v54, -inf }
 0x4c2   : > { %6760 = vst [vmem:[#allocation21_spill] sm:$0xff] %v6183_v50  ;;  %v6187_v3 = vmax.f32 %v3335_v45, %v3336_v48  ;;  %v3381_v56 = vrot.slane %v3380_v12, 4  ;;  %v6189_v37 = vmax.f32 %v3342_v32, %v3343_v41  ;;  %v3357_v2 = vrot.slane %v3356_v57, 1 }
 0x4c3   : > { %v3370_v9 = vmax.f32 %v3368_v59, %v3369_v34  ;;  %v3377_v0 = vmax.f32 %v3375_v10, %v3376_v14  ;;  %v3387_v40 = vsel %vm3323_vm1, %v3036_v5, -inf  ;;  %v3394_v43 = vsel %vm3323_vm1, %v6016_v19, -inf }
 0x4c4   : > { %6761 = vst [vmem:[#allocation5_spill] sm:$0xff] %v6187_v3  ;;  %6762 = vst [vmem:[#allocation20_spill] sm:$0xff] %v6189_v37  ;;  %v6197_v28 = vmax.f32 %v3349_v20, %v3350_v33  ;;  %v3364_v36 = vrot.slane %v3363_v35, 1  ;;  %v3382_v8 = vmax.f32 %v3380_v12, %v3381_v56  ;;  %v3388_v45 = vrot.slane %v3387_v40, 4 }
 0x4c5   : > { %v3395_v39 = vrot.slane %v3394_v43, 4  ;;  %v3401_v10 = vsel %vm3323_vm1, %v3037_v52, -inf  ;;  %v3408_v59 = vsel %vm3323_vm1, %v5999_v60, -inf  ;;  %v3415_v54 = vsel %vm3323_vm1, %v3053_v6, -inf }
 0x4c6   : > { %6763 = vst [vmem:[#allocation7_spill] sm:$0xff] %v6197_v28  ;;  %v3371_v5 = vrot.slane %v3370_v9, 1  ;;  %v3378_v20 = vrot.slane %v3377_v0, 1  ;;  %v3383_v32 = vrot.slane %v3382_v8, 2  ;;  %v3389_v48 = vmax.f32 %v3387_v40, %v3388_v45 }
 0x4c7   : > { %v3396_v41 = vmax.f32 %v3394_v43, %v3395_v39  ;;  %v3402_v33 = vrot.slane %v3401_v10, 4  ;;  %v3409_v34 = vrot.slane %v3408_v59, 4  ;;  %v3416_v14 = vrot.slane %v3415_v54, 4 }
 0x4c8   : > { %v3384_v12 = vmax.f32 %v3382_v8, %v3383_v32  ;;  %v3390_v19 = vrot.slane %v3389_v48, 2  ;;  %v3422_v52 = vsel %vm3323_vm1, %v6021_v11, -inf  ;;  %v3429_v60 = vsel %vm3323_vm1, %v3054_v16, -inf }
 0x4c9   : > { %v3397_v56 = vrot.slane %v3396_v41, 2  ;;  %v3403_v6 = vmax.f32 %v3401_v10, %v3402_v33  ;;  %v3410_v17 = vmax.f32 %v3408_v59, %v3409_v34  ;;  %v3417_v7 = vmax.f32 %v3415_v54, %v3416_v14 }
 0x4ca   : > { %v3385_v42 = vrot.slane %v3384_v12, 1  ;;  %v3391_v40 = vmax.f32 %v3389_v48, %v3390_v19  ;;  %v3423_v43 = vrot.slane %v3422_v52, 4  ;;  %v3430_v45 = vrot.slane %v3429_v60, 4 }
 0x4cb   : > { %v3398_v39 = vmax.f32 %v3396_v41, %v3397_v56  ;;  %v3404_v44 = vrot.slane %v3403_v6, 2  ;;  %v3411_v8 = vrot.slane %v3410_v17, 2  ;;  %v3418_v32 = vrot.slane %v3417_v7, 2 }
 0x4cc   : > { %v6215_v25 = vmax.f32 %v3356_v57, %v3357_v2  ;;  %v3392_v53 = vrot.slane %v3391_v40, 1  ;;  %v3424_v28 = vmax.f32 %v3422_v52, %v3423_v43  ;;  %v3431_v37 = vmax.f32 %v3429_v60, %v3430_v45 }
 0x4cd   : > { %v3399_v11 = vrot.slane %v3398_v39, 1  ;;  %v3405_v3 = vmax.f32 %v3403_v6, %v3404_v44  ;;  %v3412_v16 = vmax.f32 %v3410_v17, %v3411_v8  ;;  %v3419_v50 = vmax.f32 %v3417_v7, %v3418_v32 }
 0x4ce   : > { %v6217_v10 = vmax.f32 %v3363_v35, %v3364_v36  ;;  %v3425_v59 = vrot.slane %v3424_v28, 2  ;;  %v3432_v54 = vrot.slane %v3431_v37, 2  ;;  %v3436_v48 = vsel %vm3323_vm1, %v6026_v22, -inf }
 0x4cf   : > { %v6221_v41 = vmax.f32 %v3370_v9, %v3371_v5  ;;  %v6223_v33 = vmax.f32 %v3377_v0, %v3378_v20  ;;  %v6225_v57 = vmax.f32 %v3384_v12, %v3385_v42  ;;  %v3406_v2 = vrot.slane %v3405_v3, 1 }
 0x4d0   : > { %v3413_v34 = vrot.slane %v3412_v16, 1  ;;  %v3426_v14 = vmax.f32 %v3424_v28, %v3425_v59  ;;  %v3437_v19 = vrot.slane %v3436_v48, 4  ;;  %v6764_v44 = vcombine.high %v6026_v22, %v6026_v22 }
 0x4d1   : > { %v6231_v7 = vmax.f32 %v3391_v40, %v3392_v53  ;;  %v6233_v17 = vmax.f32 %v3398_v39, %v3399_v11  ;;  %v3420_v36 = vrot.slane %v3419_v50, 1  ;;  %v6235_v5 = vmax.f32 %v3405_v3, %v3406_v2 }
 0x4d2   : > { %v3443_v35 = vsel %vm3323_vm1, %v6764_v44, -inf  ;;  %v3433_v0 = vmax.f32 %v3431_v37, %v3432_v54  ;;  %v3438_v42 = vmax.f32 %v3436_v48, %v3437_v19  ;;  %v3450_v20 = vsel %vm3323_vm1, %v6034_v29, -inf }
 0x4d3   : > { %v3444_v9 = vrot.slane %v3443_v35, 4  ;;  %v3451_v12 = vrot.slane %v3450_v20, 4  ;;  %v6765_v22 = vcombine.high %v6034_v29, %v6034_v29  ;;  %v3464_v53 = vsel %vm3323_vm1, %v6029_v21, -inf }
 0x4d4   : > { %v6245_v60 = vmax.f32 %v3412_v16, %v3413_v34  ;;  %v3427_v56 = vrot.slane %v3426_v14, 1  ;;  %v3439_v3 = vrot.slane %v3438_v42, 2  ;;  %v3465_v43 = vrot.slane %v3464_v53, 4 }
 0x4d5   : > { %v3445_v28 = vmax.f32 %v3443_v35, %v3444_v9  ;;  %v3457_v52 = vsel %vm3323_vm1, %v6765_v22, -inf  ;;  %v3452_v40 = vmax.f32 %v3450_v20, %v3451_v12  ;;  %v6766_v45 = vcombine.high %v6029_v21, %v6029_v21 }
 0x4d6   : > { %v3458_v6 = vrot.slane %v3457_v52, 4  ;;  %v3440_v8 = vmax.f32 %v3438_v42, %v3439_v3  ;;  %v3478_v11 = vsel %vm3323_vm1, %v6042_v26, -inf  ;;  %v3466_v54 = vmax.f32 %v3464_v53, %v3465_v43 }
 0x4d7   : > { %v3446_v37 = vrot.slane %v3445_v28, 2  ;;  %v3471_v39 = vsel %vm3323_vm1, %v6766_v45, -inf  ;;  %v3453_v16 = vrot.slane %v3452_v40, 2  ;;  %v3479_v48 = vrot.slane %v3478_v11, 4 }
 0x4d8   : > { %v3459_v29 = vmax.f32 %v3457_v52, %v3458_v6  ;;  %v3472_v32 = vrot.slane %v3471_v39, 4  ;;  %v3434_v2 = vrot.slane %v3433_v0, 1  ;;  %v6767_v44 = vcombine.high %v6042_v26, %v6042_v26 }
 0x4d9   : > { %v3447_v59 = vmax.f32 %v3445_v28, %v3446_v37  ;;  %v3441_v35 = vrot.slane %v3440_v8, 1  ;;  %v3454_v9 = vmax.f32 %v3452_v40, %v3453_v16  ;;  %v3467_v42 = vrot.slane %v3466_v54, 2 }
 0x4da   : > { %v3460_v34 = vrot.slane %v3459_v29, 2  ;;  %v3473_v19 = vmax.f32 %v3471_v39, %v3472_v32  ;;  %v3485_v21 = vsel %vm3323_vm1, %v6767_v44, -inf  ;;  %v3480_v20 = vmax.f32 %v3478_v11, %v3479_v48 }
 0x4db   : > { %v3448_v12 = vrot.slane %v3447_v59, 1  ;;  %v3486_v3 = vrot.slane %v3485_v21, 4  ;;  %v6257_v28 = vmax.f32 %v3419_v50, %v3420_v36  ;;  %v3455_v53 = vrot.slane %v3454_v9, 1 }
 0x4dc   : > { %v3461_v22 = vmax.f32 %v3459_v29, %v3460_v34  ;;  %v3474_v52 = vrot.slane %v3473_v19, 2  ;;  %v3468_v6 = vmax.f32 %v3466_v54, %v3467_v42  ;;  %v3481_v37 = vrot.slane %v3480_v20, 2 }
 0x4dd   : > { %v3487_v39 = vmax.f32 %v3485_v21, %v3486_v3  ;;  %v3492_v26 = vsel %vm3323_vm1, %v6037_v23, -inf  ;;  %v6261_v32 = vmax.f32 %v3426_v14, %v3427_v56  ;;  %v6263_v40 = vmax.f32 %v3433_v0, %v3434_v2 }
 0x4de   : > { %v3462_v43 = vrot.slane %v3461_v22, 1  ;;  %v3475_v45 = vmax.f32 %v3473_v19, %v3474_v52  ;;  %v6265_v11 = vmax.f32 %v3440_v8, %v3441_v35  ;;  %v3493_v29 = vrot.slane %v3492_v26, 4 }
 0x4df   : > { %6768 = vst [vmem:[#allocation18_spill] sm:$0xff] %v6261_v32  ;;  %6769 = vst [vmem:[#allocation6_spill] sm:$0xff] %v6263_v40  ;;  %v6267_v16 = vmax.f32 %v3447_v59, %v3448_v12  ;;  %v3469_v50 = vrot.slane %v3468_v6, 1  ;;  %v3488_v36 = vrot.slane %v3487_v39, 2  ;;  %v6770_v54 = vcombine.high %v6037_v23, %v6037_v23 }
 0x4e0   : > { %v6273_v34 = vmax.f32 %v3454_v9, %v3455_v53  ;;  %v3482_v19 = vmax.f32 %v3480_v20, %v3481_v37  ;;  %v3494_v44 = vmax.f32 %v3492_v26, %v3493_v29  ;;  %v6275_v56 = vmax.f32 %v3461_v22, %v3462_v43 }
 0x4e1   : > { %v3499_v48 = vsel %vm3323_vm1, %v6770_v54, -inf  ;;  %v3476_v0 = vrot.slane %v3475_v45, 1  ;;  %v3506_v8 = vsel %vm3323_vm1, %v6052_v55, -inf  ;;  %v6771_v59 = vcombine.high %v6052_v55, %v6052_v55 }
 0x4e2   : > { %v3500_v14 = vrot.slane %v3499_v48, 4  ;;  %v3489_v21 = vmax.f32 %v3487_v39, %v3488_v36  ;;  %v3495_v23 = vrot.slane %v3494_v44, 2  ;;  %v3507_v42 = vrot.slane %v3506_v8, 4 }
 0x4e3   : > { %v3513_v2 = vsel %vm3323_vm1, %v6771_v59, -inf  ;;  %v6283_v9 = vmax.f32 %v3468_v6, %v3469_v50  ;;  %v3520_v12 = vsel %vm3323_vm1, %v6045_v18, -inf  ;;  %v6773_v22 = vcombine.high %v6045_v18, %v6045_v18 }
 0x4e4   : > { %v3501_v35 = vmax.f32 %v3499_v48, %v3500_v14  ;;  %v3514_v20 = vrot.slane %v3513_v2, 4  ;;  %v3496_v3 = vmax.f32 %v3494_v44, %v3495_v23  ;;  %v3508_v55 = vmax.f32 %v3506_v8, %v3507_v42 }
 0x4e5   : > { %6772 = vst [vmem:[#allocation19_spill] sm:$0xff] %v6283_v9  ;;  %v3527_v52 = vsel %vm3323_vm1, %v6773_v22, -inf  ;;  %v3521_v37 = vrot.slane %v3520_v12, 4  ;;  %v3483_v43 = vrot.slane %v3482_v19, 1  ;;  %v3534_v6 = vsel %vm3323_vm1, %v6061_v15, -inf }
 0x4e6   : > { %v3502_v53 = vrot.slane %v3501_v35, 2  ;;  %v3515_v39 = vmax.f32 %v3513_v2, %v3514_v20  ;;  %v3528_v26 = vrot.slane %v3527_v52, 4  ;;  %v3490_v29 = vrot.slane %v3489_v21, 1 }
 0x4e7   : > { %v3509_v36 = vrot.slane %v3508_v55, 2  ;;  %v3522_v54 = vmax.f32 %v3520_v12, %v3521_v37  ;;  %v3535_v59 = vrot.slane %v3534_v6, 4  ;;  %v6774_v18 = vcombine.high %v6061_v15, %v6061_v15 }
 0x4e8   : > { %v3503_v50 = vmax.f32 %v3501_v35, %v3502_v53  ;;  %v3516_v48 = vrot.slane %v3515_v39, 2  ;;  %v3529_v14 = vmax.f32 %v3527_v52, %v3528_v26  ;;  %v3497_v8 = vrot.slane %v3496_v3, 1 }
 0x4e9   : > { %v3541_v44 = vsel %vm3323_vm1, %v6774_v18, -inf  ;;  %v3510_v42 = vmax.f32 %v3508_v55, %v3509_v36  ;;  %v3523_v2 = vrot.slane %v3522_v54, 2  ;;  %v3536_v40 = vmax.f32 %v3534_v6, %v3535_v59 }
 0x4ea   : > { %v3504_v23 = vrot.slane %v3503_v50, 1  ;;  %v3517_v20 = vmax.f32 %v3515_v39, %v3516_v48  ;;  %v3530_v22 = vrot.slane %v3529_v14, 2  ;;  %v3542_v32 = vrot.slane %v3541_v44, 4 }
 0x4eb   : > { %v6297_v9 = vmax.f32 %v3475_v45, %v3476_v0  ;;  %v3511_v35 = vrot.slane %v3510_v42, 1  ;;  %v3524_v12 = vmax.f32 %v3522_v54, %v3523_v2  ;;  %v3548_v52 = vsel %vm3323_vm1, %v6068_v4, -inf }
 0x4ec   : > { %v6301_v53 = vmax.f32 %v3482_v19, %v3483_v43  ;;  %v3518_v15 = vrot.slane %v3517_v20, 1  ;;  %v3537_v37 = vrot.slane %v3536_v40, 2  ;;  %v3543_v26 = vmax.f32 %v3541_v44, %v3542_v32 }
 0x4ed   : > { %6775 = vst [vmem:[#allocation9_spill] sm:$0xff] %v6297_v9  ;;  %v6303_v18 = vmax.f32 %v3489_v21, %v3490_v29  ;;  %v6305_v55 = vmax.f32 %v3496_v3, %v3497_v8  ;;  %v3549_v39 = vrot.slane %v3548_v52, 4  ;;  %v6778_v6 = vcombine.high %v6068_v4, %v6068_v4 }
 0x4ee   : > { %6776 = vst [vmem:[#allocation8_spill] sm:$0xff] %v6301_v53  ;;  %v6311_v0 = vmax.f32 %v3503_v50, %v3504_v23  ;;  %v3525_v36 = vrot.slane %v3524_v12, 1  ;;  %v3531_v54 = vmax.f32 %v3529_v14, %v3530_v22  ;;  %v3544_v48 = vrot.slane %v3543_v26, 2 }
 0x4ef   : > { %6777 = vst [vmem:[#allocation11_spill] sm:$0xff] %v6303_v18  ;;  %v3555_v45 = vsel %vm3323_vm1, %v6778_v6, -inf  ;;  %v6313_v19 = vmax.f32 %v3510_v42, %v3511_v35  ;;  %v3550_v43 = vmax.f32 %v3548_v52, %v3549_v39  ;;  %v3562_v32 = vsel %vm3323_vm1, %v6073_v47, -inf }
 0x4f0   : > { %v3556_v59 = vrot.slane %v3555_v45, 4  ;;  %v6317_v21 = vmax.f32 %v3517_v20, %v3518_v15  ;;  %v3538_v3 = vmax.f32 %v3536_v40, %v3537_v37  ;;  %v3545_v29 = vmax.f32 %v3543_v26, %v3544_v48 }
 0x4f1   : > { %v3563_v44 = vrot.slane %v3562_v32, 4  ;;  %v3551_v4 = vrot.slane %v3550_v43, 2  ;;  %v6779_v50 = vcombine.high %v6073_v47, %v6073_v47  ;;  %v3576_v23 = vsel %vm3323_vm1, %v6076_v27, -inf }
 0x4f2   : > { %v3557_v8 = vmax.f32 %v3555_v45, %v3556_v59  ;;  %v6325_v42 = vmax.f32 %v3524_v12, %v3525_v36  ;;  %v3532_v2 = vrot.slane %v3531_v54, 1  ;;  %v3577_v40 = vrot.slane %v3576_v23, 4 }
 0x4f3   : > { %v3569_v14 = vsel %vm3323_vm1, %v6779_v50, -inf  ;;  %v3564_v22 = vmax.f32 %v3562_v32, %v3563_v44  ;;  %v3552_v20 = vmax.f32 %v3550_v43, %v3551_v4  ;;  %v6781_v15 = vcombine.high %v6076_v27, %v6076_v27 }
 0x4f4   : > { %6780 = vst [vmem:[#allocation10_spill] sm:$0xff] %v6325_v42  ;;  %v3570_v35 = vrot.slane %v3569_v14, 4  ;;  %v3558_v52 = vrot.slane %v3557_v8, 2  ;;  %v3539_v26 = vrot.slane %v3538_v3, 1  ;;  %v3546_v45 = vrot.slane %v3545_v29, 1 }
 0x4f5   : > { %v3583_v37 = vsel %vm3323_vm1, %v6781_v15, -inf  ;;  %v3565_v47 = vrot.slane %v3564_v22, 2  ;;  %v3578_v59 = vmax.f32 %v3576_v23, %v3577_v40  ;;  %v3590_v12 = vsel %vm3323_vm1, %v6081_v62, -inf }
 0x4f6   : > { %v3571_v39 = vmax.f32 %v3569_v14, %v3570_v35  ;;  %v3584_v6 = vrot.slane %v3583_v37, 4  ;;  %v3559_v48 = vmax.f32 %v3557_v8, %v3558_v52  ;;  %v3591_v44 = vrot.slane %v3590_v12, 4 }
 0x4f7   : > { %v3566_v36 = vmax.f32 %v3564_v22, %v3565_v47  ;;  %v3553_v4 = vrot.slane %v3552_v20, 1  ;;  %v3579_v18 = vrot.slane %v3578_v59, 2  ;;  %v6782_v27 = vcombine.high %v6081_v62, %v6081_v62 }
 0x4f8   : > { %v3572_v32 = vrot.slane %v3571_v39, 2  ;;  %v3585_v43 = vmax.f32 %v3583_v37, %v3584_v6  ;;  %v3560_v50 = vrot.slane %v3559_v48, 1  ;;  %v3592_v8 = vmax.f32 %v3590_v12, %v3591_v44 }
 0x4f9   : > { %v3597_v15 = vsel %vm3323_vm1, %v6782_v27, -inf  ;;  %v3567_v14 = vrot.slane %v3566_v36, 1  ;;  %v6337_v23 = vmax.f32 %v3531_v54, %v3532_v2  ;;  %v6339_v52 = vmax.f32 %v3538_v3, %v3539_v26 }
 0x4fa   : > { %v3573_v35 = vmax.f32 %v3571_v39, %v3572_v32  ;;  %v3586_v53 = vrot.slane %v3585_v43, 2  ;;  %v3598_v22 = vrot.slane %v3597_v15, 4  ;;  %v3604_v40 = vsel %vm3323_vm1, %v6084_v1, -inf }
 0x4fb   : > { %6783 = vst [vmem:[#allocation13_spill] sm:$0xff] %v6339_v52  ;;  %v6343_v37 = vmax.f32 %v3545_v29, %v3546_v45  ;;  %v3580_v6 = vmax.f32 %v3578_v59, %v3579_v18  ;;  %v3593_v42 = vrot.slane %v3592_v8, 2  ;;  %v6345_v62 = vmax.f32 %v3552_v20, %v3553_v4 }
 0x4fc   : > { %v3574_v47 = vrot.slane %v3573_v35, 1  ;;  %v3599_v27 = vmax.f32 %v3597_v15, %v3598_v22  ;;  %v3605_v9 = vrot.slane %v3604_v40, 4  ;;  %v6785_v39 = vcombine.high %v6084_v1, %v6084_v1 }
 0x4fd   : > { %6784 = vst [vmem:[#allocation12_spill] sm:$0xff] %v6343_v37  ;;  %v6351_v3 = vmax.f32 %v3559_v48, %v3560_v50  ;;  %v6353_v2 = vmax.f32 %v3566_v36, %v3567_v14  ;;  %v3587_v26 = vmax.f32 %v3585_v43, %v3586_v53  ;;  %v3594_v29 = vmax.f32 %v3592_v8, %v3593_v42 }
 0x4fe   : > { %v3611_v54 = vsel %vm3323_vm1, %v6785_v39, -inf  ;;  %v3600_v45 = vrot.slane %v3599_v27, 2  ;;  %v3606_v32 = vmax.f32 %v3604_v40, %v3605_v9  ;;  %v3618_v18 = vsel %vm3323_vm1, %v6089_v49, -inf }
 0x4ff   : > { %v3612_v12 = vrot.slane %v3611_v54, 4  ;;  %v6357_v20 = vmax.f32 %v3573_v35, %v3574_v47  ;;  %v3581_v59 = vrot.slane %v3580_v6, 1  ;;  %v3619_v4 = vrot.slane %v3618_v18, 4 }
 0x500   : > { %v3601_v1 = vmax.f32 %v3599_v27, %v3600_v45  ;;  %v3607_v15 = vrot.slane %v3606_v32, 2  ;;  %v6786_v48 = vcombine.high %v6089_v49, %v6089_v49  ;;  %v3632_v53 = vsel %vm3323_vm1, %v6092_v58, -inf }
 0x501   : > { %v3613_v44 = vmax.f32 %v3611_v54, %v3612_v12  ;;  %v3588_v42 = vrot.slane %v3587_v26, 1  ;;  %v3620_v43 = vmax.f32 %v3618_v18, %v3619_v4  ;;  %v3595_v14 = vrot.slane %v3594_v29, 1 }
 0x502   : > { %v3625_v36 = vsel %vm3323_vm1, %v6786_v48, -inf  ;;  %v3608_v35 = vmax.f32 %v3606_v32, %v3607_v15  ;;  %v3633_v8 = vrot.slane %v3632_v53, 4  ;;  %v6787_v22 = vcombine.high %v6092_v58, %v6092_v58 }
 0x503   : > { %v3614_v9 = vrot.slane %v3613_v44, 2  ;;  %v3626_v50 = vrot.slane %v3625_v36, 4  ;;  %v3621_v27 = vrot.slane %v3620_v43, 2  ;;  %v6369_v54 = vmax.f32 %v3580_v6, %v3581_v59 }
 0x504   : > { %v3639_v40 = vsel %vm3323_vm1, %v6787_v22, -inf  ;;  %v3602_v12 = vrot.slane %v3601_v1, 1  ;;  %v3634_v45 = vmax.f32 %v3632_v53, %v3633_v8  ;;  %v3646_v18 = vsel %vm3323_vm1, %v6097_v30, -inf }
 0x505   : > { %v3615_v47 = vmax.f32 %v3613_v44, %v3614_v9  ;;  %v3627_v49 = vmax.f32 %v3625_v36, %v3626_v50  ;;  %v3640_v39 = vrot.slane %v3639_v40, 4  ;;  %v3609_v4 = vrot.slane %v3608_v35, 1 }
 0x506   : > { %v3622_v48 = vmax.f32 %v3620_v43, %v3621_v27  ;;  %v6373_v37 = vmax.f32 %v3587_v26, %v3588_v42  ;;  %v3635_v58 = vrot.slane %v3634_v45, 2  ;;  %v3647_v52 = vrot.slane %v3646_v18, 4 }
 0x507   : > { %v3628_v32 = vrot.slane %v3627_v49, 2  ;;  %v3641_v15 = vmax.f32 %v3639_v40, %v3640_v39  ;;  %v6788_v44 = vcombine.high %v6097_v30, %v6097_v30  ;;  %v6379_v6 = vmax.f32 %v3594_v29, %v3595_v14 }
 0x508   : > { %v3616_v59 = vrot.slane %v3615_v47, 1  ;;  %v3636_v50 = vmax.f32 %v3634_v45, %v3635_v58  ;;  %v3648_v8 = vmax.f32 %v3646_v18, %v3647_v52  ;;  %v3660_v43 = vsel %vm3323_vm1, %v6100_v24, -inf }
 0x509   : > { %v3653_v36 = vsel %vm3323_vm1, %v6788_v44, -inf  ;;  %6789 = vst [vmem:[#allocation15_spill] sm:$0xff] %v6379_v6  ;;  %v3629_v53 = vmax.f32 %v3627_v49, %v3628_v32  ;;  %v3642_v9 = vrot.slane %v3641_v15, 2  ;;  %v6383_v26 = vmax.f32 %v3601_v1, %v3602_v12 }
 0x50a   : > { %v3654_v22 = vrot.slane %v3653_v36, 4  ;;  %v6385_v42 = vmax.f32 %v3608_v35, %v3609_v4  ;;  %v3623_v40 = vrot.slane %v3622_v48, 1  ;;  %v3661_v27 = vrot.slane %v3660_v43, 4 }
 0x50b   : > { %6790 = vst [vmem:[#allocation14_spill] sm:$0xff] %v6383_v26  ;;  %v3643_v30 = vmax.f32 %v3641_v15, %v3642_v9  ;;  %v3649_v39 = vrot.slane %v3648_v8, 2  ;;  %v6791_v29 = vcombine.high %v6100_v24, %v6100_v24  ;;  %v6391_v49 = vmax.f32 %v3615_v47, %v3616_v59 }
 0x50c   : > { %v3655_v44 = vmax.f32 %v3653_v36, %v3654_v22  ;;  %v3630_v52 = vrot.slane %v3629_v53, 1  ;;  %v3662_v45 = vmax.f32 %v3660_v43, %v3661_v27  ;;  %v3637_v32 = vrot.slane %v3636_v50, 1 }
 0x50d   : > { %v3667_v14 = vsel %vm3323_vm1, %v6791_v29, -inf  ;;  %v3650_v1 = vmax.f32 %v3648_v8, %v3649_v39  ;;  %v3674_v35 = vsel %vm3323_vm1, %v6107_v31, -inf  ;;  %v6395_v4 = vmax.f32 %v3622_v48, %v3623_v40 }
 0x50e   : > { %v3668_v18 = vrot.slane %v3667_v14, 4  ;;  %v3656_v12 = vrot.slane %v3655_v44, 2  ;;  %v3663_v15 = vrot.slane %v3662_v45, 2  ;;  %v3675_v36 = vrot.slane %v3674_v35, 4 }
 0x50f   : > { %6792 = vst [vmem:[#allocation17_spill] sm:$0xff] %v6395_v4  ;;  %v3644_v9 = vrot.slane %v3643_v30, 1  ;;  %v3651_v24 = vrot.slane %v3650_v1, 1  ;;  %v6793_v47 = vcombine.high %v6107_v31, %v6107_v31  ;;  %v3688_v22 = vsel %vm3323_vm1, %v6110_v61, -inf }
 0x510   : > { %v3669_v58 = vmax.f32 %v3667_v14, %v3668_v18  ;;  %v3657_v8 = vmax.f32 %v3655_v44, %v3656_v12  ;;  %v3676_v27 = vmax.f32 %v3674_v35, %v3675_v36  ;;  %v6403_v29 = vmax.f32 %v3629_v53, %v3630_v52 }
 0x511   : > { %v3681_v59 = vsel %vm3323_vm1, %v6793_v47, -inf  ;;  %v6405_v48 = vmax.f32 %v3636_v50, %v3637_v32  ;;  %v3689_v40 = vrot.slane %v3688_v22, 4  ;;  %v6795_v14 = vcombine.high %v6110_v61, %v6110_v61 }
 0x512   : > { %v3670_v43 = vrot.slane %v3669_v58, 2  ;;  %v3682_v39 = vrot.slane %v3681_v59, 4  ;;  %v3664_v31 = vmax.f32 %v3662_v45, %v3663_v15  ;;  %v3677_v47 = vrot.slane %v3676_v27, 2 }
 0x513   : > { %6794 = vst [vmem:[#allocation16_spill] sm:$0xff] %v6405_v48  ;;  %v3695_v18 = vsel %vm3323_vm1, %v6795_v14, -inf  ;;  %v6411_v6 = vmax.f32 %v3643_v30, %v3644_v9  ;;  %v3690_v44 = vmax.f32 %v3688_v22, %v3689_v40  ;;  %v3702_v53 = vsel %vm3323_vm1, %v6117_v63, -inf }
 0x514   : > { %v3671_v26 = vmax.f32 %v3669_v58, %v3670_v43  ;;  %v3683_v4 = vmax.f32 %v3681_v59, %v3682_v39  ;;  %v3696_v12 = vrot.slane %v3695_v18, 4  ;;  %v6415_v52 = vmax.f32 %v3650_v1, %v3651_v24 }
 0x515   : > { %6796 = vst [vmem:[#allocation3_spill] sm:$0xff] %v6411_v6  ;;  %v3658_v50 = vrot.slane %v3657_v8, 1  ;;  %v3678_v32 = vmax.f32 %v3676_v27, %v3677_v47  ;;  %v3691_v36 = vrot.slane %v3690_v44, 2  ;;  %v3703_v48 = vrot.slane %v3702_v53, 4 }
 0x516   : > { %6797 = vst [vmem:[#allocation4_spill] sm:$0xff] %v6415_v52  ;;  %v3684_v35 = vrot.slane %v3683_v4, 2  ;;  %v3697_v61 = vmax.f32 %v3695_v18, %v3696_v12  ;;  %v6798_v45 = vcombine.high %v6117_v63, %v6117_v63  ;;  %v3665_v30 = vrot.slane %v3664_v31, 1 }
 0x517   : > { %v3672_v58 = vrot.slane %v3671_v26, 1  ;;  %v3692_v22 = vmax.f32 %v3690_v44, %v3691_v36  ;;  %v3704_v39 = vmax.f32 %v3702_v53, %v3703_v48  ;;  %v3716_v1 = vsel %vm3323_vm1, %v6141_v38, -inf }
 0x518   : > { %v3709_v15 = vsel %vm3323_vm1, %v6798_v45, -inf  ;;  %v3685_v9 = vmax.f32 %v3683_v4, %v3684_v35  ;;  %v3698_v43 = vrot.slane %v3697_v61, 2  ;;  %v6423_v24 = vmax.f32 %v3657_v8, %v3658_v50 }
 0x519   : > { %v3710_v59 = vrot.slane %v3709_v15, 4  ;;  %v3679_v27 = vrot.slane %v3678_v32, 1  ;;  %v3717_v14 = vrot.slane %v3716_v1, 4  ;;  %v3705_v63 = vrot.slane %v3704_v39, 2 }
 0x51a   : > { %6799 = vst [vmem:[#allocation22_spill] sm:$0xff] %v6423_v24  ;;  %v3686_v18 = vrot.slane %v3685_v9, 1  ;;  %v3699_v47 = vmax.f32 %v3697_v61, %v3698_v43  ;;  %v6800_v12 = vcombine.high %v6141_v38, %v6141_v38  ;;  %v6429_v35 = vmax.f32 %v3664_v31, %v3665_v30 }
 0x51b   : > { %v3711_v40 = vmax.f32 %v3709_v15, %v3710_v59  ;;  %v3718_v48 = vmax.f32 %v3716_v1, %v3717_v14  ;;  %v6431_v36 = vmax.f32 %v3671_v26, %v3672_v58  ;;  %v3693_v8 = vrot.slane %v3692_v22, 1 }
 0x51c   : > { %v3723_v4 = vsel %vm3323_vm1, %v6800_v12, -inf  ;;  %v3706_v50 = vmax.f32 %v3704_v39, %v3705_v63  ;;  %v3730_v45 = vsel %vm3323_vm1, %v6148_v46, -inf  ;;  %v3700_v15 = vrot.slane %v3699_v47, 1 }
 0x51d   : > { %v3712_v44 = vrot.slane %v3711_v40, 2  ;;  %v3724_v53 = vrot.slane %v3723_v4, 4  ;;  %v3719_v61 = vrot.slane %v3718_v48, 2  ;;  %v3731_v43 = vrot.slane %v3730_v45, 4 }
 0x51e   : > { %v6435_v24 = vmax.f32 %v3678_v32, %v3679_v27  ;;  %v6437_v38 = vmax.f32 %v3685_v9, %v3686_v18  ;;  %v6801_v31 = vcombine.high %v6148_v46, %v6148_v46  ;;  %v3744_v26 = vsel %vm3323_vm1, %v6152_v51, -inf }
 0x51f   : > { %v3725_v59 = vmax.f32 %v3723_v4, %v3724_v53  ;;  %v3707_v58 = vrot.slane %v3706_v50, 1  ;;  %v3713_v39 = vmax.f32 %v3711_v40, %v3712_v44  ;;  %v3732_v14 = vmax.f32 %v3730_v45, %v3731_v43 }
 0x520   : > { %v3737_v30 = vsel %vm3323_vm1, %v6801_v31, -inf  ;;  %v6445_v63 = vmax.f32 %v3692_v22, %v3693_v8  ;;  %v3745_v4 = vrot.slane %v3744_v26, 4  ;;  %v6803_v32 = vcombine.high %v6152_v51, %v6152_v51 }
 0x521   : > { %v3726_v1 = vrot.slane %v3725_v59, 2  ;;  %v3738_v12 = vrot.slane %v3737_v30, 4  ;;  %v6451_v27 = vmax.f32 %v3699_v47, %v3700_v15  ;;  %v3720_v46 = vmax.f32 %v3718_v48, %v3719_v61 }
 0x522   : > { %6802 = vst [vmem:[#allocation23_spill] sm:$0xff] %v6445_v63  ;;  %v3751_v9 = vsel %vm3323_vm1, %v6803_v32, -inf  ;;  %v3733_v53 = vrot.slane %v3732_v14, 2  ;;  %v3746_v52 = vmax.f32 %v3744_v26, %v3745_v4  ;;  %v3758_v40 = vsel %vm3323_vm1, %v6157_v13, -inf  ;;  %v6805_v4 = vld [vmem:[#allocation21_spill] sm:$0xff] }
 0x523   : > { %v3727_v18 = vmax.f32 %v3725_v59, %v3726_v1  ;;  %v3739_v31 = vmax.f32 %v3737_v30, %v3738_v12  ;;  %v3752_v6 = vrot.slane %v3751_v9, 4  ;;  %v6455_v22 = vmax.f32 %v3706_v50, %v3707_v58 }
 0x524   : > { %v3714_v44 = vrot.slane %v3713_v39, 1  ;;  %v3734_v8 = vmax.f32 %v3732_v14, %v3733_v53  ;;  %v3759_v45 = vrot.slane %v3758_v40, 4  ;;  %v3747_v51 = vrot.slane %v3746_v52, 2 }
 0x525   : > { %v3740_v43 = vrot.slane %v3739_v31, 2  ;;  %v3753_v63 = vmax.f32 %v3751_v9, %v3752_v6  ;;  %v6804_v47 = vcombine.high %v6157_v13, %v6157_v13  ;;  %v3721_v15 = vrot.slane %v3720_v46, 1  ;;  %v6806_v6 = vld [vmem:[#allocation5_spill] sm:$0xff] }
 0x526   : > { %v3728_v61 = vrot.slane %v3727_v18, 1  ;;  %v3760_v59 = vmax.f32 %v3758_v40, %v3759_v45  ;;  %v3735_v26 = vrot.slane %v3734_v8, 1  ;;  %v6461_v58 = vmax.f32 %v3746_v52, %v3747_v51 }
 0x527   : > { %v3765_v48 = vsel %vm3323_vm1, %v6804_v47, -inf  ;;  %v3741_v1 = vmax.f32 %v3739_v31, %v3740_v43  ;;  %v3754_v50 = vrot.slane %v3753_v63, 2  ;;  %v3837_v32 = vsel %vm3836_vm2, %v6806_v6, %v6805_v4  ;;  %v6807_v31 = vld [vmem:[#allocation20_spill] sm:$0xff] }
 0x528   : > { %v3766_v30 = vrot.slane %v3765_v48, 4  ;;  %v3761_v14 = vrot.slane %v3760_v59, 2  ;;  %v6466_v13 = vmax.f32 %v3713_v39, %v3714_v44  ;;  %v3839_v43 = vsel %vm3838_vm3, %v6807_v31, %v3837_v32  ;;  %v6816_v31 = vld [vmem:[#allocation13_spill] sm:$0xff] }
 0x529   : > { %v3742_v9 = vrot.slane %v3741_v1, 1  ;;  %v6468_v53 = vmax.f32 %v3753_v63, %v3754_v50  ;;  %v3722_v52 = vmax.f32 %v3720_v46, %v3721_v15  ;;  %v3729_v51 = vmax.f32 %v3727_v18, %v3728_v61 }
 0x52a   : > { %v3767_v12 = vmax.f32 %v3765_v48, %v3766_v30  ;;  %v6470_v40 = vmax.f32 %v3760_v59, %v3761_v14  ;;  %v3736_v47 = vmax.f32 %v3734_v8, %v3735_v26  ;;  %v6808_v48 = vld [vmem:[#allocation7_spill] sm:$0xff]  ;;  %v3749_v39 = vrot.slane %v6461_v58, 1 }
 0x52b   : > { %v3841_v30 = vsel %vm3840_vm4, %v6808_v48, %v3839_v43  ;;  %v3743_v63 = vmax.f32 %v3741_v1, %v3742_v9  ;;  %v3756_v46 = vrot.slane %v6468_v53, 1  ;;  %v3850_v15 = vsel %vm3836_vm2, %v6231_v7, %v6225_v57  ;;  %v6815_v9 = vld [vmem:[#allocation11_spill] sm:$0xff] }
 0x52c   : > { %v3768_v45 = vrot.slane %v3767_v12, 2  ;;  %v3843_v59 = vsel %vm3842_vm5, %v6215_v25, %v3841_v30  ;;  %v3763_v18 = vrot.slane %v6470_v40, 1  ;;  %v3851_v61 = vsel %vm3838_vm3, %v6233_v17, %v3850_v15 }
 0x52d   : > { %v3845_v8 = vsel %vm3844_vm6, %v6217_v10, %v3843_v59  ;;  %v3857_v26 = vsel %vm3836_vm2, %v6267_v16, %v6265_v11  ;;  %v3864_v1 = vsel %vm3836_vm2, %v6311_v0, %v6305_v55  ;;  %v3852_v57 = vsel %vm3840_vm4, %v6235_v5, %v3851_v61  ;;  %v6809_v5 = vld [vmem:[#allocation19_spill] sm:$0xff]  ;;  %v6810_v55 = vld [vmem:[#allocation18_spill] sm:$0xff] }
 0x52e   : > { %v6478_v44 = vmax.f32 %v3767_v12, %v3768_v45  ;;  %v3847_v25 = vsel %vm3846_vm7, %v6221_v41, %v3845_v8  ;;  %v3858_v41 = vsel %vm3838_vm3, %v6273_v34, %v3857_v26  ;;  %v3853_v7 = vsel %vm3842_vm5, %v6245_v60, %v3852_v57  ;;  %v6813_v12 = vld [vmem:[#allocation6_spill] sm:$0xff]  ;;  %v6818_v59 = vld [vmem:[#allocation15_spill] sm:$0xff]  ;;  %v6819_v8 = vld [vmem:[#allocation17_spill] sm:$0xff] }
 0x52f   : > { %v3849_v50 = vsel %vm3848_vm8, %v6223_v33, %v3847_v25  ;;  %v3859_v17 = vsel %vm3840_vm4, %v6275_v56, %v3858_v41  ;;  %v3865_v11 = vsel %vm3838_vm3, %v6313_v19, %v3864_v1  ;;  %v3871_v16 = vsel %vm3836_vm2, %v6351_v3, %v6345_v62  ;;  %v6811_v19 = vld [vmem:[#allocation9_spill] sm:$0xff]  ;;  %v6812_v3 = vld [vmem:[#allocation10_spill] sm:$0xff]  ;;  %v6822_v41 = vld [vmem:[#allocation3_spill] sm:$0xff] }
 0x530   : > { %v3770_v10 = vrot.slane %v6478_v44, 1  ;;  %3907 = vst [vmem:[%s6485_s22] sm:$0xff] %v3849_v50  ;;  %v3854_v33 = vsel %vm3844_vm6, %v6257_v28, %v3853_v7  ;;  %v3860_v34 = vsel %vm3842_vm5, %v6809_v5, %v3859_v17  ;;  %v3866_v60 = vsel %vm3840_vm4, %v6317_v21, %v3865_v11  ;;  %v6814_v21 = vld [vmem:[#allocation8_spill] sm:$0xff]  ;;  %v6825_v17 = vld [vmem:[#allocation22_spill] sm:$0xff] }
 0x531   : > { %v3872_v56 = vsel %vm3838_vm3, %v6353_v2, %v3871_v16  ;;  %v3855_v0 = vsel %vm3846_vm7, %v6810_v55, %v3854_v33  ;;  %v3861_v62 = vsel %vm3844_vm6, %v6811_v19, %v3860_v34  ;;  %v3867_v28 = vsel %vm3842_vm5, %v6812_v3, %v3866_v60  ;;  %v6821_v50 = vld [vmem:[#allocation16_spill] sm:$0xff] }
 0x532   : > { %v3873_v14 = vsel %vm3840_vm4, %v6357_v20, %v3872_v56  ;;  %v3856_v4 = vsel %vm3848_vm8, %v6813_v12, %v3855_v0  ;;  %v3862_v6 = vsel %vm3846_vm7, %v6814_v21, %v3861_v62  ;;  %v3868_v2 = vsel %vm3844_vm6, %v6337_v23, %v3867_v28  ;;  %v6817_v23 = vld [vmem:[#allocation12_spill] sm:$0xff] }
 0x533   : > { %v3874_v32 = vsel %vm3842_vm5, %v6369_v54, %v3873_v14  ;;  %v3863_v45 = vsel %vm3848_vm8, %v6815_v9, %v3862_v6  ;;  %v3869_v43 = vsel %vm3846_vm7, %v6816_v31, %v3868_v2  ;;  %v3878_v48 = vsel %vm3836_vm2, %v6391_v49, %v6385_v42  ;;  %3908 = vst [vmem:[%s6485_s22 + $0x8] sm:$0xff] %v3856_v4  ;;  %v6824_v7 = vld [vmem:[#allocation4_spill] sm:$0xff] }
 0x534   : > { %v3875_v20 = vsel %vm3844_vm6, %v6373_v37, %v3874_v32  ;;  %v3870_v30 = vsel %vm3848_vm8, %v6817_v23, %v3869_v43  ;;  %v3879_v15 = vsel %vm3838_vm3, %v6819_v8, %v3878_v48  ;;  %v3885_v25 = vsel %vm3836_vm2, %v6431_v36, %v6429_v35  ;;  %3909 = vst [vmem:[%s6485_s22 + $0x10] sm:$0xff] %v3863_v45  ;;  %v6820_v37 = vld [vmem:[#allocation14_spill] sm:$0xff] }
 0x535   : > { %v3876_v54 = vsel %vm3846_vm7, %v6818_v59, %v3875_v20  ;;  %v3880_v42 = vsel %vm3840_vm4, %v6403_v29, %v3879_v15  ;;  %v3886_v49 = vsel %vm3838_vm3, %v6435_v24, %v3885_v25  ;;  %v3892_v26 = vsel %vm3836_vm2, %v3729_v51, %v3722_v52  ;;  %3910 = vst [vmem:[%s6485_s22 + $0x18] sm:$0xff] %v3870_v30  ;;  %v6823_v52 = vld [vmem:[#allocation23_spill] sm:$0xff] }
 0x536   : > { %v3877_v61 = vsel %vm3848_vm8, %v6820_v37, %v3876_v54  ;;  %v3750_v1 = vmax.f32 %v6461_v58, %v3749_v39  ;;  %v3881_v57 = vsel %vm3842_vm5, %v6821_v50, %v3880_v42  ;;  %v3887_v35 = vsel %vm3840_vm4, %v6437_v38, %v3886_v49 }
 0x537   : > { %v3893_v36 = vsel %vm3838_vm3, %v3736_v47, %v3892_v26  ;;  %3911 = vst [vmem:[%s6485_s22 + $0x20] sm:$0xff] %v3877_v61  ;;  %v3757_v29 = vmax.f32 %v6468_v53, %v3756_v46  ;;  %v3882_v24 = vsel %vm3844_vm6, %v6822_v41, %v3881_v57  ;;  %v3888_v58 = vsel %vm3842_vm5, %v6823_v52, %v3887_v35 }
 0x538   : > { %v3894_v51 = vsel %vm3840_vm4, %v3743_v63, %v3893_v36  ;;  %v3764_v39 = vmax.f32 %v6470_v40, %v3763_v18  ;;  %v3883_v38 = vsel %vm3846_vm7, %v6824_v7, %v3882_v24  ;;  %v3889_v47 = vsel %vm3844_vm6, %v6451_v27, %v3888_v58 }
 0x539   : > { %v3895_v53 = vsel %vm3842_vm5, %v3750_v1, %v3894_v51  ;;  %v3771_v46 = vmax.f32 %v6478_v44, %v3770_v10  ;;  %v3884_v11 = vsel %vm3848_vm8, %v6825_v17, %v3883_v38  ;;  %v3890_v16 = vsel %vm3846_vm7, %v6455_v22, %v3889_v47 }
 0x53a   : > { %v3896_v63 = vsel %vm3844_vm6, %v3757_v29, %v3895_v53  ;;  %v3891_v40 = vsel %vm3848_vm8, %v6466_v13, %v3890_v16  ;;  %3912 = vst [vmem:[%s6485_s22 + $0x28] sm:$0xff] %v3884_v11 }
 0x53b   : > { %v3897_v18 = vsel %vm3846_vm7, %v3764_v39, %v3896_v63  ;;  %3913 = vst [vmem:[%s6485_s22 + $0x30] sm:$0xff] %v3891_v40 }
 0x53c   : > { %v3898_v27 = vsel %vm3848_vm8, %v3771_v46, %v3897_v18 }
 0x53d   : > { %3914 = vst [vmem:[%s6485_s22 + $0x38] sm:$0xff] %v3898_v27 }
 0x53e PF: > { %s21_s17 = sadd.s32 1, %s4308_s17  }
 0x53f   : > { %p18_p4 = scmp.ge.s32.totalorder %s21_s17, 4  }
 0x541   :  { %20 = sbr.rel (!%p18_p4) target bundleno = 1 (0x1), region = 94 }

</bundles_post_ra>
